<compile_context>
chip_gen: v6e
topology: v6e:2x2x1
jax: 0.10.0
libtpu: 0.0.40
codegen_flags: <defaults>
</compile_context>

<pallas_src>
import functools

import jax
import jax.numpy as jnp
from jax.experimental import pallas as pl
from jax.experimental.pallas import tpu as pltpu

# ----------------------- small test hyper-parameters ------------------------
D = 32            # dims             (module default 256)
NHEAD = 4         # transformer heads
FF = 128          # dim_feedforward
DOWN = 4          # down_scale
ST = 4            # dwconv_stride
ORI_H = 32
ORI_W = 32
NOW_H = ORI_H // DOWN          # H' = 8
NOW_W = ORI_W // DOWN          # W' = 8
DW_H = NOW_H // ST             # 2
DW_W = NOW_W // ST             # 2
TRANS_LAYERS = 1
B, T, NPTS = 2, 3, 16
LN_EPS = 1e-5
BN_EPS = 1e-5
VMEM_LIMIT = 32 * 1024 * 1024  # explicit scoped-VMEM request (safe on v5e/v6e/v7x)


# =============================== Pallas kernels ==============================
def _anyview_core_kernel(xs_ref, wdown_ref, pe_ref,
                         wq_ref, bq_ref, wk_ref, bk_ref, wv_ref, bv_ref,
                         wo_ref, bo_ref, ln1g_ref, ln1b_ref,
                         w1_ref, b1_ref, w2_ref, b2_ref, ln2g_ref, ln2b_ref,
                         wup_ref, bup_ref, o_ref,
                         *, bc, tc, s0, nhead, head_dim, n_layers, eps):
    """conv_down + adjacency build + encoder layers + combine + conv_up, fused."""
    f32 = jnp.float32
    bf16 = jnp.bfloat16
    dm = nhead * head_dim
    seq = 2 * s0
    bt = bc * tc
    rows = bt * seq
    scale = 1.0 / (head_dim ** 0.5)

    # ---- conv_down: depthwise scale folded into the 1x1 pointwise -> one matmul
    xd = jnp.dot(xs_ref[...], wdown_ref[...], preferred_element_type=f32)   # (bt*s0, dm)

    # ---- adjacency build (one_side=True), adj1 columns only (see dedup note).
    #      Row order: column (b, t), then slot in {self, next-frame}, then s0.
    #      Built with 2-D row slices + one sublane concat (no sub-8 reshapes).
    pieces = []
    for b in range(bc):
        for t in range(tc):
            r_self = (b * tc + t) * s0
            r_next = (b * tc + (t + 1) % tc) * s0
            pieces.append(xd[r_self:r_self + s0])     # slot 0: self tokens
            pieces.append(xd[r_next:r_next + s0])     # slot 1: next-frame tokens
    src = jnp.concatenate(pieces, axis=0)             # (rows, dm)

    pe = pe_ref[...]                                  # (seq, dm), torch .repeat tiling

    for l in range(n_layers):
        # ---- self-attention (DETR post-norm layer, dropout = identity at eval)
        qk_in = (src.reshape(bt, seq, dm) + pe).reshape(rows, dm).astype(bf16)
        src_b = src.astype(bf16)
        q = (jnp.dot(qk_in, wq_ref[l], preferred_element_type=f32) + bq_ref[l]) * scale
        k = jnp.dot(qk_in, wk_ref[l], preferred_element_type=f32) + bk_ref[l]
        v = jnp.dot(src_b, wv_ref[l], preferred_element_type=f32) + bv_ref[l]

        # heads stacked along the batch axis: ONE score einsum, ONE softmax,
        # ONE PV einsum, ONE (rows, dm)@(dm, dm) out-projection matmul.
        def split_heads(x):
            x3 = x.reshape(bt, seq, dm)
            return jnp.concatenate(
                [x3[:, :, h * head_dim:(h + 1) * head_dim] for h in range(nhead)],
                axis=0)                                # (nhead*bt, seq, head_dim)

        qh, kh, vh = split_heads(q), split_heads(k), split_heads(v)
        s = jnp.einsum("bqd,bkd->bqk", qh.astype(bf16), kh.astype(bf16),
                       preferred_element_type=f32)     # (nhead*bt, seq, seq) f32
        m = jnp.max(s, axis=-1, keepdims=True)
        p = jnp.exp(s - m)
        p = p * pl.reciprocal(jnp.sum(p, axis=-1, keepdims=True), approx=True)
        oh = jnp.einsum("bqk,bkd->bqd", p.astype(bf16), vh.astype(bf16),
                        preferred_element_type=f32)    # (nhead*bt, seq, head_dim)
        o_cat = jnp.concatenate(
            [oh[h * bt:(h + 1) * bt] for h in range(nhead)], axis=-1)  # (bt, seq, dm)
        attn = jnp.dot(o_cat.reshape(rows, dm).astype(bf16), wo_ref[l],
                       preferred_element_type=f32) + bo_ref[l]

        # residual + LayerNorm1 (f32)
        x = src + attn
        mu = jnp.mean(x, axis=-1, keepdims=True)
        xc = x - mu
        var = jnp.mean(xc * xc, axis=-1, keepdims=True)
        x = xc * jax.lax.rsqrt(var + eps) * ln1g_ref[l] + ln1b_ref[l]

        # FFN + residual + LayerNorm2
        h1 = jnp.dot(x.astype(bf16), w1_ref[l], preferred_element_type=f32) + b1_ref[l]
        h1 = jnp.maximum(h1, 0.0)
        ff = jnp.dot(h1.astype(bf16), w2_ref[l], preferred_element_type=f32) + b2_ref[l]
        yr = x + ff
        mu = jnp.mean(yr, axis=-1, keepdims=True)
        yc = yr - mu
        var = jnp.mean(yc * yc, axis=-1, keepdims=True)
        src = yc * jax.lax.rsqrt(var + eps) * ln2g_ref[l] + ln2b_ref[l]

    # ---- combine:  y[b, t] = adj1_out[b, t, slot0] + adj2_out[b, t, slot1]
    #                        = adj1_out[b, t, slot0] + adj1_out[b, (t-1)%T, slot1]
    self_rows, prev_rows = [], []
    for b in range(bc):
        for t in range(tc):
            c_self = b * tc + t
            c_prev = b * tc + (t - 1) % tc
            self_rows.append(src[c_self * seq: c_self * seq + s0])
            prev_rows.append(src[c_prev * seq + s0: c_prev * seq + seq])
    y = jnp.concatenate(self_rows, axis=0) + jnp.concatenate(prev_rows, axis=0)  # (bt*s0, dm)

    # ---- conv_up pointwise: 16 offset-scaled copies folded along N -> lane-dense store
    o_ref[...] = (jnp.dot(y.astype(bf16), wup_ref[...], preferred_element_type=f32)
                  + bup_ref[...])


def _pc_proj_kernel(g_ref, pc_ref, w1_ref, b1_ref, w2_ref, b2_ref, o_ref):
    """Fused im_out_proj (2x Conv1d-k1+BN+ReLU, BN folded) + residual add."""
    f32 = jnp.float32
    h = jnp.dot(g_ref[...], w1_ref[...], preferred_element_type=f32) + b1_ref[...]
    h = jnp.maximum(h, 0.0)
    h = jnp.dot(h.astype(jnp.bfloat16), w2_ref[...], preferred_element_type=f32) + b2_ref[...]
    h = jnp.maximum(h, 0.0)
    o_ref[...] = pc_ref[...] + h


def pc_out_proj(g, pc, w1, b1, w2, b2):
    """g, pc: (M, C).  M-tiled when large (keeps VMEM bounded on v7x)."""
    M, C = g.shape
    bf16 = jnp.bfloat16
    tm = 256 if (M > 256 and M % 256 == 0) else M
    row = lambda i: (i, 0)
    full = lambda i: (0, 0)
    return pl.pallas_call(
        _pc_proj_kernel,
        grid=(M // tm,),
        in_specs=[pl.BlockSpec((tm, C), row), pl.BlockSpec((tm, C), row),
                  pl.BlockSpec((C, C), full), pl.BlockSpec((1, C), full),
                  pl.BlockSpec((C, C), full), pl.BlockSpec((1, C), full)],
        out_specs=pl.BlockSpec((tm, C), row),
        out_shape=jax.ShapeDtypeStruct((M, C), jnp.float32),
        compiler_params=pltpu.CompilerParams(
            dimension_semantics=("parallel",), vmem_limit_bytes=VMEM_LIMIT),
    )(g.astype(bf16), pc.astype(jnp.float32),
      w1.astype(bf16), b1.reshape(1, -1).astype(jnp.float32),
      w2.astype(bf16), b2.reshape(1, -1).astype(jnp.float32))


# ============================ model components ===============================
def run_anyview_core(x, params):
    """x: (B, T, H', W', C) channels-last -> (B, T, H', W', C)."""
    Bc, Tc, nH, nW, C = x.shape
    dwH, dwW = nH // ST, nW // ST
    S0 = dwH * dwW
    seq = 2 * S0
    M0 = Bc * Tc * S0
    Nup = ST * ST * C
    bf16 = jnp.bfloat16

    # strided sample for the k=1 stride-4 depthwise conv (glue: one XLA slice)
    xs = x[:, :, ::ST, ::ST, :].reshape(M0, C)

    # conv_down: fold depthwise scale into the pointwise weight
    w_down = (params["conv_down_dw"][:, None] * params["conv_down_pw"].T).astype(bf16)

    # positional encoding, faithful to the torch .repeat() tiling semantics:
    # PE[s] = PE_T[s % 2] + PE_H[s % dwH] + PE_W[s % dwW]; passed UN-tiled.
    s_idx = jnp.arange(seq)
    pe = (params["pe_t"][s_idx % params["pe_t"].shape[0], 0]
          + params["pe_h"][s_idx % params["pe_h"].shape[0], 0]
          + params["pe_w"][s_idx % params["pe_w"].shape[0], 0]).astype(jnp.float32)

    # stacked per-layer encoder weights (L, ...); MXU operands in bf16
    L = len(params["layers"])
    stk = lambda fn: jnp.stack([fn(lp) for lp in params["layers"]])
    wq = stk(lambda lp: lp["in_proj_w"][:C].T).astype(bf16)
    bq = stk(lambda lp: lp["in_proj_b"][:C]).reshape(L, 1, C).astype(jnp.float32)
    wk = stk(lambda lp: lp["in_proj_w"][C:2 * C].T).astype(bf16)
    bk = stk(lambda lp: lp["in_proj_b"][C:2 * C]).reshape(L, 1, C).astype(jnp.float32)
    wv = stk(lambda lp: lp["in_proj_w"][2 * C:].T).astype(bf16)
    bv = stk(lambda lp: lp["in_proj_b"][2 * C:]).reshape(L, 1, C).astype(jnp.float32)
    wo = stk(lambda lp: lp["out_proj_w"].T).astype(bf16)
    bo = stk(lambda lp: lp["out_proj_b"]).reshape(L, 1, C).astype(jnp.float32)
    w1 = stk(lambda lp: lp["lin1_w"].T).astype(bf16)
    b1 = stk(lambda lp: lp["lin1_b"]).reshape(L, 1, -1).astype(jnp.float32)
    w2 = stk(lambda lp: lp["lin2_w"].T).astype(bf16)
    b2 = stk(lambda lp: lp["lin2_b"]).reshape(L, 1, C).astype(jnp.float32)
    ln1g = stk(lambda lp: lp["ln1_g"]).reshape(L, 1, C).astype(jnp.float32)
    ln1b = stk(lambda lp: lp["ln1_b"]).reshape(L, 1, C).astype(jnp.float32)
    ln2g = stk(lambda lp: lp["ln2_g"]).reshape(L, 1, C).astype(jnp.float32)
    ln2b = stk(lambda lp: lp["ln2_b"]).reshape(L, 1, C).astype(jnp.float32)
    ffdim = w1.shape[-1]

    # conv_up: ConvTranspose2d(k=3, stride=4, out_pad=1, groups=C) + 1x1 pointwise,
    # stride >= k so no tap overlap -> 16 scaled copies of one pointwise matmul.
    dw = params["conv_up_dw"]
    scal = jnp.zeros((ST, ST, C), jnp.float32).at[:3, :3, :].set(jnp.transpose(dw, (1, 2, 0)))
    wpw_t = params["conv_up_pw"].T
    w_up = ((scal.reshape(ST * ST, C)[:, :, None] * wpw_t[None]).transpose(1, 0, 2)
            .reshape(C, Nup)).astype(bf16)
    b_eff = params["conv_up_pw"] @ params["conv_up_dw_bias"]
    b_up = jnp.tile(b_eff, ST * ST).reshape(1, Nup).astype(jnp.float32)

    # work-size-gated megacore split over batches: only shard when per-core
    # encoder rows are large enough to amortize the per-step grid overhead
    # (single grid step on v5e/v6e and on v7x at small sizes).
    ncore = 2 if (Bc % 2 == 0
                  and (Bc // 2) * Tc * seq >= 512
                  and ((Bc // 2) * Tc * S0) % 8 == 0) else 1
    bc_blk = Bc // ncore
    M0b = M0 // ncore

    def wspec(shape):
        nd = len(shape)
        return pl.BlockSpec(shape, lambda i, _n=nd: (0,) * _n)

    kernel = functools.partial(
        _anyview_core_kernel, bc=bc_blk, tc=Tc, s0=S0,
        nhead=NHEAD, head_dim=C // NHEAD, n_layers=L, eps=LN_EPS)

    out = pl.pallas_call(
        kernel,
        grid=(ncore,),
        in_specs=[
            pl.BlockSpec((M0b, C), lambda i: (i, 0)),        # xs
            wspec((C, C)),                                    # w_down
            wspec((seq, C)),                                  # pe (un-tiled)
            wspec((L, C, C)), wspec((L, 1, C)),               # wq, bq
            wspec((L, C, C)), wspec((L, 1, C)),               # wk, bk
            wspec((L, C, C)), wspec((L, 1, C)),               # wv, bv
            wspec((L, C, C)), wspec((L, 1, C)),               # wo, bo
            wspec((L, 1, C)), wspec((L, 1, C)),               # ln1 g, b
            wspec((L, C, ffdim)), wspec((L, 1, ffdim)),       # w1, b1
            wspec((L, ffdim, C)), wspec((L, 1, C)),           # w2, b2
            wspec((L, 1, C)), wspec((L, 1, C)),               # ln2 g, b
            wspec((C, Nup)), wspec((1, Nup)),                 # w_up, b_up
        ],
        out_specs=pl.BlockSpec((M0b, Nup), lambda i: (i, 0)),
        out_shape=jax.ShapeDtypeStruct((M0, Nup), jnp.float32),
        compiler_params=pltpu.CompilerParams(
            dimension_semantics=("parallel",), vmem_limit_bytes=VMEM_LIMIT),
    )(xs.astype(bf16), w_down, pe,
      wq, bq, wk, bk, wv, bv, wo, bo, ln1g, ln1b, w1, b1, w2, b2, ln2g, ln2b,
      w_up, b_up)
    # TODO(synk): at production D=256 / large H'xW' the fused encoder block no
    # longer fits one VMEM step; split the grid further over (b, t) columns.

    # (kh, kw) interleave of the 16 deconv offsets (wrapper layout glue only)
    y = out.reshape(Bc, Tc, dwH, dwW, ST, ST, C)
    y = y.transpose(0, 1, 2, 4, 3, 5, 6).reshape(Bc, Tc, nH, nW, C)
    return y


def anyview_former_forward(params, image_feats, view_mask, pc_feats, pc_inds):
    """image_feats:(B,T,C,H',W') view_mask:(B,T) pc_feats:(B,C,N) pc_inds:(B,N)."""
    del view_mask  # TODO(synk): Is_mask=True attention-mask path not implemented
    Bc, Tc, C, nH, nW = image_feats.shape
    Nn = pc_inds.shape[1]

    t_i = pc_inds // (ORI_W * ORI_H)
    h_i = (pc_inds % (ORI_W * ORI_H)) // ORI_W
    w_i = (pc_inds % (ORI_W * ORI_H)) % ORI_W
    h_i = h_i // DOWN
    w_i = w_i // DOWN
    inds = t_i * (nH * nW) + h_i * nW + w_i                 # (B, N) downscaled indices

    # channels-last rows (B, L, C); same L indexing as the torch (B, C, L) view
    x = image_feats.transpose(0, 1, 3, 4, 2).reshape(Bc, Tc * nH * nW, C)
    pc_rows = pc_feats.transpose(0, 2, 1)                   # (B, N, C)
    b_idx = jnp.arange(Bc)[:, None]

    # TODO(synk): dynamic scatter/gather kept as XLA ops to preserve torch
    # scatter_ (overwrite) semantics on duplicate indices.
    scat = jnp.zeros_like(x).at[b_idx, inds].set(pc_rows)   # set-then-add, as in torch
    x = (x + scat).reshape(Bc, Tc, nH, nW, C)

    y = run_anyview_core(x, params).reshape(Bc, Tc * nH * nW, C)
    g = jnp.take_along_axis(y, inds[:, :, None], axis=1)    # (B, N, C)

    out = pc_out_proj(g.reshape(Bc * Nn, C), pc_rows.reshape(Bc * Nn, C),
                      params["proj_w1_eff"], params["proj_b1_eff"],
                      params["proj_w2_eff"], params["proj_b2_eff"])
    return out.reshape(Bc, Nn, C).transpose(0, 2, 1)        # (B, C, N)


# ============================= parameter init ================================
def make_params(key):
    ks = iter(jax.random.split(key, 64))

    def nrm(shape, s=0.1):
        return s * jax.random.normal(next(ks), shape, jnp.float32)

    def layer_params():
        return dict(
            in_proj_w=nrm((3 * D, D)), in_proj_b=nrm((3 * D,), 0.01),
            out_proj_w=nrm((D, D)), out_proj_b=nrm((D,), 0.01),
            lin1_w=nrm((FF, D)), lin1_b=nrm((FF,), 0.01),
            lin2_w=nrm((D, FF)), lin2_b=nrm((D,), 0.01),
            ln1_g=1.0 + nrm((D,), 0.01), ln1_b=nrm((D,), 0.01),
            ln2_g=1.0 + nrm((D,), 0.01), ln2_b=nrm((D,), 0.01),
        )

    params = dict(
        pe_t=jax.random.normal(next(ks), (2, 1, D), jnp.float32),
        pe_h=jax.random.normal(next(ks), (DW_H, 1, D), jnp.float32),
        pe_w=jax.random.normal(next(ks), (DW_W, 1, D), jnp.float32),
        conv_down_dw=nrm((D,)),                 # Conv2d(D,D,1,groups=D) weight (D,1,1,1)
        conv_down_pw=nrm((D, D)),               # 1x1 pointwise, no bias
        conv_up_dw=nrm((D, 3, 3)),              # ConvTranspose2d(D,D,3,groups=D) weight
        conv_up_dw_bias=nrm((D,), 0.01),        # ConvTranspose2d bias (default True)
        conv_up_pw=nrm((D, D)),                 # 1x1 pointwise, no bias
        layers=[layer_params() for _ in range(TRANS_LAYERS)],
    )

    # im_out_proj: Conv1d(D,D,1,bias=False) + BN1d + ReLU, twice; fold BN (eval).
    for i in (1, 2):
        w = nrm((D, D))
        gamma = 1.0 + nrm((D,), 0.1)
        beta = nrm((D,), 0.1)
        mean = jnp.zeros((D,), jnp.float32)
        var = jnp.ones((D,), jnp.float32)
        scale = gamma / jnp.sqrt(var + BN_EPS)
        params[f"proj_w{i}_eff"] = (w * scale[:, None]).T   # (C_in, C_out)
        params[f"proj_b{i}_eff"] = beta - mean * scale
    return params


# =================================== main ====================================
if __name__ == "__main__":
    key = jax.random.PRNGKey(0)
    k_params, k_img, k_pc, k_idx = jax.random.split(key, 4)

    params = make_params(k_params)

    image_feats = jax.random.normal(k_img, (B, T, D, NOW_H, NOW_W), jnp.float32)
    view_mask = jnp.ones((B, T), jnp.float32)
    pc_feats = jax.random.normal(k_pc, (B, D, NPTS), jnp.float32)

    # pc_inds: full-resolution indices in [0, T*ORI_H*ORI_W) whose downscaled
    # cells are unique per batch (scatter on duplicates is order-dependent).
    L_down = T * NOW_H * NOW_W
    inds_down = jnp.stack([
        jax.random.permutation(jax.random.fold_in(k_idx, b), L_down)[:NPTS]
        for b in range(B)
    ])
    t_ = inds_down // (NOW_H * NOW_W)
    rem = inds_down % (NOW_H * NOW_W)
    h_, w_ = rem // NOW_W, rem % NOW_W
    pc_inds = (t_ * (ORI_H * ORI_W) + (h_ * DOWN) * ORI_W + (w_ * DOWN)).astype(jnp.int32)

    fwd = jax.jit(anyview_former_forward)
    out = fwd(params, image_feats, view_mask, pc_feats, pc_inds)
    out = jax.block_until_ready(out)

    assert out.shape == (B, D, NPTS), out.shape
    assert bool(jnp.all(jnp.isfinite(out)))
    print("KERNEL_OK")
</pallas_src>

<mosaic_0001>
module attributes {stable_mosaic.version = 11 : i64} {
  func.func @_anyview_core_kernel(%arg0: i32, %arg1: memref<24x32xbf16, #tpu.memory_space<vmem>>, %arg2: memref<32x32xbf16, #tpu.memory_space<vmem>>, %arg3: memref<8x32xf32, #tpu.memory_space<vmem>>, %arg4: memref<1x32x32xbf16, #tpu.memory_space<vmem>>, %arg5: memref<1x1x32xf32, #tpu.memory_space<vmem>>, %arg6: memref<1x32x32xbf16, #tpu.memory_space<vmem>>, %arg7: memref<1x1x32xf32, #tpu.memory_space<vmem>>, %arg8: memref<1x32x32xbf16, #tpu.memory_space<vmem>>, %arg9: memref<1x1x32xf32, #tpu.memory_space<vmem>>, %arg10: memref<1x32x32xbf16, #tpu.memory_space<vmem>>, %arg11: memref<1x1x32xf32, #tpu.memory_space<vmem>>, %arg12: memref<1x1x32xf32, #tpu.memory_space<vmem>>, %arg13: memref<1x1x32xf32, #tpu.memory_space<vmem>>, %arg14: memref<1x32x128xbf16, #tpu.memory_space<vmem>>, %arg15: memref<1x1x128xf32, #tpu.memory_space<vmem>>, %arg16: memref<1x128x32xbf16, #tpu.memory_space<vmem>>, %arg17: memref<1x1x32xf32, #tpu.memory_space<vmem>>, %arg18: memref<1x1x32xf32, #tpu.memory_space<vmem>>, %arg19: memref<1x1x32xf32, #tpu.memory_space<vmem>>, %arg20: memref<32x512xbf16, #tpu.memory_space<vmem>>, %arg21: memref<1x512xf32, #tpu.memory_space<vmem>>, %arg22: memref<24x512xf32, #tpu.memory_space<vmem>>) attributes {dimension_semantics = [#tpu.dimension_semantics<parallel>], iteration_bounds = array<i64: 1>, scalar_prefetch = 0 : i64, scratch_operands = 0 : i64, tpu.core_type = #tpu.core_type<tc>, window_params = [{transform_indices = @transform_0, window_bounds = array<i64: 24, 32>}, {pipeline_mode = #tpu.pipeline_mode<synchronous>, transform_indices = @transform_1, window_bounds = array<i64: 32, 32>}, {pipeline_mode = #tpu.pipeline_mode<synchronous>, transform_indices = @transform_2, window_bounds = array<i64: 8, 32>}, {pipeline_mode = #tpu.pipeline_mode<synchronous>, transform_indices = @transform_3, window_bounds = array<i64: 1, 32, 32>}, {pipeline_mode = #tpu.pipeline_mode<synchronous>, transform_indices = @transform_4, window_bounds = array<i64: 1, 1, 32>}, {pipeline_mode = #tpu.pipeline_mode<synchronous>, transform_indices = @transform_5, window_bounds = array<i64: 1, 32, 32>}, {pipeline_mode = #tpu.pipeline_mode<synchronous>, transform_indices = @transform_6, window_bounds = array<i64: 1, 1, 32>}, {pipeline_mode = #tpu.pipeline_mode<synchronous>, transform_indices = @transform_7, window_bounds = array<i64: 1, 32, 32>}, {pipeline_mode = #tpu.pipeline_mode<synchronous>, transform_indices = @transform_8, window_bounds = array<i64: 1, 1, 32>}, {pipeline_mode = #tpu.pipeline_mode<synchronous>, transform_indices = @transform_9, window_bounds = array<i64: 1, 32, 32>}, {pipeline_mode = #tpu.pipeline_mode<synchronous>, transform_indices = @transform_10, window_bounds = array<i64: 1, 1, 32>}, {pipeline_mode = #tpu.pipeline_mode<synchronous>, transform_indices = @transform_11, window_bounds = array<i64: 1, 1, 32>}, {pipeline_mode = #tpu.pipeline_mode<synchronous>, transform_indices = @transform_12, window_bounds = array<i64: 1, 1, 32>}, {pipeline_mode = #tpu.pipeline_mode<synchronous>, transform_indices = @transform_13, window_bounds = array<i64: 1, 32, 128>}, {pipeline_mode = #tpu.pipeline_mode<synchronous>, transform_indices = @transform_14, window_bounds = array<i64: 1, 1, 128>}, {pipeline_mode = #tpu.pipeline_mode<synchronous>, transform_indices = @transform_15, window_bounds = array<i64: 1, 128, 32>}, {pipeline_mode = #tpu.pipeline_mode<synchronous>, transform_indices = @transform_16, window_bounds = array<i64: 1, 1, 32>}, {pipeline_mode = #tpu.pipeline_mode<synchronous>, transform_indices = @transform_17, window_bounds = array<i64: 1, 1, 32>}, {pipeline_mode = #tpu.pipeline_mode<synchronous>, transform_indices = @transform_18, window_bounds = array<i64: 1, 1, 32>}, {pipeline_mode = #tpu.pipeline_mode<synchronous>, transform_indices = @transform_19, window_bounds = array<i64: 32, 512>}, {pipeline_mode = #tpu.pipeline_mode<synchronous>, transform_indices = @transform_20, window_bounds = array<i64: 1, 512>}, {transform_indices = @transform_21, window_bounds = array<i64: 24, 512>}]} {
    %c0 = arith.constant 0 : index
    %c0_0 = arith.constant 0 : index
    %0 = vector.load %arg1[%c0, %c0_0] : memref<24x32xbf16, #tpu.memory_space<vmem>>, vector<24x32xbf16>
    %c0_1 = arith.constant 0 : index
    %c0_2 = arith.constant 0 : index
    %1 = vector.load %arg2[%c0_1, %c0_2] : memref<32x32xbf16, #tpu.memory_space<vmem>>, vector<32x32xbf16>
    %cst = arith.constant dense<0.000000e+00> : vector<24x32xf32>
    %2 = tpu.matmul %0, %1, %cst {dimension_numbers = #tpu.dot_dimension_numbers<[1], [0], [0], [1], [0, 0, 1, 1], [], []>} : vector<24x32xbf16>, vector<32x32xbf16>, vector<24x32xf32> -> vector<24x32xf32>
    %3 = vector.extract_strided_slice %2 {offsets = [0, 0], sizes = [4, 32], strides = [1, 1]} : vector<24x32xf32> to vector<4x32xf32>
    %4 = vector.extract_strided_slice %2 {offsets = [4, 0], sizes = [4, 32], strides = [1, 1]} : vector<24x32xf32> to vector<4x32xf32>
    %5 = vector.extract_strided_slice %2 {offsets = [4, 0], sizes = [4, 32], strides = [1, 1]} : vector<24x32xf32> to vector<4x32xf32>
    %6 = vector.extract_strided_slice %2 {offsets = [8, 0], sizes = [4, 32], strides = [1, 1]} : vector<24x32xf32> to vector<4x32xf32>
    %7 = vector.extract_strided_slice %2 {offsets = [8, 0], sizes = [4, 32], strides = [1, 1]} : vector<24x32xf32> to vector<4x32xf32>
    %8 = vector.extract_strided_slice %2 {offsets = [0, 0], sizes = [4, 32], strides = [1, 1]} : vector<24x32xf32> to vector<4x32xf32>
    %9 = vector.extract_strided_slice %2 {offsets = [12, 0], sizes = [4, 32], strides = [1, 1]} : vector<24x32xf32> to vector<4x32xf32>
    %10 = vector.extract_strided_slice %2 {offsets = [16, 0], sizes = [4, 32], strides = [1, 1]} : vector<24x32xf32> to vector<4x32xf32>
    %11 = vector.extract_strided_slice %2 {offsets = [16, 0], sizes = [4, 32], strides = [1, 1]} : vector<24x32xf32> to vector<4x32xf32>
    %12 = vector.extract_strided_slice %2 {offsets = [20, 0], sizes = [4, 32], strides = [1, 1]} : vector<24x32xf32> to vector<4x32xf32>
    %13 = vector.extract_strided_slice %2 {offsets = [20, 0], sizes = [4, 32], strides = [1, 1]} : vector<24x32xf32> to vector<4x32xf32>
    %14 = vector.extract_strided_slice %2 {offsets = [12, 0], sizes = [4, 32], strides = [1, 1]} : vector<24x32xf32> to vector<4x32xf32>
    %15 = tpu.concatenate %3, %4, %5, %6, %7, %8, %9, %10, %11, %12, %13, %14 in 0 : vector<4x32xf32>, vector<4x32xf32>, vector<4x32xf32>, vector<4x32xf32>, vector<4x32xf32>, vector<4x32xf32>, vector<4x32xf32>, vector<4x32xf32>, vector<4x32xf32>, vector<4x32xf32>, vector<4x32xf32>, vector<4x32xf32> -> vector<48x32xf32>
    %c0_3 = arith.constant 0 : index
    %c0_4 = arith.constant 0 : index
    %16 = vector.load %arg3[%c0_3, %c0_4] : memref<8x32xf32, #tpu.memory_space<vmem>>, vector<8x32xf32>
    %17 = vector.shape_cast %15 : vector<48x32xf32> to vector<6x8x32xf32>
    %18 = vector.shape_cast %16 : vector<8x32xf32> to vector<1x8x32xf32>
    %19 = vector.broadcast %18 : vector<1x8x32xf32> to vector<6x8x32xf32>
    %20 = arith.addf %17, %19 : vector<6x8x32xf32>
    %21 = vector.shape_cast %20 : vector<6x8x32xf32> to vector<48x32xf32>
    %22 = arith.truncf %21 : vector<48x32xf32> to vector<48x32xbf16>
    %23 = arith.truncf %15 : vector<48x32xf32> to vector<48x32xbf16>
    %c0_5 = arith.constant 0 : index
    %c0_6 = arith.constant 0 : index
    %c0_7 = arith.constant 0 : index
    %24 = vector.load %arg4[%c0_5, %c0_6, %c0_7] : memref<1x32x32xbf16, #tpu.memory_space<vmem>>, vector<1x32x32xbf16>
    %25 = vector.shape_cast %24 : vector<1x32x32xbf16> to vector<32x32xbf16>
    %cst_8 = arith.constant dense<0.000000e+00> : vector<48x32xf32>
    %26 = tpu.matmul %22, %25, %cst_8 {dimension_numbers = #tpu.dot_dimension_numbers<[1], [0], [0], [1], [0, 0, 1, 1], [], []>} : vector<48x32xbf16>, vector<32x32xbf16>, vector<48x32xf32> -> vector<48x32xf32>
    %c0_9 = arith.constant 0 : index
    %c0_10 = arith.constant 0 : index
    %c0_11 = arith.constant 0 : index
    %27 = vector.load %arg5[%c0_9, %c0_10, %c0_11] : memref<1x1x32xf32, #tpu.memory_space<vmem>>, vector<1x1x32xf32>
    %28 = vector.shape_cast %27 : vector<1x1x32xf32> to vector<1x32xf32>
    %29 = vector.broadcast %28 : vector<1x32xf32> to vector<48x32xf32>
    %30 = arith.addf %26, %29 : vector<48x32xf32>
    %cst_12 = arith.constant 0.353553385 : f32
    %31 = vector.broadcast %cst_12 : f32 to vector<48x32xf32>
    %32 = arith.mulf %30, %31 : vector<48x32xf32>
    %c0_13 = arith.constant 0 : index
    %c0_14 = arith.constant 0 : index
    %c0_15 = arith.constant 0 : index
    %33 = vector.load %arg6[%c0_13, %c0_14, %c0_15] : memref<1x32x32xbf16, #tpu.memory_space<vmem>>, vector<1x32x32xbf16>
    %34 = vector.shape_cast %33 : vector<1x32x32xbf16> to vector<32x32xbf16>
    %cst_16 = arith.constant dense<0.000000e+00> : vector<48x32xf32>
    %35 = tpu.matmul %22, %34, %cst_16 {dimension_numbers = #tpu.dot_dimension_numbers<[1], [0], [0], [1], [0, 0, 1, 1], [], []>} : vector<48x32xbf16>, vector<32x32xbf16>, vector<48x32xf32> -> vector<48x32xf32>
    %c0_17 = arith.constant 0 : index
    %c0_18 = arith.constant 0 : index
    %c0_19 = arith.constant 0 : index
    %36 = vector.load %arg7[%c0_17, %c0_18, %c0_19] : memref<1x1x32xf32, #tpu.memory_space<vmem>>, vector<1x1x32xf32>
    %37 = vector.shape_cast %36 : vector<1x1x32xf32> to vector<1x32xf32>
    %38 = vector.broadcast %37 : vector<1x32xf32> to vector<48x32xf32>
    %39 = arith.addf %35, %38 : vector<48x32xf32>
    %c0_20 = arith.constant 0 : index
    %c0_21 = arith.constant 0 : index
    %c0_22 = arith.constant 0 : index
    %40 = vector.load %arg8[%c0_20, %c0_21, %c0_22] : memref<1x32x32xbf16, #tpu.memory_space<vmem>>, vector<1x32x32xbf16>
    %41 = vector.shape_cast %40 : vector<1x32x32xbf16> to vector<32x32xbf16>
    %cst_23 = arith.constant dense<0.000000e+00> : vector<48x32xf32>
    %42 = tpu.matmul %23, %41, %cst_23 {dimension_numbers = #tpu.dot_dimension_numbers<[1], [0], [0], [1], [0, 0, 1, 1], [], []>} : vector<48x32xbf16>, vector<32x32xbf16>, vector<48x32xf32> -> vector<48x32xf32>
    %c0_24 = arith.constant 0 : index
    %c0_25 = arith.constant 0 : index
    %c0_26 = arith.constant 0 : index
    %43 = vector.load %arg9[%c0_24, %c0_25, %c0_26] : memref<1x1x32xf32, #tpu.memory_space<vmem>>, vector<1x1x32xf32>
    %44 = vector.shape_cast %43 : vector<1x1x32xf32> to vector<1x32xf32>
    %45 = vector.broadcast %44 : vector<1x32xf32> to vector<48x32xf32>
    %46 = arith.addf %42, %45 : vector<48x32xf32>
    %47 = vector.shape_cast %32 : vector<48x32xf32> to vector<6x8x32xf32>
    %48 = vector.extract_strided_slice %47 {offsets = [0, 0, 0], sizes = [6, 8, 8], strides = [1, 1, 1]} : vector<6x8x32xf32> to vector<6x8x8xf32>
    %49 = vector.extract_strided_slice %47 {offsets = [0, 0, 8], sizes = [6, 8, 8], strides = [1, 1, 1]} : vector<6x8x32xf32> to vector<6x8x8xf32>
    %50 = vector.extract_strided_slice %47 {offsets = [0, 0, 16], sizes = [6, 8, 8], strides = [1, 1, 1]} : vector<6x8x32xf32> to vector<6x8x8xf32>
    %51 = vector.extract_strided_slice %47 {offsets = [0, 0, 24], sizes = [6, 8, 8], strides = [1, 1, 1]} : vector<6x8x32xf32> to vector<6x8x8xf32>
    %52 = tpu.concatenate %48, %49, %50, %51 in 0 : vector<6x8x8xf32>, vector<6x8x8xf32>, vector<6x8x8xf32>, vector<6x8x8xf32> -> vector<24x8x8xf32>
    %53 = vector.shape_cast %39 : vector<48x32xf32> to vector<6x8x32xf32>
    %54 = vector.extract_strided_slice %53 {offsets = [0, 0, 0], sizes = [6, 8, 8], strides = [1, 1, 1]} : vector<6x8x32xf32> to vector<6x8x8xf32>
    %55 = vector.extract_strided_slice %53 {offsets = [0, 0, 8], sizes = [6, 8, 8], strides = [1, 1, 1]} : vector<6x8x32xf32> to vector<6x8x8xf32>
    %56 = vector.extract_strided_slice %53 {offsets = [0, 0, 16], sizes = [6, 8, 8], strides = [1, 1, 1]} : vector<6x8x32xf32> to vector<6x8x8xf32>
    %57 = vector.extract_strided_slice %53 {offsets = [0, 0, 24], sizes = [6, 8, 8], strides = [1, 1, 1]} : vector<6x8x32xf32> to vector<6x8x8xf32>
    %58 = tpu.concatenate %54, %55, %56, %57 in 0 : vector<6x8x8xf32>, vector<6x8x8xf32>, vector<6x8x8xf32>, vector<6x8x8xf32> -> vector<24x8x8xf32>
    %59 = vector.shape_cast %46 : vector<48x32xf32> to vector<6x8x32xf32>
    %60 = vector.extract_strided_slice %59 {offsets = [0, 0, 0], sizes = [6, 8, 8], strides = [1, 1, 1]} : vector<6x8x32xf32> to vector<6x8x8xf32>
    %61 = vector.extract_strided_slice %59 {offsets = [0, 0, 8], sizes = [6, 8, 8], strides = [1, 1, 1]} : vector<6x8x32xf32> to vector<6x8x8xf32>
    %62 = vector.extract_strided_slice %59 {offsets = [0, 0, 16], sizes = [6, 8, 8], strides = [1, 1, 1]} : vector<6x8x32xf32> to vector<6x8x8xf32>
    %63 = vector.extract_strided_slice %59 {offsets = [0, 0, 24], sizes = [6, 8, 8], strides = [1, 1, 1]} : vector<6x8x32xf32> to vector<6x8x8xf32>
    %64 = tpu.concatenate %60, %61, %62, %63 in 0 : vector<6x8x8xf32>, vector<6x8x8xf32>, vector<6x8x8xf32>, vector<6x8x8xf32> -> vector<24x8x8xf32>
    %65 = arith.truncf %52 : vector<24x8x8xf32> to vector<24x8x8xbf16>
    %66 = arith.truncf %58 : vector<24x8x8xf32> to vector<24x8x8xbf16>
    "tpu.trace_start"() <{level = 10 : i32, message = "bqd,bkd->bqk"}> : () -> ()
    %cst_27 = arith.constant dense<0.000000e+00> : vector<24x8x8xf32>
    %67 = tpu.matmul %65, %66, %cst_27 {dimension_numbers = #tpu.dot_dimension_numbers<[2], [2], [1], [1], [0, 0, 0, 1, 1, 1], [0], [0]>} : vector<24x8x8xbf16>, vector<24x8x8xbf16>, vector<24x8x8xf32> -> vector<24x8x8xf32>
    "tpu.trace_stop"() : () -> ()
    %cst_28 = arith.constant dense<0xFF800000> : vector<24x8xf32>
    %68 = vector.multi_reduction <maximumf>, %67, %cst_28 [2] : vector<24x8x8xf32> to vector<24x8xf32>
    %69 = vector.shape_cast %68 : vector<24x8xf32> to vector<24x8x1xf32>
    %70 = vector.broadcast %69 : vector<24x8x1xf32> to vector<24x8x8xf32>
    %71 = arith.subf %67, %70 : vector<24x8x8xf32>
    %72 = math.exp %71 : vector<24x8x8xf32>
    %cst_29 = arith.constant dense<0.000000e+00> : vector<24x8xf32>
    %73 = vector.multi_reduction <add>, %72, %cst_29 [2] : vector<24x8x8xf32> to vector<24x8xf32>
    %74 = vector.shape_cast %73 : vector<24x8xf32> to vector<24x8x1xf32>
    %75 = tpu.reciprocal %74 {approx = true} : vector<24x8x1xf32> -> vector<24x8x1xf32>
    %76 = vector.broadcast %75 : vector<24x8x1xf32> to vector<24x8x8xf32>
    %77 = arith.mulf %72, %76 : vector<24x8x8xf32>
    %78 = arith.truncf %77 : vector<24x8x8xf32> to vector<24x8x8xbf16>
    %79 = arith.truncf %64 : vector<24x8x8xf32> to vector<24x8x8xbf16>
    "tpu.trace_start"() <{level = 10 : i32, message = "bqk,bkd->bqd"}> : () -> ()
    %cst_30 = arith.constant dense<0.000000e+00> : vector<24x8x8xf32>
    %80 = tpu.matmul %78, %79, %cst_30 {dimension_numbers = #tpu.dot_dimension_numbers<[2], [1], [1], [2], [0, 0, 0, 1, 1, 2], [0], [0]>} : vector<24x8x8xbf16>, vector<24x8x8xbf16>, vector<24x8x8xf32> -> vector<24x8x8xf32>
    "tpu.trace_stop"() : () -> ()
    %81 = vector.extract_strided_slice %80 {offsets = [0, 0, 0], sizes = [6, 8, 8], strides = [1, 1, 1]} : vector<24x8x8xf32> to vector<6x8x8xf32>
    %82 = vector.extract_strided_slice %80 {offsets = [6, 0, 0], sizes = [6, 8, 8], strides = [1, 1, 1]} : vector<24x8x8xf32> to vector<6x8x8xf32>
    %83 = vector.extract_strided_slice %80 {offsets = [12, 0, 0], sizes = [6, 8, 8], strides = [1, 1, 1]} : vector<24x8x8xf32> to vector<6x8x8xf32>
    %84 = vector.extract_strided_slice %80 {offsets = [18, 0, 0], sizes = [6, 8, 8], strides = [1, 1, 1]} : vector<24x8x8xf32> to vector<6x8x8xf32>
    %85 = tpu.concatenate %81, %82, %83, %84 in 2 : vector<6x8x8xf32>, vector<6x8x8xf32>, vector<6x8x8xf32>, vector<6x8x8xf32> -> vector<6x8x32xf32>
    %86 = vector.shape_cast %85 : vector<6x8x32xf32> to vector<48x32xf32>
    %87 = arith.truncf %86 : vector<48x32xf32> to vector<48x32xbf16>
    %c0_31 = arith.constant 0 : index
    %c0_32 = arith.constant 0 : index
    %c0_33 = arith.constant 0 : index
    %88 = vector.load %arg10[%c0_31, %c0_32, %c0_33] : memref<1x32x32xbf16, #tpu.memory_space<vmem>>, vector<1x32x32xbf16>
    %89 = vector.shape_cast %88 : vector<1x32x32xbf16> to vector<32x32xbf16>
    %cst_34 = arith.constant dense<0.000000e+00> : vector<48x32xf32>
    %90 = tpu.matmul %87, %89, %cst_34 {dimension_numbers = #tpu.dot_dimension_numbers<[1], [0], [0], [1], [0, 0, 1, 1], [], []>} : vector<48x32xbf16>, vector<32x32xbf16>, vector<48x32xf32> -> vector<48x32xf32>
    %c0_35 = arith.constant 0 : index
    %c0_36 = arith.constant 0 : index
    %c0_37 = arith.constant 0 : index
    %91 = vector.load %arg11[%c0_35, %c0_36, %c0_37] : memref<1x1x32xf32, #tpu.memory_space<vmem>>, vector<1x1x32xf32>
    %92 = vector.shape_cast %91 : vector<1x1x32xf32> to vector<1x32xf32>
    %93 = vector.broadcast %92 : vector<1x32xf32> to vector<48x32xf32>
    %94 = arith.addf %90, %93 : vector<48x32xf32>
    %95 = arith.addf %15, %94 : vector<48x32xf32>
    %cst_38 = arith.constant dense<0.000000e+00> : vector<48xf32>
    %96 = vector.multi_reduction <add>, %95, %cst_38 [1] : vector<48x32xf32> to vector<48xf32>
    %97 = vector.shape_cast %96 : vector<48xf32> to vector<48x1xf32>
    %cst_39 = arith.constant 3.200000e+01 : f32
    %98 = vector.broadcast %cst_39 : f32 to vector<48x1xf32>
    %99 = arith.divf %97, %98 : vector<48x1xf32>
    %100 = vector.broadcast %99 : vector<48x1xf32> to vector<48x32xf32>
    %101 = arith.subf %95, %100 : vector<48x32xf32>
    %102 = arith.mulf %101, %101 : vector<48x32xf32>
    %cst_40 = arith.constant dense<0.000000e+00> : vector<48xf32>
    %103 = vector.multi_reduction <add>, %102, %cst_40 [1] : vector<48x32xf32> to vector<48xf32>
    %104 = vector.shape_cast %103 : vector<48xf32> to vector<48x1xf32>
    %cst_41 = arith.constant 3.200000e+01 : f32
    %105 = vector.broadcast %cst_41 : f32 to vector<48x1xf32>
    %106 = arith.divf %104, %105 : vector<48x1xf32>
    %cst_42 = arith.constant 9.99999974E-6 : f32
    %107 = vector.broadcast %cst_42 : f32 to vector<48x1xf32>
    %108 = arith.addf %106, %107 : vector<48x1xf32>
    %109 = math.rsqrt %108 : vector<48x1xf32>
    %110 = vector.broadcast %109 : vector<48x1xf32> to vector<48x32xf32>
    %111 = arith.mulf %101, %110 : vector<48x32xf32>
    %c0_43 = arith.constant 0 : index
    %c0_44 = arith.constant 0 : index
    %c0_45 = arith.constant 0 : index
    %112 = vector.load %arg12[%c0_43, %c0_44, %c0_45] : memref<1x1x32xf32, #tpu.memory_space<vmem>>, vector<1x1x32xf32>
    %113 = vector.shape_cast %112 : vector<1x1x32xf32> to vector<1x32xf32>
    %114 = vector.broadcast %113 : vector<1x32xf32> to vector<48x32xf32>
    %115 = arith.mulf %111, %114 : vector<48x32xf32>
    %c0_46 = arith.constant 0 : index
    %c0_47 = arith.constant 0 : index
    %c0_48 = arith.constant 0 : index
    %116 = vector.load %arg13[%c0_46, %c0_47, %c0_48] : memref<1x1x32xf32, #tpu.memory_space<vmem>>, vector<1x1x32xf32>
    %117 = vector.shape_cast %116 : vector<1x1x32xf32> to vector<1x32xf32>
    %118 = vector.broadcast %117 : vector<1x32xf32> to vector<48x32xf32>
    %119 = arith.addf %115, %118 : vector<48x32xf32>
    %120 = arith.truncf %119 : vector<48x32xf32> to vector<48x32xbf16>
    %c0_49 = arith.constant 0 : index
    %c0_50 = arith.constant 0 : index
    %c0_51 = arith.constant 0 : index
    %121 = vector.load %arg14[%c0_49, %c0_50, %c0_51] : memref<1x32x128xbf16, #tpu.memory_space<vmem>>, vector<1x32x128xbf16>
    %122 = vector.shape_cast %121 : vector<1x32x128xbf16> to vector<32x128xbf16>
    %cst_52 = arith.constant dense<0.000000e+00> : vector<48x128xf32>
    %123 = tpu.matmul %120, %122, %cst_52 {dimension_numbers = #tpu.dot_dimension_numbers<[1], [0], [0], [1], [0, 0, 1, 1], [], []>} : vector<48x32xbf16>, vector<32x128xbf16>, vector<48x128xf32> -> vector<48x128xf32>
    %c0_53 = arith.constant 0 : index
    %c0_54 = arith.constant 0 : index
    %c0_55 = arith.constant 0 : index
    %124 = vector.load %arg15[%c0_53, %c0_54, %c0_55] : memref<1x1x128xf32, #tpu.memory_space<vmem>>, vector<1x1x128xf32>
    %125 = vector.shape_cast %124 : vector<1x1x128xf32> to vector<1x128xf32>
    %126 = vector.broadcast %125 : vector<1x128xf32> to vector<48x128xf32>
    %127 = arith.addf %123, %126 : vector<48x128xf32>
    %cst_56 = arith.constant 0.000000e+00 : f32
    %128 = vector.broadcast %cst_56 : f32 to vector<48x128xf32>
    %129 = arith.maximumf %127, %128 : vector<48x128xf32>
    %130 = arith.truncf %129 : vector<48x128xf32> to vector<48x128xbf16>
    %c0_57 = arith.constant 0 : index
    %c0_58 = arith.constant 0 : index
    %c0_59 = arith.constant 0 : index
    %131 = vector.load %arg16[%c0_57, %c0_58, %c0_59] : memref<1x128x32xbf16, #tpu.memory_space<vmem>>, vector<1x128x32xbf16>
    %132 = vector.shape_cast %131 : vector<1x128x32xbf16> to vector<128x32xbf16>
    %cst_60 = arith.constant dense<0.000000e+00> : vector<48x32xf32>
    %133 = tpu.matmul %130, %132, %cst_60 {dimension_numbers = #tpu.dot_dimension_numbers<[1], [0], [0], [1], [0, 0, 1, 1], [], []>} : vector<48x128xbf16>, vector<128x32xbf16>, vector<48x32xf32> -> vector<48x32xf32>
    %c0_61 = arith.constant 0 : index
    %c0_62 = arith.constant 0 : index
    %c0_63 = arith.constant 0 : index
    %134 = vector.load %arg17[%c0_61, %c0_62, %c0_63] : memref<1x1x32xf32, #tpu.memory_space<vmem>>, vector<1x1x32xf32>
    %135 = vector.shape_cast %134 : vector<1x1x32xf32> to vector<1x32xf32>
    %136 = vector.broadcast %135 : vector<1x32xf32> to vector<48x32xf32>
    %137 = arith.addf %133, %136 : vector<48x32xf32>
    %138 = arith.addf %119, %137 : vector<48x32xf32>
    %cst_64 = arith.constant dense<0.000000e+00> : vector<48xf32>
    %139 = vector.multi_reduction <add>, %138, %cst_64 [1] : vector<48x32xf32> to vector<48xf32>
    %140 = vector.shape_cast %139 : vector<48xf32> to vector<48x1xf32>
    %cst_65 = arith.constant 3.200000e+01 : f32
    %141 = vector.broadcast %cst_65 : f32 to vector<48x1xf32>
    %142 = arith.divf %140, %141 : vector<48x1xf32>
    %143 = vector.broadcast %142 : vector<48x1xf32> to vector<48x32xf32>
    %144 = arith.subf %138, %143 : vector<48x32xf32>
    %145 = arith.mulf %144, %144 : vector<48x32xf32>
    %cst_66 = arith.constant dense<0.000000e+00> : vector<48xf32>
    %146 = vector.multi_reduction <add>, %145, %cst_66 [1] : vector<48x32xf32> to vector<48xf32>
    %147 = vector.shape_cast %146 : vector<48xf32> to vector<48x1xf32>
    %cst_67 = arith.constant 3.200000e+01 : f32
    %148 = vector.broadcast %cst_67 : f32 to vector<48x1xf32>
    %149 = arith.divf %147, %148 : vector<48x1xf32>
    %cst_68 = arith.constant 9.99999974E-6 : f32
    %150 = vector.broadcast %cst_68 : f32 to vector<48x1xf32>
    %151 = arith.addf %149, %150 : vector<48x1xf32>
    %152 = math.rsqrt %151 : vector<48x1xf32>
    %153 = vector.broadcast %152 : vector<48x1xf32> to vector<48x32xf32>
    %154 = arith.mulf %144, %153 : vector<48x32xf32>
    %c0_69 = arith.constant 0 : index
    %c0_70 = arith.constant 0 : index
    %c0_71 = arith.constant 0 : index
    %155 = vector.load %arg18[%c0_69, %c0_70, %c0_71] : memref<1x1x32xf32, #tpu.memory_space<vmem>>, vector<1x1x32xf32>
    %156 = vector.shape_cast %155 : vector<1x1x32xf32> to vector<1x32xf32>
    %157 = vector.broadcast %156 : vector<1x32xf32> to vector<48x32xf32>
    %158 = arith.mulf %154, %157 : vector<48x32xf32>
    %c0_72 = arith.constant 0 : index
    %c0_73 = arith.constant 0 : index
    %c0_74 = arith.constant 0 : index
    %159 = vector.load %arg19[%c0_72, %c0_73, %c0_74] : memref<1x1x32xf32, #tpu.memory_space<vmem>>, vector<1x1x32xf32>
    %160 = vector.shape_cast %159 : vector<1x1x32xf32> to vector<1x32xf32>
    %161 = vector.broadcast %160 : vector<1x32xf32> to vector<48x32xf32>
    %162 = arith.addf %158, %161 : vector<48x32xf32>
    %163 = vector.extract_strided_slice %162 {offsets = [0, 0], sizes = [4, 32], strides = [1, 1]} : vector<48x32xf32> to vector<4x32xf32>
    %164 = vector.extract_strided_slice %162 {offsets = [20, 0], sizes = [4, 32], strides = [1, 1]} : vector<48x32xf32> to vector<4x32xf32>
    %165 = vector.extract_strided_slice %162 {offsets = [8, 0], sizes = [4, 32], strides = [1, 1]} : vector<48x32xf32> to vector<4x32xf32>
    %166 = vector.extract_strided_slice %162 {offsets = [4, 0], sizes = [4, 32], strides = [1, 1]} : vector<48x32xf32> to vector<4x32xf32>
    %167 = vector.extract_strided_slice %162 {offsets = [16, 0], sizes = [4, 32], strides = [1, 1]} : vector<48x32xf32> to vector<4x32xf32>
    %168 = vector.extract_strided_slice %162 {offsets = [12, 0], sizes = [4, 32], strides = [1, 1]} : vector<48x32xf32> to vector<4x32xf32>
    %169 = vector.extract_strided_slice %162 {offsets = [24, 0], sizes = [4, 32], strides = [1, 1]} : vector<48x32xf32> to vector<4x32xf32>
    %170 = vector.extract_strided_slice %162 {offsets = [44, 0], sizes = [4, 32], strides = [1, 1]} : vector<48x32xf32> to vector<4x32xf32>
    %171 = vector.extract_strided_slice %162 {offsets = [32, 0], sizes = [4, 32], strides = [1, 1]} : vector<48x32xf32> to vector<4x32xf32>
    %172 = vector.extract_strided_slice %162 {offsets = [28, 0], sizes = [4, 32], strides = [1, 1]} : vector<48x32xf32> to vector<4x32xf32>
    %173 = vector.extract_strided_slice %162 {offsets = [40, 0], sizes = [4, 32], strides = [1, 1]} : vector<48x32xf32> to vector<4x32xf32>
    %174 = vector.extract_strided_slice %162 {offsets = [36, 0], sizes = [4, 32], strides = [1, 1]} : vector<48x32xf32> to vector<4x32xf32>
    %175 = tpu.concatenate %163, %165, %167, %169, %171, %173 in 0 : vector<4x32xf32>, vector<4x32xf32>, vector<4x32xf32>, vector<4x32xf32>, vector<4x32xf32>, vector<4x32xf32> -> vector<24x32xf32>
    %176 = tpu.concatenate %164, %166, %168, %170, %172, %174 in 0 : vector<4x32xf32>, vector<4x32xf32>, vector<4x32xf32>, vector<4x32xf32>, vector<4x32xf32>, vector<4x32xf32> -> vector<24x32xf32>
    %177 = arith.addf %175, %176 : vector<24x32xf32>
    %178 = arith.truncf %177 : vector<24x32xf32> to vector<24x32xbf16>
    %c0_75 = arith.constant 0 : index
    %c0_76 = arith.constant 0 : index
    %179 = vector.load %arg20[%c0_75, %c0_76] : memref<32x512xbf16, #tpu.memory_space<vmem>>, vector<32x512xbf16>
    %cst_77 = arith.constant dense<0.000000e+00> : vector<24x512xf32>
    %180 = tpu.matmul %178, %179, %cst_77 {dimension_numbers = #tpu.dot_dimension_numbers<[1], [0], [0], [1], [0, 0, 1, 1], [], []>} : vector<24x32xbf16>, vector<32x512xbf16>, vector<24x512xf32> -> vector<24x512xf32>
    %c0_78 = arith.constant 0 : index
    %c0_79 = arith.constant 0 : index
    %181 = vector.load %arg21[%c0_78, %c0_79] : memref<1x512xf32, #tpu.memory_space<vmem>>, vector<1x512xf32>
    %182 = vector.broadcast %181 : vector<1x512xf32> to vector<24x512xf32>
    %183 = arith.addf %180, %182 : vector<24x512xf32>
    %c0_80 = arith.constant 0 : index
    %c0_81 = arith.constant 0 : index
    %184 = vector.load %arg22[%c0_80, %c0_81] : memref<24x512xf32, #tpu.memory_space<vmem>>, vector<24x512xf32>
    tpu.vector_store %arg22[%c0_80, %c0_81], %183 {strides = array<i32>} : memref<24x512xf32, #tpu.memory_space<vmem>>, vector<24x512xf32>,
    return
  }
  func.func @transform_0(%arg0: i32) -> (i32, i32) {
    %c0_i32 = arith.constant 0 : i32
    %c0_i32_0 = arith.constant 0 : i32
    return %arg0, %c0_i32 : i32, i32
  }
  func.func @transform_1(%arg0: i32) -> (i32, i32) {
    %c0_i32 = arith.constant 0 : i32
    %c0_i32_0 = arith.constant 0 : i32
    %c0_i32_1 = arith.constant 0 : i32
    return %c0_i32, %c0_i32_0 : i32, i32
  }
  func.func @transform_2(%arg0: i32) -> (i32, i32) {
    %c0_i32 = arith.constant 0 : i32
    %c0_i32_0 = arith.constant 0 : i32
    %c0_i32_1 = arith.constant 0 : i32
    return %c0_i32, %c0_i32_0 : i32, i32
  }
  func.func @transform_3(%arg0: i32) -> (i32, i32, i32) {
    %c0_i32 = arith.constant 0 : i32
    %c0_i32_0 = arith.constant 0 : i32
    %c0_i32_1 = arith.constant 0 : i32
    %c0_i32_2 = arith.constant 0 : i32
    return %c0_i32, %c0_i32_0, %c0_i32_1 : i32, i32, i32
  }
  func.func @transform_4(%arg0: i32) -> (i32, i32, i32) {
    %c0_i32 = arith.constant 0 : i32
    %c0_i32_0 = arith.constant 0 : i32
    %c0_i32_1 = arith.constant 0 : i32
    %c0_i32_2 = arith.constant 0 : i32
    return %c0_i32, %c0_i32_0, %c0_i32_1 : i32, i32, i32
  }
  func.func @transform_5(%arg0: i32) -> (i32, i32, i32) {
    %c0_i32 = arith.constant 0 : i32
    %c0_i32_0 = arith.constant 0 : i32
    %c0_i32_1 = arith.constant 0 : i32
    %c0_i32_2 = arith.constant 0 : i32
    return %c0_i32, %c0_i32_0, %c0_i32_1 : i32, i32, i32
  }
  func.func @transform_6(%arg0: i32) -> (i32, i32, i32) {
    %c0_i32 = arith.constant 0 : i32
    %c0_i32_0 = arith.constant 0 : i32
    %c0_i32_1 = arith.constant 0 : i32
    %c0_i32_2 = arith.constant 0 : i32
    return %c0_i32, %c0_i32_0, %c0_i32_1 : i32, i32, i32
  }
  func.func @transform_7(%arg0: i32) -> (i32, i32, i32) {
    %c0_i32 = arith.constant 0 : i32
    %c0_i32_0 = arith.constant 0 : i32
    %c0_i32_1 = arith.constant 0 : i32
    %c0_i32_2 = arith.constant 0 : i32
    return %c0_i32, %c0_i32_0, %c0_i32_1 : i32, i32, i32
  }
  func.func @transform_8(%arg0: i32) -> (i32, i32, i32) {
    %c0_i32 = arith.constant 0 : i32
    %c0_i32_0 = arith.constant 0 : i32
    %c0_i32_1 = arith.constant 0 : i32
    %c0_i32_2 = arith.constant 0 : i32
    return %c0_i32, %c0_i32_0, %c0_i32_1 : i32, i32, i32
  }
  func.func @transform_9(%arg0: i32) -> (i32, i32, i32) {
    %c0_i32 = arith.constant 0 : i32
    %c0_i32_0 = arith.constant 0 : i32
    %c0_i32_1 = arith.constant 0 : i32
    %c0_i32_2 = arith.constant 0 : i32
    return %c0_i32, %c0_i32_0, %c0_i32_1 : i32, i32, i32
  }
  func.func @transform_10(%arg0: i32) -> (i32, i32, i32) {
    %c0_i32 = arith.constant 0 : i32
    %c0_i32_0 = arith.constant 0 : i32
    %c0_i32_1 = arith.constant 0 : i32
    %c0_i32_2 = arith.constant 0 : i32
    return %c0_i32, %c0_i32_0, %c0_i32_1 : i32, i32, i32
  }
  func.func @transform_11(%arg0: i32) -> (i32, i32, i32) {
    %c0_i32 = arith.constant 0 : i32
    %c0_i32_0 = arith.constant 0 : i32
    %c0_i32_1 = arith.constant 0 : i32
    %c0_i32_2 = arith.constant 0 : i32
    return %c0_i32, %c0_i32_0, %c0_i32_1 : i32, i32, i32
  }
  func.func @transform_12(%arg0: i32) -> (i32, i32, i32) {
    %c0_i32 = arith.constant 0 : i32
    %c0_i32_0 = arith.constant 0 : i32
    %c0_i32_1 = arith.constant 0 : i32
    %c0_i32_2 = arith.constant 0 : i32
    return %c0_i32, %c0_i32_0, %c0_i32_1 : i32, i32, i32
  }
  func.func @transform_13(%arg0: i32) -> (i32, i32, i32) {
    %c0_i32 = arith.constant 0 : i32
    %c0_i32_0 = arith.constant 0 : i32
    %c0_i32_1 = arith.constant 0 : i32
    %c0_i32_2 = arith.constant 0 : i32
    return %c0_i32, %c0_i32_0, %c0_i32_1 : i32, i32, i32
  }
  func.func @transform_14(%arg0: i32) -> (i32, i32, i32) {
    %c0_i32 = arith.constant 0 : i32
    %c0_i32_0 = arith.constant 0 : i32
    %c0_i32_1 = arith.constant 0 : i32
    %c0_i32_2 = arith.constant 0 : i32
    return %c0_i32, %c0_i32_0, %c0_i32_1 : i32, i32, i32
  }
  func.func @transform_15(%arg0: i32) -> (i32, i32, i32) {
    %c0_i32 = arith.constant 0 : i32
    %c0_i32_0 = arith.constant 0 : i32
    %c0_i32_1 = arith.constant 0 : i32
    %c0_i32_2 = arith.constant 0 : i32
    return %c0_i32, %c0_i32_0, %c0_i32_1 : i32, i32, i32
  }
  func.func @transform_16(%arg0: i32) -> (i32, i32, i32) {
    %c0_i32 = arith.constant 0 : i32
    %c0_i32_0 = arith.constant 0 : i32
    %c0_i32_1 = arith.constant 0 : i32
    %c0_i32_2 = arith.constant 0 : i32
    return %c0_i32, %c0_i32_0, %c0_i32_1 : i32, i32, i32
  }
  func.func @transform_17(%arg0: i32) -> (i32, i32, i32) {
    %c0_i32 = arith.constant 0 : i32
    %c0_i32_0 = arith.constant 0 : i32
    %c0_i32_1 = arith.constant 0 : i32
    %c0_i32_2 = arith.constant 0 : i32
    return %c0_i32, %c0_i32_0, %c0_i32_1 : i32, i32, i32
  }
  func.func @transform_18(%arg0: i32) -> (i32, i32, i32) {
    %c0_i32 = arith.constant 0 : i32
    %c0_i32_0 = arith.constant 0 : i32
    %c0_i32_1 = arith.constant 0 : i32
    %c0_i32_2 = arith.constant 0 : i32
    return %c0_i32, %c0_i32_0, %c0_i32_1 : i32, i32, i32
  }
  func.func @transform_19(%arg0: i32) -> (i32, i32) {
    %c0_i32 = arith.constant 0 : i32
    %c0_i32_0 = arith.constant 0 : i32
    %c0_i32_1 = arith.constant 0 : i32
    return %c0_i32, %c0_i32_0 : i32, i32
  }
  func.func @transform_20(%arg0: i32) -> (i32, i32) {
    %c0_i32 = arith.constant 0 : i32
    %c0_i32_0 = arith.constant 0 : i32
    %c0_i32_1 = arith.constant 0 : i32
    return %c0_i32, %c0_i32_0 : i32, i32
  }
  func.func @transform_21(%arg0: i32) -> (i32, i32) {
    %c0_i32 = arith.constant 0 : i32
    %c0_i32_0 = arith.constant 0 : i32
    return %arg0, %c0_i32 : i32, i32
  }
}

module attributes {stable_mosaic.version = 11 : i64} {
  func.func @_pc_proj_kernel(%arg0: i32, %arg1: memref<32x32xbf16, #tpu.memory_space<vmem>>, %arg2: memref<32x32xf32, #tpu.memory_space<vmem>>, %arg3: memref<32x32xbf16, #tpu.memory_space<vmem>>, %arg4: memref<1x32xf32, #tpu.memory_space<vmem>>, %arg5: memref<32x32xbf16, #tpu.memory_space<vmem>>, %arg6: memref<1x32xf32, #tpu.memory_space<vmem>>, %arg7: memref<32x32xf32, #tpu.memory_space<vmem>>) attributes {dimension_semantics = [#tpu.dimension_semantics<parallel>], iteration_bounds = array<i64: 1>, scalar_prefetch = 0 : i64, scratch_operands = 0 : i64, tpu.core_type = #tpu.core_type<tc>, window_params = [{transform_indices = @transform_0, window_bounds = array<i64: 32, 32>}, {transform_indices = @transform_1, window_bounds = array<i64: 32, 32>}, {pipeline_mode = #tpu.pipeline_mode<synchronous>, transform_indices = @transform_2, window_bounds = array<i64: 32, 32>}, {pipeline_mode = #tpu.pipeline_mode<synchronous>, transform_indices = @transform_3, window_bounds = array<i64: 1, 32>}, {pipeline_mode = #tpu.pipeline_mode<synchronous>, transform_indices = @transform_4, window_bounds = array<i64: 32, 32>}, {pipeline_mode = #tpu.pipeline_mode<synchronous>, transform_indices = @transform_5, window_bounds = array<i64: 1, 32>}, {transform_indices = @transform_6, window_bounds = array<i64: 32, 32>}]} {
    %c0 = arith.constant 0 : index
    %c0_0 = arith.constant 0 : index
    %0 = vector.load %arg1[%c0, %c0_0] : memref<32x32xbf16, #tpu.memory_space<vmem>>, vector<32x32xbf16>
    %c0_1 = arith.constant 0 : index
    %c0_2 = arith.constant 0 : index
    %1 = vector.load %arg3[%c0_1, %c0_2] : memref<32x32xbf16, #tpu.memory_space<vmem>>, vector<32x32xbf16>
    %cst = arith.constant dense<0.000000e+00> : vector<32x32xf32>
    %2 = tpu.matmul %0, %1, %cst {dimension_numbers = #tpu.dot_dimension_numbers<[1], [0], [0], [1], [0, 0, 1, 1], [], []>} : vector<32x32xbf16>, vector<32x32xbf16>, vector<32x32xf32> -> vector<32x32xf32>
    %c0_3 = arith.constant 0 : index
    %c0_4 = arith.constant 0 : index
    %3 = vector.load %arg4[%c0_3, %c0_4] : memref<1x32xf32, #tpu.memory_space<vmem>>, vector<1x32xf32>
    %4 = vector.broadcast %3 : vector<1x32xf32> to vector<32x32xf32>
    %5 = arith.addf %2, %4 : vector<32x32xf32>
    %cst_5 = arith.constant 0.000000e+00 : f32
    %6 = vector.broadcast %cst_5 : f32 to vector<32x32xf32>
    %7 = arith.maximumf %5, %6 : vector<32x32xf32>
    %8 = arith.truncf %7 : vector<32x32xf32> to vector<32x32xbf16>
    %c0_6 = arith.constant 0 : index
    %c0_7 = arith.constant 0 : index
    %9 = vector.load %arg5[%c0_6, %c0_7] : memref<32x32xbf16, #tpu.memory_space<vmem>>, vector<32x32xbf16>
    %cst_8 = arith.constant dense<0.000000e+00> : vector<32x32xf32>
    %10 = tpu.matmul %8, %9, %cst_8 {dimension_numbers = #tpu.dot_dimension_numbers<[1], [0], [0], [1], [0, 0, 1, 1], [], []>} : vector<32x32xbf16>, vector<32x32xbf16>, vector<32x32xf32> -> vector<32x32xf32>
    %c0_9 = arith.constant 0 : index
    %c0_10 = arith.constant 0 : index
    %11 = vector.load %arg6[%c0_9, %c0_10] : memref<1x32xf32, #tpu.memory_space<vmem>>, vector<1x32xf32>
    %12 = vector.broadcast %11 : vector<1x32xf32> to vector<32x32xf32>
    %13 = arith.addf %10, %12 : vector<32x32xf32>
    %cst_11 = arith.constant 0.000000e+00 : f32
    %14 = vector.broadcast %cst_11 : f32 to vector<32x32xf32>
    %15 = arith.maximumf %13, %14 : vector<32x32xf32>
    %c0_12 = arith.constant 0 : index
    %c0_13 = arith.constant 0 : index
    %16 = vector.load %arg2[%c0_12, %c0_13] : memref<32x32xf32, #tpu.memory_space<vmem>>, vector<32x32xf32>
    %17 = arith.addf %16, %15 : vector<32x32xf32>
    %c0_14 = arith.constant 0 : index
    %c0_15 = arith.constant 0 : index
    %18 = vector.load %arg7[%c0_14, %c0_15] : memref<32x32xf32, #tpu.memory_space<vmem>>, vector<32x32xf32>
    tpu.vector_store %arg7[%c0_14, %c0_15], %17 {strides = array<i32>} : memref<32x32xf32, #tpu.memory_space<vmem>>, vector<32x32xf32>,
    return
  }
  func.func @transform_0(%arg0: i32) -> (i32, i32) {
    %c0_i32 = arith.constant 0 : i32
    %c0_i32_0 = arith.constant 0 : i32
    return %arg0, %c0_i32 : i32, i32
  }
  func.func @transform_1(%arg0: i32) -> (i32, i32) {
    %c0_i32 = arith.constant 0 : i32
    %c0_i32_0 = arith.constant 0 : i32
    return %arg0, %c0_i32 : i32, i32
  }
  func.func @transform_2(%arg0: i32) -> (i32, i32) {
    %c0_i32 = arith.constant 0 : i32
    %c0_i32_0 = arith.constant 0 : i32
    %c0_i32_1 = arith.constant 0 : i32
    return %c0_i32, %c0_i32_0 : i32, i32
  }
  func.func @transform_3(%arg0: i32) -> (i32, i32) {
    %c0_i32 = arith.constant 0 : i32
    %c0_i32_0 = arith.constant 0 : i32
    %c0_i32_1 = arith.constant 0 : i32
    return %c0_i32, %c0_i32_0 : i32, i32
  }
  func.func @transform_4(%arg0: i32) -> (i32, i32) {
    %c0_i32 = arith.constant 0 : i32
    %c0_i32_0 = arith.constant 0 : i32
    %c0_i32_1 = arith.constant 0 : i32
    return %c0_i32, %c0_i32_0 : i32, i32
  }
  func.func @transform_5(%arg0: i32) -> (i32, i32) {
    %c0_i32 = arith.constant 0 : i32
    %c0_i32_0 = arith.constant 0 : i32
    %c0_i32_1 = arith.constant 0 : i32
    return %c0_i32, %c0_i32_0 : i32, i32
  }
  func.func @transform_6(%arg0: i32) -> (i32, i32) {
    %c0_i32 = arith.constant 0 : i32
    %c0_i32_0 = arith.constant 0 : i32
    return %arg0, %c0_i32 : i32, i32
  }
}

</mosaic_0001>

<bundles_post_ra>
// kernel: tile.8
= control target key start
LH: loop header
LB: loop body
LE: loop exit
PB: predicated region body
PF: predicated region fallthrough
CT: control target
= control target key end

     0   :  { %s28_s0 = inlined_call_operand.vmem [shape: f32[32], index: 0, kind: input, shape index: {}]   ;;  %s29_s1 = inlined_call_operand.vmem [shape: f32[16,32], index: 1, kind: output, shape index: {}]  }
   0x1   :  { %v4_v0 = vld [vmem:[%s28_s0] ss:$0 sm:$0xff] }
   0x2   :  { %5 = vst [vmem:[%s29_s1] sm:$0xff] %v4_v0  ;;  %8 = vst [vmem:[%s29_s1 + $0x8] sm:$0xff] %v4_v0 }

// kernel: tile.9
= control target key start
LH: loop header
LB: loop body
LE: loop exit
PB: predicated region body
PF: predicated region fallthrough
CT: control target
= control target key end

     0   :  { %s62_s8 = smov 96   ;;  %vm3_vm0 = vcmask 261120   ;;  %s64_s15 = smov 64   ;;  %vm9_vm1 = vcmask 1048320   ;;  %vm15_vm2 = vcmask 785920   ;;  %vm21_vm3 = vcmask 523520   ;;  %s99_s0 = inlined_call_operand.vmem [shape: f32[16,32], index: 0, kind: input, shape index: {}]   ;;  %s100_s1 = inlined_call_operand.vmem [shape: f32[1,512], index: 1, kind: output, shape index: {}]  }
   0x1   :  { %v53_v0 = vld [vmem:[%s99_s0 + $0x3] ss:$4 sm:$0xf]   ;;  %v54_v1 = vld [vmem:[%s99_s0 + $0x2] ss:$4 sm:$0xf]  }
   0x2   :  { %7 = vrot.lane.b32.xlu0 %v53_v0, %s62_s8  ;;  %v55_v2 = vld [vmem:[%s99_s0 + $0x1] ss:$4 sm:$0xf]   ;;  %v2_v3 = vld [vmem:[%s99_s0] ss:$4 sm:$0xf]  }
   0x3   :  { %s63_s0 = smov 32   ;;  %4 = vst.msk [vmem:[#allocation0] ss:$8 sm:$0xf] %vm3_vm0, %v2_v3  }
   0x4   :  { %19 = vrot.lane.b32.xlu1 %v55_v2, %s63_s0 }
   0x6   :  { %13 = vrot.lane.b32.xlu0 %v54_v1, %s64_s15 }
  0x74   :  { %v8_v4 = vpop.permute.xlu0 %7  }
  0x75   :  { %10 = vst.msk [vmem:[#allocation0] ss:$8 sm:$0xf] %vm9_vm1, %v8_v4  }
  0x76   :  { %v20_v5 = vpop.permute.xlu1 %19  }
  0x78   :  { %v14_v6 = vpop.permute.xlu0 %13  }
  0x79   :  { %16 = vst.msk [vmem:[#allocation0] ss:$8 sm:$0xf] %vm15_vm2, %v14_v6  }
  0x7a   :  { %22 = vst.msk [vmem:[#allocation0] ss:$8 sm:$0xf] %vm21_vm3, %v20_v5  }
  0x81   :  { %v27_v7 = vld [vmem:[#allocation0] sm:$0x1]  ;;  %v32_v8 = vld [vmem:[#allocation0 + $0x8] sm:$0x1]  ;;  %v38_v9 = vld [vmem:[#allocation0 + $0x10] sm:$0x1] }
  0x82   :  { %30 = vst [vmem:[%s100_s1] sm:$0x1] %v27_v7  ;;  %56 = vst [vmem:[%s100_s1 + $0x1] sm:$0x1] %v32_v8  ;;  %v45_v10 = vld [vmem:[#allocation0 + $0x18] sm:$0x1] }
  0x83   :  { %57 = vst [vmem:[%s100_s1 + $0x2] sm:$0x1] %v38_v9  ;;  %58 = vst [vmem:[%s100_s1 + $0x3] sm:$0x1] %v45_v10 }

// kernel: anyview_former_forward.3
= control target key start
LH: loop header
LB: loop body
LE: loop exit
PB: predicated region body
PF: predicated region fallthrough
CT: control target
= control target key end

     0   :  { %vm62_vm0 = vcmask 261120   ;;  %s386_s0 = inlined_call_operand.vmem [shape: bf16[32,32], index: 0, kind: input, shape index: {}]   ;;  %s387_s1 = inlined_call_operand.vmem [shape: f32[32,32], index: 1, kind: input, shape index: {}]   ;;  %s388_s2 = inlined_call_operand.vmem [shape: bf16[32,32], index: 2, kind: input, shape index: {}]   ;;  %s389_s3 = inlined_call_operand.vmem [shape: f32[1,32], index: 3, kind: input, shape index: {}]   ;;  %s390_s4 = inlined_call_operand.vmem [shape: bf16[32,32], index: 4, kind: input, shape index: {}]   ;;  %s391_s5 = inlined_call_operand.vmem [shape: f32[1,32], index: 5, kind: input, shape index: {}]   ;;  %s392_s6 = inlined_call_operand.hbm [shape: f32[32,32], index: 6, kind: output, shape index: {}]  }
   0x1   :  { %v273_v0 = vld [vmem:[%s388_s2 + $0x8] sm:$0xff]   ;;  %v274_v1 = vld [vmem:[%s388_s2] sm:$0xff]  }
   0x2   :  { %254 = vmatprep.subr.bf16.mxu0 %v273_v0  ;;  %v275_v2 = vld [vmem:[%s386_s0] sm:$0xff]  }
   0x3   :  { %255 = vmatpush3.bf16.msra.mxu0 %v273_v0  ;;  %258 = vmatprep.mubr.msk.bf16.mxu0 %vm62_vm0, %v275_v2 }
   0x4   :  { %256 = vmatprep.subr.bf16.mxu0 %v274_v1 }
   0x5   :  { %11 = vsyncpa [#allocation3], 0  ;;  %v276_v3 = vld [vmem:[%s386_s0 + $0x8] sm:$0xff]   ;;  %v278_v5 = vld [vmem:[%s390_s4] sm:$0xff]  }
   0x6   :  { %v277_v4 = vld [vmem:[%s390_s4 + $0x8] sm:$0xff]   ;;  %v234_v8 = vld [vmem:[%s389_s3] ss:$0 sm:$0xff]  ;;  %v208_v24 = vld [vmem:[%s387_s1 + $0x10] sm:$0xff] }
   0x7   :  { %257 = vmatpush3.bf16.msra.mxu0 %v274_v1  ;;  %262 = vmatprep.subr.bf16.mxu1 %v277_v4  ;;  %v241_v21 = vld [vmem:[%s391_s5] ss:$0 sm:$0xff]  ;;  %v209_v33 = vld [vmem:[%s387_s1 + $0x18] sm:$0xff]  ;;  %s301_s5 = smov [#allocation2]   ;;  %v207_v38 = vld [vmem:[%s387_s1 + $0x8] sm:$0xff] }
   0x8   :  { %263 = vmatpush3.bf16.msra.mxu1 %v277_v4  ;;  %v206_v28 = vld [vmem:[%s387_s1] sm:$0xff]  ;;  %s223_s15 = sshll.u32 %s301_s5, 4  ;;  %s224_s15 = int_to_ptr.vmem [resolvable:$true] %s223_s15 }
   0x9   :  { %264 = vmatprep.subr.bf16.mxu1 %v278_v5  ;;  %s279_s18 = scalar_lea.vmem %s224_s15, 512  ;;  %p284_p1 = scmp.lt.s32.totalorder %s224_s15, %s224_s15 }
   0xa   :  { %259 = vmatmul.mubr.msk.bf16.vlgmr.msra.gmra.mxu0 %vm62_vm0, %v276_v3  ;;  %p280_p0 = scmp.ne.s32.totalorder %s224_s15, %s279_s18  ;;  %p285_p2 = scmp.lt.s32.totalorder %s279_s18, %s279_s18 }
   0xc   :  { %265 = vmatpush3.bf16.msra.mxu1 %v278_v5  ;;  %p286_p3 = por %p285_p2, %p284_p1 }
   0xe   :  { %p287_p4 = pnand %p286_p3, %p280_p0 }
  0xca   :  { %v260_v6 = vpop.f32.mrf.mxu0 }
  0xcb   :  { %v112_v12 = vadd.f32 %v260_v6, %v234_v8 }
  0xcc   :  { %v103_v7 = vpop.f32.mrf.mxu0 }
  0xcd   :  { %v104_v10 = vadd.f32 %v234_v8, %v103_v7  ;;  %v120_v18 = vmax.f32 %v112_v12, 0.0 }
  0xce   :  { %v261_v9 = vpop.f32.mrf.mxu0 }
  0xcf   :  { %v115_v11 = vadd.f32 %v261_v9, %v234_v8  ;;  %v118_v16 = vmax.f32 %v104_v10, 0.0 }
  0xd0   :  { %v106_v13 = vpop.f32.mrf.mxu0 }
  0xd1   :  { %v107_v14 = vadd.f32 %v234_v8, %v106_v13  ;;  %v121_v15 = vmax.f32 %v115_v11, 0.0 }
  0xd3   :  { %v119_v17 = vmax.f32 %v107_v14, 0.0  ;;  %v123_v20 = vpack.c.bf16 %v121_v15, %v120_v18 }
  0xd5   :  { %v122_v19 = vpack.c.bf16 %v119_v17, %v118_v16 }
  0xd7   :  { %266 = vmatprep.mubr.msk.bf16.mxu1 %vm62_vm0, %v122_v19 }
  0xd8   :  { %267 = vmatmul.mubr.msk.bf16.vlgmr.msra.gmra.mxu1 %vm62_vm0, %v123_v20 }
 0x198   :  { %v268_v22 = vpop.f32.mrf.mxu1 }
 0x199   :  { %v196_v23 = vadd.f32 %v268_v22, %v241_v21 }
 0x19a   :  { %v187_v25 = vpop.f32.mrf.mxu1 }
 0x19b   :  { %v204_v26 = vmax.f32 %v196_v23, 0.0  ;;  %v188_v27 = vadd.f32 %v241_v21, %v187_v25 }
 0x19c   :  { %v269_v29 = vpop.f32.mrf.mxu1 }
 0x19d   :  { %v212_v30 = vadd.f32 %v208_v24, %v204_v26  ;;  %v202_v31 = vmax.f32 %v188_v27, 0.0  ;;  %v199_v32 = vadd.f32 %v269_v29, %v241_v21 }
 0x19e   :  { %v190_v34 = vpop.f32.mrf.mxu1 }
 0x19f   :  { %216 = vst.msk [vmem:[#allocation2 + $0x10] sm:$0xff] %vm62_vm0, %v212_v30  ;;  %v210_v35 = vadd.f32 %v206_v28, %v202_v31  ;;  %v205_v36 = vmax.f32 %v199_v32, 0.0  ;;  %v191_v37 = vadd.f32 %v241_v21, %v190_v34 }
 0x1a1   :  { %214 = vst.msk [vmem:[#allocation2] sm:$0xff] %vm62_vm0, %v210_v35  ;;  %v213_v39 = vadd.f32 %v209_v33, %v205_v36  ;;  %v203_v40 = vmax.f32 %v191_v37, 0.0 }
 0x1a3   :  { %217 = vst.msk [vmem:[#allocation2 + $0x18] sm:$0xff] %vm62_vm0, %v213_v39  ;;  %v211_v41 = vadd.f32 %v207_v38, %v203_v40 }
 0x1a5   :  { %215 = vst.msk [vmem:[#allocation2 + $0x8] sm:$0xff] %vm62_vm0, %v211_v41 }
 0x1a6   :  { %290 = shalt.err (!%p287_p4)
}
 0x1a7   :  { %s302_s19 = smov 128   ;;  %s303_s20 = smov 8  }
 0x1a8   :  { %229 = dma.vmem_to_hbm [thread:$0]  %s224_s15, 512, %s392_s6, [#allocation3], %s302_s19, %s302_s19, %s303_s20  }
 0x1a9   :  { %299 = dma.done.wait [#allocation3], 512  }
 0x1aa   :  { %300 = vsyncadd [#allocation3], 4294966784 }
 0x1ab   :  { %233 = vsyncpa [#allocation3], 1 }

// kernel: anyview_former_forward.2
= control target key start
LH: loop header
LB: loop body
LE: loop exit
PB: predicated region body
PF: predicated region fallthrough
CT: control target
= control target key end

     0   :  { %vm96_vm0 = vcmask 261120   ;;  %v5034_v5 = vmov 0.0   ;;  %vm5035_vm1 = vmmov 0   ;;  %vm160_vm2 = vcmask 1043456   ;;  %s5037_s27 = smov 112   ;;  %s6211_s1 = inlined_call_operand.vmem [shape: bf16[32,32], index: 1, kind: input, shape index: {}]   ;;  %s6212_s0 = inlined_call_operand.vmem [shape: bf16[24,32], index: 0, kind: input, shape index: {}]   ;;  %s6213_s3 = inlined_call_operand.vmem [shape: bf16[1,32,32], index: 3, kind: input, shape index: {}]   ;;  %s6214_s5 = inlined_call_operand.vmem [shape: bf16[1,32,32], index: 5, kind: input, shape index: {}]   ;;  %s6215_s7 = inlined_call_operand.vmem [shape: bf16[1,32,32], index: 7, kind: input, shape index: {}]   ;;  %s6216_s2 = inlined_call_operand.vmem [shape: f32[8,32], index: 2, kind: input, shape index: {}]   ;;  %s6217_s6 = inlined_call_operand.vmem [shape: f32[1,1,32], index: 6, kind: input, shape index: {}]   ;;  %s6218_s4 = inlined_call_operand.vmem [shape: f32[1,1,32], index: 4, kind: input, shape index: {}]   ;;  %s6219_s8 = inlined_call_operand.vmem [shape: f32[1,1,32], index: 8, kind: input, shape index: {}]   ;;  %s6220_s9 = inlined_call_operand.vmem [shape: bf16[1,32,32], index: 9, kind: input, shape index: {}]   ;;  %s6221_s10 = inlined_call_operand.vmem [shape: f32[1,1,32], index: 10, kind: input, shape index: {}]   ;;  %s6222_s13 = inlined_call_operand.vmem [shape: bf16[1,32,128], index: 13, kind: input, shape index: {}]   ;;  %s6223_s15 = inlined_call_operand.vmem [shape: bf16[1,128,32], index: 15, kind: input, shape index: {}]   ;;  %s6224_s11 = inlined_call_operand.vmem [shape: f32[1,1,32], index: 11, kind: input, shape index: {}]   ;;  %s6225_s12 = inlined_call_operand.vmem [shape: f32[1,1,32], index: 12, kind: input, shape index: {}]   ;;  %s6226_s14 = inlined_call_operand.vmem [shape: f32[1,1,128], index: 14, kind: input, shape index: {}]   ;;  %s6227_s16 = inlined_call_operand.vmem [shape: f32[1,1,32], index: 16, kind: input, shape index: {}]   ;;  %s6228_s19 = inlined_call_operand.vmem [shape: bf16[32,512], index: 19, kind: input, shape index: {}]   ;;  %s6229_s17 = inlined_call_operand.vmem [shape: f32[1,1,32], index: 17, kind: input, shape index: {}]   ;;  %s6230_s18 = inlined_call_operand.vmem [shape: f32[1,1,32], index: 18, kind: input, shape index: {}]   ;;  %s6231_s20 = inlined_call_operand.vmem [shape: f32[1,512], index: 20, kind: input, shape index: {}]   ;;  %s6232_s21 = inlined_call_operand.vmem [shape: f32[24,512], index: 21, kind: output, shape index: {}]  }
   0x1   :  { %6238 = sst [smem:[#allocation2_spill]] %s6211_s1  ;;  %4295 = vmatprep.subr.bf16.mxu1 %v5034_v5  ;;  %4299 = vmatprep.mubr.msk.bf16.mxu1 %vm5035_vm1, %v5034_v5  ;;  %v5260_v35 = vld [vmem:[%s6217_s6] ss:$0 sm:$0xff]  ;;  %vm670_vm3 = vcmask 64512   ;;  %vm3269_vm4 = vcmask 130048   ;;  %vm3276_vm5 = vcmask 195584  }
   0x2   :  { %6239 = sst [smem:[#allocation3_spill]] %s6212_s0  ;;  %v5265_v36 = vld [vmem:[%s6218_s4] ss:$0 sm:$0xff]  ;;  %s5036_s4 = smov 120  }
   0x3   :  { %6240 = sst [smem:[#allocation4_spill]] %s6213_s3 }
   0x4   :  { %6241 = sst [smem:[#allocation5_spill]] %s6214_s5  ;;  %s5039_s5 = smov 8  }
   0x5   :  { %6242 = sst [smem:[#allocation6_spill]] %s6215_s7 }
   0x6   :  { %6243 = sst [smem:[#allocation7_spill]] %s6216_s2 }
   0x7   :  { %s6244_s26 = sld [smem:[#allocation2_spill]] }
   0x8   :  { %s6245_s1 = sld [smem:[#allocation3_spill]] }
   0x9   :  { %s6246_s23 = sld [smem:[#allocation4_spill]] }
   0xa   :  { %s6247_s3 = sld [smem:[#allocation5_spill]] }
   0xb   :  { %s6249_s2 = sld [smem:[#allocation6_spill]] }
   0xd   :  { %v4880_v0 = vld [vmem:[%s6244_s26 + $0x8] sm:$0xff]   ;;  %v4881_v1 = vld [vmem:[%s6244_s26] sm:$0xff]  }
   0xe   :  { %4287 = vmatprep.subr.bf16.mxu0 %v4880_v0  ;;  %v4882_v2 = vld [vmem:[%s6245_s1] sm:$0xff]   ;;  %v4883_v3 = vld [vmem:[%s6245_s1 + $0x8] ss:$0 sps:$4 sm:$0xff]   ;;  %s6248_s1 = sld [smem:[#allocation7_spill]] }
   0xf   :  { %4288 = vmatpush3.bf16.msra.mxu0 %v4880_v0  ;;  %4291 = vmatprep.mubr.msk.bf16.mxu0 %vm96_vm0, %v4882_v2  ;;  %v4884_v4 = vld [vmem:[%s6246_s23 + $0x8] sm:$0xff]   ;;  %v4886_v7 = vld [vmem:[%s6246_s23] sm:$0xff]  }
  0x10   :  { %4289 = vmatprep.subr.bf16.mxu0 %v4881_v1  ;;  %v4885_v6 = vld [vmem:[%s6247_s3 + $0x8] sm:$0xff]   ;;  %4296 = vmatpush3.bf16.msra.mxu1 %v4884_v4  ;;  %v4887_v8 = vld [vmem:[%s6247_s3] sm:$0xff]  }
  0x11   :  { %4297 = vmatprep.subr.bf16.mxu1 %v5034_v5  ;;  %v4888_v21 = vld [vmem:[%s6249_s2 + $0x8] sm:$0xff]   ;;  %v4889_v25 = vld [vmem:[%s6249_s2] sm:$0xff]   ;;  %s5041_s2 = smov 24  }
  0x13   :  { %4290 = vmatpush3.bf16.msra.mxu0 %v4881_v1 }
  0x14   :  { %4311 = vmatprep.subr.bf16.mxu0 %v5034_v5  ;;  %4298 = vmatpush3.bf16.msra.mxu1 %v4886_v7  ;;  %v165_v15 = vld [vmem:[%s6248_s1] sm:$0xff]  ;;  %s5040_s1 = smov 16  }
  0x15   :  { %4327 = vmatprep.subr.bf16.mxu1 %v5034_v5 }
  0x16   :  { %4292 = vmatmul.mubr.msk.bf16.vlgmr.msra.gmra.mxu0 %vm96_vm0, %v4883_v3 }
  0x17   :  { %4312 = vmatpush3.bf16.msra.mxu0 %v4885_v6  ;;  %4315 = vmatprep.mubr.msk.bf16.mxu0 %vm5035_vm1, %v5034_v5 }
  0x18   :  { %4313 = vmatprep.subr.bf16.mxu0 %v5034_v5 }
  0x1b   :  { %4314 = vmatpush3.bf16.msra.mxu0 %v4887_v8 }
  0x1c   :  { %4343 = vmatprep.subr.bf16.mxu0 %v5034_v5 }
  0xd6   :  { %v5189_v9 = vpop.f32.mrf.mxu0 }
  0xd7   :  { %v158_v19 = vrot.slane %v5189_v9, 4  ;;  %v170_v30 = vadd.f32 %v5189_v9, %v165_v15 }
  0xd8   :  { %v5191_v10 = vpop.f32.mrf.mxu0 }
  0xd9   :  { %v152_v13 = vrot.slane %v5191_v10, 4  ;;  %v166_v17 = vadd.f32 %v165_v15, %v5191_v10 }
  0xda   :  { %v4294_v11 = vpop.f32.mrf.mxu0 }
  0xdc   :  { %v140_v12 = vpop.f32.mrf.mxu0 }
  0xdd   :  { %v155_v14 = vrot.slane %v140_v12, 4  ;;  %v5212_v23 = vsel %vm160_vm2, %v140_v12, %v152_v13  ;;  %v5225_v28 = vsel %vm160_vm2, %v158_v19, %v140_v12 }
  0xde   :  { %v168_v26 = vadd.f32 %v165_v15, %v5212_v23  ;;  %v171_v29 = vadd.f32 %v165_v15, %v5225_v28  ;;  %v177_v34 = vpack.c.bf16 %v5225_v28, %v5189_v9 }
  0xdf   :  { %v5198_v16 = vsel %vm160_vm2, %v152_v13, %v155_v14  ;;  %v5207_v22 = vsel %vm160_vm2, %v155_v14, %v158_v19 }
  0xe0   :  { %v167_v18 = vadd.f32 %v165_v15, %v5198_v16  ;;  %v169_v24 = vadd.f32 %v165_v15, %v5207_v22  ;;  %v174_v31 = vpack.c.bf16 %v171_v29, %v170_v30  ;;  %v175_v32 = vpack.c.bf16 %v5198_v16, %v5191_v10 }
  0xe1   :  { %v176_v33 = vpack.c.bf16 %v5207_v22, %v5212_v23 }
  0xe2   :  { %v172_v20 = vpack.c.bf16 %v167_v18, %v166_v17  ;;  %v173_v27 = vpack.c.bf16 %v169_v24, %v168_v26 }
  0xe4   :  { %4300 = vmatmul.mubr.msk.bf16.vlgmr.msra.gmra.mxu1 %vm96_vm0, %v172_v20  ;;  %4316 = vmatmul.mubr.msk.bf16.vlgmr.msra.gmra.mxu0 %vm96_vm0, %v172_v20 }
  0xe5   :  { %4303 = vmatprep.mubr.msk.bf16.mxu1 %vm5035_vm1, %v5034_v5  ;;  %4319 = vmatprep.mubr.msk.bf16.mxu0 %vm5035_vm1, %v5034_v5 }
  0xe6   :  { %4328 = vmatpush3.bf16.msra.mxu1 %v4888_v21 }
  0xe7   :  { %4329 = vmatprep.subr.bf16.mxu1 %v5034_v5 }
  0xea   :  { %4330 = vmatpush3.bf16.msra.mxu1 %v4889_v25 }
  0xeb   :  { %4361 = vmatprep.subr.bf16.mxu1 %v5034_v5 }
  0xec   :  { %4304 = vmatmul.mubr.msk.bf16.gmra.mxu1 %vm96_vm0, %v173_v27  ;;  %4320 = vmatmul.mubr.msk.bf16.gmra.mxu0 %vm96_vm0, %v173_v27 }
  0xed   :  { %4307 = vmatprep.mubr.msk.bf16.mxu1 %vm5035_vm1, %v5034_v5  ;;  %4323 = vmatprep.mubr.msk.bf16.mxu0 %vm5035_vm1, %v5034_v5 }
  0xf4   :  { %4308 = vmatmul.mubr.msk.bf16.gmra.mxu1 %vm96_vm0, %v174_v31  ;;  %4324 = vmatmul.mubr.msk.bf16.gmra.mxu0 %vm96_vm0, %v174_v31 }
  0xf5   :  { %4331 = vmatprep.mubr.msk.bf16.mxu1 %vm5035_vm1, %v5034_v5  ;;  %4345 = vmatprep.mubr.msk.bf16.mxu0 %vm5035_vm1, %v5034_v5 }
  0xfc   :  { %4332 = vmatmul.mubr.msk.bf16.vlgmr.msra.gmra.mxu1 %vm96_vm0, %v175_v32 }
  0xfd   :  { %4335 = vmatprep.mubr.msk.bf16.mxu1 %vm5035_vm1, %v5034_v5 }
 0x104   :  { %4336 = vmatmul.mubr.msk.bf16.gmra.mxu1 %vm96_vm0, %v176_v33 }
 0x105   :  { %4339 = vmatprep.mubr.msk.bf16.mxu1 %vm5035_vm1, %v5034_v5 }
 0x10c   :  { %4340 = vmatmul.mubr.msk.bf16.gmra.mxu1 %vm96_vm0, %v177_v34 }
 0x10d   :  { %4363 = vmatprep.mubr.msk.bf16.mxu1 %vm5035_vm1, %v5034_v5 }
 0x1a4   :  { %v244_v37 = vpop.f32.mrf.mxu1  ;;  %v330_v38 = vpop.f32.mrf.mxu0 }
 0x1a5   :  { %v331_v39 = vadd.f32 %v5260_v35, %v330_v38  ;;  %v245_v42 = vadd.f32 %v5265_v36, %v244_v37 }
 0x1a6   :  { %v4301_v40 = vpop.f32.mrf.mxu1  ;;  %v4317_v41 = vpop.f32.mrf.mxu0 }
 0x1a7   :  { %v646_v43 = vpack.c.bf16 %v331_v39, %v331_v39  ;;  %v267_v51 = vmul.f32 0.35355338, %v245_v42 }
 0x1a8   :  { %v247_v44 = vpop.f32.mrf.mxu1  ;;  %v333_v45 = vpop.f32.mrf.mxu0 }
 0x1a9   :  { %v248_v46 = vadd.f32 %v5265_v36, %v247_v44  ;;  %v334_v47 = vadd.f32 %v5260_v35, %v333_v45  ;;  %v675_v48 = vsel %vm670_vm3, %v646_v43, 0  ;;  %v622_v59 = vpack.c.bf16 %v267_v51, %v267_v51  ;;  %v4060_v43 = vld [vmem:[%s6219_s8] ss:$0 sm:$0xff]  ;;  %s5038_s8 = smov 104  }
 0x1aa   :  { %v4302_v49 = vpop.f32.mrf.mxu1  ;;  %v4318_v50 = vpop.f32.mrf.mxu0  ;;  %4344 = vmatpush3.bf16.xpose.msra.mxu0 %v675_v48 }
 0x1ab   :  { %v268_v52 = vmul.f32 0.35355338, %v248_v46  ;;  %v5272_v53 = vpack.i.bf16 %v334_v47, %v331_v39  ;;  %4349 = vmatprep.subr.bf16.mxu0 %v5034_v5  ;;  %v647_v56 = vpack.c.bf16 %v334_v47, %v334_v47 }
 0x1ac   :  { %v252_v54 = vpop.f32.mrf.mxu1  ;;  %v338_v55 = vpop.f32.mrf.mxu0 }
 0x1ad   :  { %4701 = vrot.lane.b32.xlu0 %v5272_v53, %s5036_s4  ;;  %v5277_v60 = vpack.i.bf16 %v268_v52, %v267_v51  ;;  %v253_v61 = vadd.f32 %v5265_v36, %v252_v54  ;;  %v339_v0 = vadd.f32 %v5260_v35, %v338_v55  ;;  %v721_v3 = vsel %vm670_vm3, %v647_v56, 0 }
 0x1ae   :  { %v4305_v57 = vpop.f32.mrf.mxu1  ;;  %v4321_v58 = vpop.f32.mrf.mxu0  ;;  %v623_v20 = vpack.c.bf16 %v268_v52, %v268_v52 }
 0x1af   :  { %v269_v14 = vmul.f32 0.35355338, %v253_v61  ;;  %v648_v17 = vpack.c.bf16 %v339_v0, %v339_v0 }
 0x1b0   :  { %v255_v62 = vpop.f32.mrf.mxu1  ;;  %v341_v63 = vpop.f32.mrf.mxu0 }
 0x1b1   :  { %v256_v1 = vadd.f32 %v5265_v36, %v255_v62  ;;  %v342_v2 = vadd.f32 %v5260_v35, %v341_v63  ;;  %4346 = vmatmul.mubr.msk.bf16.vlgmr.msra.gmra.mxu0 %vm670_vm3, %v622_v59  ;;  %4706 = vrot.lane.b32.xlu0 %v5277_v60, %s5036_s4  ;;  %v767_v31 = vsel %vm670_vm3, %v648_v17, 0  ;;  %v624_v45 = vpack.c.bf16 %v269_v14, %v269_v14 }
 0x1b2   :  { %v4306_v4 = vpop.f32.mrf.mxu1  ;;  %v4322_v6 = vpop.f32.mrf.mxu0  ;;  %4350 = vmatpush3.bf16.xpose.msra.mxu0 %v721_v3  ;;  %4351 = vmatprep.mubr.msk.bf16.mxu0 %vm5035_vm1, %v5034_v5 }
 0x1b3   :  { %v270_v7 = vmul.f32 0.35355338, %v256_v1  ;;  %v5289_v8 = vpack.i.bf16 %v342_v2, %v339_v0  ;;  %v649_v11 = vpack.c.bf16 %v342_v2, %v342_v2  ;;  %4355 = vmatprep.subr.bf16.mxu0 %v5034_v5 }
 0x1b4   :  { %v260_v12 = vpop.f32.mrf.mxu1  ;;  %v346_v13 = vpop.f32.mrf.mxu0 }
 0x1b5   :  { %4711 = vrot.lane.b32.xlu1 %v5289_v8, %s5036_s4  ;;  %v813_v15 = vsel %vm670_vm3, %v649_v11, 0  ;;  %v261_v21 = vadd.f32 %v5265_v36, %v260_v12  ;;  %v5296_v24 = vpack.i.bf16 %v270_v7, %v269_v14  ;;  %v347_v27 = vadd.f32 %v5260_v35, %v346_v13 }
 0x1b6   :  { %v4309_v18 = vpop.f32.mrf.mxu1  ;;  %v4325_v19 = vpop.f32.mrf.mxu0  ;;  %4362 = vmatpush3.bf16.xpose.msra.mxu1 %v813_v15  ;;  %v625_v32 = vpack.c.bf16 %v270_v7, %v270_v7 }
 0x1b7   :  { %4373 = vmatprep.subr.bf16.mxu1 %v5034_v5  ;;  %v271_v37 = vmul.f32 0.35355338, %v261_v21  ;;  %v650_v42 = vpack.c.bf16 %v347_v27, %v347_v27 }
 0x1b8   :  { %v263_v25 = vpop.f32.mrf.mxu1  ;;  %v349_v26 = vpop.f32.mrf.mxu0 }
 0x1b9   :  { %v264_v29 = vadd.f32 %v5265_v36, %v263_v25  ;;  %v350_v30 = vadd.f32 %v5260_v35, %v349_v26  ;;  %4352 = vmatmul.mubr.msk.bf16.vlgmr.msra.gmra.mxu0 %vm670_vm3, %v623_v20  ;;  %4716 = vrot.lane.b32.xlu1 %v5296_v24, %s5036_s4  ;;  %v859_v49 = vsel %vm670_vm3, %v650_v42, 0  ;;  %v626_v57 = vpack.c.bf16 %v271_v37, %v271_v37 }
 0x1ba   :  { %v4310_v33 = vpop.f32.mrf.mxu1  ;;  %v4326_v34 = vpop.f32.mrf.mxu0  ;;  %4356 = vmatpush3.bf16.xpose.msra.mxu0 %v767_v31  ;;  %4357 = vmatprep.mubr.msk.bf16.mxu0 %vm5035_vm1, %v5034_v5 }
 0x1bb   :  { %v272_v38 = vmul.f32 0.35355338, %v264_v29  ;;  %v4720_v39 = vpack.i.bf16 %v350_v30, %v347_v27  ;;  %v651_v36 = vpack.c.bf16 %v350_v30, %v350_v30  ;;  %4367 = vmatprep.subr.bf16.mxu0 %v5034_v5 }
 0x1bc   :  { %v419_v35 = vpop.f32.mrf.mxu1 }
 0x1bd   :  { %4721 = vrot.lane.b32.xlu0 %v4720_v39, %s5036_s4  ;;  %4364 = vmatmul.mubr.msk.bf16.vlgmr.msra.gmra.mxu1 %vm670_vm3, %v625_v32  ;;  %v905_v40 = vsel %vm670_vm3, %v651_v36, 0  ;;  %v4725_v41 = vpack.i.bf16 %v272_v38, %v271_v37  ;;  %v5319_v47 = vadd.f32 %v4060_v43, %v419_v35  ;;  %v627_v51 = vpack.c.bf16 %v272_v38, %v272_v38 }
 0x1be   :  { %v4333_v44 = vpop.f32.mrf.mxu1  ;;  %4374 = vmatpush3.bf16.xpose.msra.mxu1 %v905_v40  ;;  %4375 = vmatprep.mubr.msk.bf16.mxu1 %vm5035_vm1, %v5034_v5 }
 0x1bf   :  { %4726 = vrot.lane.b32.xlu1 %v4725_v41, %s5036_s4  ;;  %4385 = vmatprep.subr.bf16.mxu1 %v5034_v5 }
 0x1c0   :  { %v422_v46 = vpop.f32.mrf.mxu1 }
 0x1c1   :  { %v5321_v48 = vadd.f32 %v4060_v43, %v422_v46  ;;  %4731 = vrot.lane.b32.xlu0 %v5272_v53, %s5037_s27  ;;  %4358 = vmatmul.mubr.msk.bf16.vlgmr.msra.gmra.mxu0 %vm670_vm3, %v624_v45 }
 0x1c2   :  { %v4334_v50 = vpop.f32.mrf.mxu1  ;;  %4368 = vmatpush3.bf16.xpose.msra.mxu0 %v859_v49  ;;  %4369 = vmatprep.mubr.msk.bf16.mxu0 %vm5035_vm1, %v5034_v5 }
 0x1c3   :  { %4736 = vrot.lane.b32.xlu1 %v5277_v60, %s5037_s27  ;;  %4379 = vmatprep.subr.bf16.mxu0 %v5034_v5  ;;  %v5334_v52 = vpack.i.bf16 %v5321_v48, %v5319_v47 }
 0x1c4   :  { %v427_v54 = vpop.f32.mrf.mxu1 }
 0x1c5   :  { %v5336_v55 = vadd.f32 %v4060_v43, %v427_v54  ;;  %4741 = vrot.lane.b32.xlu0 %v5289_v8, %s5037_s27  ;;  %4376 = vmatmul.mubr.msk.bf16.vlgmr.msra.gmra.mxu1 %vm670_vm3, %v627_v51 }
 0x1c6   :  { %v4337_v56 = vpop.f32.mrf.mxu1  ;;  %4387 = vmatprep.mubr.msk.bf16.mxu1 %vm5035_vm1, %v5034_v5 }
 0x1c7   :  { %4746 = vrot.lane.b32.xlu1 %v5296_v24, %s5037_s27 }
 0x1c8   :  { %v430_v58 = vpop.f32.mrf.mxu1 }
 0x1c9   :  { %v5345_v59 = vadd.f32 %v4060_v43, %v430_v58  ;;  %4751 = vrot.lane.b32.xlu0 %v4720_v39, %s5037_s27  ;;  %4370 = vmatmul.mubr.msk.bf16.vlgmr.msra.gmra.mxu0 %vm670_vm3, %v626_v57 }
 0x1ca   :  { %v4338_v61 = vpop.f32.mrf.mxu1  ;;  %4381 = vmatprep.mubr.msk.bf16.mxu0 %vm5035_vm1, %v5034_v5 }
 0x1cb   :  { %4756 = vrot.lane.b32.xlu1 %v4725_v41, %s5037_s27  ;;  %v5354_v62 = vpack.i.bf16 %v5345_v59, %v5336_v55 }
 0x1cc   :  { %v435_v63 = vpop.f32.mrf.mxu1 }
 0x1cd   :  { %v5356_v0 = vadd.f32 %v4060_v43, %v435_v63  ;;  %4761 = vrot.lane.b32.xlu0 %v5272_v53, %s5038_s8 }
 0x1ce   :  { %v4341_v1 = vpop.f32.mrf.mxu1 }
 0x1cf   :  { %4766 = vrot.lane.b32.xlu1 %v5277_v60, %s5038_s8 }
 0x1d0   :  { %v438_v2 = vpop.f32.mrf.mxu1 }
 0x1d1   :  { %v5362_v3 = vadd.f32 %v4060_v43, %v438_v2  ;;  %4771 = vrot.lane.b32.xlu0 %v5289_v8, %s5038_s8 }
 0x1d2   :  { %v4342_v4 = vpop.f32.mrf.mxu1 }
 0x1d3   :  { %4776 = vrot.lane.b32.xlu1 %v5296_v24, %s5038_s8  ;;  %v5370_v6 = vpack.i.bf16 %v5362_v3, %v5356_v0 }
 0x1d5   :  { %4781 = vrot.lane.b32.xlu0 %v4720_v39, %s5038_s8 }
 0x1d7   :  { %4786 = vrot.lane.b32.xlu1 %v4725_v41, %s5038_s8 }
 0x1db   :  { %4791 = vrot.lane.b32.xlu1 %v5334_v52, %s5036_s4 }
 0x21f   :  { %v4702_v53 = vpop.permute.xlu0 %4701 }
 0x220   :  { %v4704_v60 = vunpack.i.h.bf16 %v4702_v53  ;;  %v4703_v7 = vunpack.i.l.bf16 %v4702_v53 }
 0x222   :  { %v653_v11 = vpack.c.bf16 %v4704_v60, %v4704_v60  ;;  %v652_v8 = vpack.c.bf16 %v4703_v7, %v4703_v7 }
 0x223   :  { %v4707_v12 = vpop.permute.xlu0 %4706 }
 0x224   :  { %v951_v13 = vsel %vm670_vm3, %v652_v8, 0  ;;  %v997_v14 = vsel %vm670_vm3, %v653_v11, 0  ;;  %v4709_v15 = vunpack.i.h.bf16 %v4707_v12  ;;  %v4708_v17 = vunpack.i.l.bf16 %v4707_v12 }
 0x225   :  { %4380 = vmatpush3.bf16.xpose.msra.mxu0 %v951_v13  ;;  %4386 = vmatpush3.bf16.xpose.msra.mxu1 %v997_v14 }
 0x226   :  { %4391 = vmatprep.subr.bf16.mxu0 %v5034_v5  ;;  %4397 = vmatprep.subr.bf16.mxu1 %v5034_v5  ;;  %v629_v21 = vpack.c.bf16 %v4709_v15, %v4709_v15  ;;  %v628_v24 = vpack.c.bf16 %v4708_v17, %v4708_v17 }
 0x227   :  { %v4712_v18 = vpop.permute.xlu1 %4711 }
 0x228   :  { %v4714_v19 = vunpack.i.h.bf16 %v4712_v18  ;;  %v4713_v20 = vunpack.i.l.bf16 %v4712_v18 }
 0x22a   :  { %v655_v25 = vpack.c.bf16 %v4714_v19, %v4714_v19  ;;  %v654_v26 = vpack.c.bf16 %v4713_v20, %v4713_v20 }
 0x22b   :  { %v4717_v27 = vpop.permute.xlu1 %4716 }
 0x22c   :  { %4382 = vmatmul.mubr.msk.bf16.vlgmr.msra.gmra.mxu0 %vm670_vm3, %v628_v24  ;;  %4388 = vmatmul.mubr.msk.bf16.vlgmr.msra.gmra.mxu1 %vm670_vm3, %v629_v21  ;;  %v1043_v29 = vsel %vm670_vm3, %v654_v26, 0  ;;  %v1089_v30 = vsel %vm670_vm3, %v655_v25, 0  ;;  %v4719_v31 = vunpack.i.h.bf16 %v4717_v27  ;;  %v4718_v32 = vunpack.i.l.bf16 %v4717_v27 }
 0x22d   :  { %4392 = vmatpush3.bf16.xpose.msra.mxu0 %v1043_v29  ;;  %4398 = vmatpush3.bf16.xpose.msra.mxu1 %v1089_v30 }
 0x22e   :  { %4393 = vmatprep.mubr.msk.bf16.mxu0 %vm5035_vm1, %v5034_v5  ;;  %4399 = vmatprep.mubr.msk.bf16.mxu1 %vm5035_vm1, %v5034_v5  ;;  %v631_v38 = vpack.c.bf16 %v4719_v31, %v4719_v31  ;;  %v630_v39 = vpack.c.bf16 %v4718_v32, %v4718_v32 }
 0x22f   :  { %v4722_v33 = vpop.permute.xlu0 %4721  ;;  %4403 = vmatprep.subr.bf16.mxu0 %v5034_v5  ;;  %4409 = vmatprep.subr.bf16.mxu1 %v5034_v5 }
 0x230   :  { %v4724_v34 = vunpack.i.h.bf16 %v4722_v33  ;;  %v4723_v37 = vunpack.i.l.bf16 %v4722_v33 }
 0x231   :  { %v4727_v41 = vpop.permute.xlu1 %4726 }
 0x232   :  { %v657_v36 = vpack.c.bf16 %v4724_v34, %v4724_v34  ;;  %v656_v35 = vpack.c.bf16 %v4723_v37, %v4723_v37  ;;  %v4729_v46 = vunpack.i.h.bf16 %v4727_v41  ;;  %v4728_v49 = vunpack.i.l.bf16 %v4727_v41 }
 0x233   :  { %v4732_v40 = vpop.permute.xlu0 %4731 }
 0x234   :  { %4394 = vmatmul.mubr.msk.bf16.vlgmr.msra.gmra.mxu0 %vm670_vm3, %v630_v39  ;;  %4400 = vmatmul.mubr.msk.bf16.vlgmr.msra.gmra.mxu1 %vm670_vm3, %v631_v38  ;;  %v4734_v42 = vunpack.i.h.bf16 %v4732_v40  ;;  %v4733_v43 = vunpack.i.l.bf16 %v4732_v40  ;;  %v1135_v44 = vsel %vm670_vm3, %v656_v35, 0  ;;  %v1181_v45 = vsel %vm670_vm3, %v657_v36, 0 }
 0x235   :  { %4405 = vmatprep.mubr.msk.bf16.mxu0 %vm5035_vm1, %v5034_v5  ;;  %4411 = vmatprep.mubr.msk.bf16.mxu1 %vm5035_vm1, %v5034_v5  ;;  %v633_v56 = vpack.c.bf16 %v4729_v46, %v4729_v46  ;;  %v632_v57 = vpack.c.bf16 %v4728_v49, %v4728_v49  ;;  %v4737_v58 = vpop.permute.xlu1 %4736 }
 0x236   :  { %4404 = vmatpush3.bf16.xpose.msra.mxu0 %v1135_v44  ;;  %4410 = vmatpush3.bf16.xpose.msra.mxu1 %v1181_v45  ;;  %v659_v50 = vpack.c.bf16 %v4734_v42, %v4734_v42  ;;  %v658_v51 = vpack.c.bf16 %v4733_v43, %v4733_v43  ;;  %v4739_v4 = vunpack.i.h.bf16 %v4737_v58  ;;  %v4738_v53 = vunpack.i.l.bf16 %v4737_v58 }
 0x237   :  { %4415 = vmatprep.subr.bf16.mxu0 %v5034_v5  ;;  %4421 = vmatprep.subr.bf16.mxu1 %v5034_v5  ;;  %v4742_v54 = vpop.permute.xlu0 %4741 }
 0x238   :  { %v4744_v61 = vunpack.i.h.bf16 %v4742_v54  ;;  %v4743_v63 = vunpack.i.l.bf16 %v4742_v54  ;;  %v1227_v1 = vsel %vm670_vm3, %v658_v51, 0  ;;  %v1273_v2 = vsel %vm670_vm3, %v659_v50, 0 }
 0x239   :  { %v635_v8 = vpack.c.bf16 %v4739_v4, %v4739_v4  ;;  %v634_v12 = vpack.c.bf16 %v4738_v53, %v4738_v53  ;;  %v4747_v13 = vpop.permute.xlu1 %4746 }
 0x23a   :  { %v661_v60 = vpack.c.bf16 %v4744_v61, %v4744_v61  ;;  %v660_v7 = vpack.c.bf16 %v4743_v63, %v4743_v63  ;;  %v4749_v19 = vunpack.i.h.bf16 %v4747_v13  ;;  %v4748_v20 = vunpack.i.l.bf16 %v4747_v13 }
 0x23b   :  { %v4752_v11 = vpop.permute.xlu0 %4751 }
 0x23c   :  { %v4754_v14 = vunpack.i.h.bf16 %v4752_v11  ;;  %v4753_v15 = vunpack.i.l.bf16 %v4752_v11  ;;  %v1319_v17 = vsel %vm670_vm3, %v660_v7, 0  ;;  %v1365_v18 = vsel %vm670_vm3, %v661_v60, 0 }
 0x23d   :  { %4406 = vmatmul.mubr.msk.bf16.vlgmr.msra.gmra.mxu0 %vm670_vm3, %v632_v57  ;;  %4412 = vmatmul.mubr.msk.bf16.vlgmr.msra.gmra.mxu1 %vm670_vm3, %v633_v56  ;;  %v637_v26 = vpack.c.bf16 %v4749_v19, %v4749_v19  ;;  %v636_v27 = vpack.c.bf16 %v4748_v20, %v4748_v20  ;;  %v4757_v29 = vpop.permute.xlu1 %4756  ;;  %v2064_v19 = vpack.c.bf16 %v5321_v48, %v5321_v48 }
 0x23e   :  { %4416 = vmatpush3.bf16.xpose.msra.mxu0 %v1227_v1  ;;  %4422 = vmatpush3.bf16.xpose.msra.mxu1 %v1273_v2  ;;  %v663_v21 = vpack.c.bf16 %v4754_v14, %v4754_v14  ;;  %v662_v24 = vpack.c.bf16 %v4753_v15, %v4753_v15  ;;  %v4759_v34 = vunpack.i.h.bf16 %v4757_v29  ;;  %v4758_v37 = vunpack.i.l.bf16 %v4757_v29 }
 0x23f   :  { %4417 = vmatprep.mubr.msk.bf16.mxu0 %vm5035_vm1, %v5034_v5  ;;  %4423 = vmatprep.mubr.msk.bf16.mxu1 %vm5035_vm1, %v5034_v5  ;;  %v4762_v25 = vpop.permute.xlu0 %4761 }
 0x240   :  { %4427 = vmatprep.subr.bf16.mxu0 %v5034_v5  ;;  %4433 = vmatprep.subr.bf16.mxu1 %v5034_v5  ;;  %v4764_v30 = vunpack.i.h.bf16 %v4762_v25  ;;  %v4763_v31 = vunpack.i.l.bf16 %v4762_v25  ;;  %v1411_v32 = vsel %vm670_vm3, %v662_v24, 0  ;;  %v1457_v33 = vsel %vm670_vm3, %v663_v21, 0 }
 0x241   :  { %v639_v35 = vpack.c.bf16 %v4759_v34, %v4759_v34  ;;  %v638_v40 = vpack.c.bf16 %v4758_v37, %v4758_v37  ;;  %v4767_v41 = vpop.permute.xlu1 %4766  ;;  %v2137_v25 = vsel %vm160_vm2, %v2064_v19, 0 }
 0x242   :  { %v665_v38 = vpack.c.bf16 %v4764_v30, %v4764_v30  ;;  %v664_v39 = vpack.c.bf16 %v4763_v31, %v4763_v31  ;;  %v4769_v46 = vunpack.i.h.bf16 %v4767_v41  ;;  %v4768_v49 = vunpack.i.l.bf16 %v4767_v41 }
 0x243   :  { %v4772_v36 = vpop.permute.xlu0 %4771 }
 0x244   :  { %v4774_v42 = vunpack.i.h.bf16 %v4772_v36  ;;  %v4773_v43 = vunpack.i.l.bf16 %v4772_v36  ;;  %v1503_v44 = vsel %vm670_vm3, %v664_v39, 0  ;;  %v1549_v45 = vsel %vm670_vm3, %v665_v38, 0 }
 0x245   :  { %4418 = vmatmul.mubr.msk.bf16.vlgmr.msra.gmra.mxu0 %vm670_vm3, %v634_v12  ;;  %4424 = vmatmul.mubr.msk.bf16.vlgmr.msra.gmra.mxu1 %vm670_vm3, %v635_v8  ;;  %v641_v56 = vpack.c.bf16 %v4769_v46, %v4769_v46  ;;  %v640_v57 = vpack.c.bf16 %v4768_v49, %v4768_v49  ;;  %v4777_v58 = vpop.permute.xlu1 %4776 }
 0x246   :  { %4428 = vmatpush3.bf16.xpose.msra.mxu0 %v1319_v17  ;;  %4434 = vmatpush3.bf16.xpose.msra.mxu1 %v1365_v18  ;;  %v667_v50 = vpack.c.bf16 %v4774_v42, %v4774_v42  ;;  %v666_v51 = vpack.c.bf16 %v4773_v43, %v4773_v43  ;;  %v4779_v4 = vunpack.i.h.bf16 %v4777_v58  ;;  %v4778_v53 = vunpack.i.l.bf16 %v4777_v58 }
 0x247   :  { %4429 = vmatprep.mubr.msk.bf16.mxu0 %vm5035_vm1, %v5034_v5  ;;  %4435 = vmatprep.mubr.msk.bf16.mxu1 %vm5035_vm1, %v5034_v5  ;;  %v4782_v54 = vpop.permute.xlu0 %4781  ;;  %v2063_v18 = vpack.c.bf16 %v5319_v47, %v5319_v47 }
 0x248   :  { %4439 = vmatprep.subr.bf16.mxu0 %v5034_v5  ;;  %4445 = vmatprep.subr.bf16.mxu1 %v5034_v5  ;;  %v4784_v61 = vunpack.i.h.bf16 %v4782_v54  ;;  %v4783_v63 = vunpack.i.l.bf16 %v4782_v54  ;;  %v1595_v1 = vsel %vm670_vm3, %v666_v51, 0  ;;  %v1641_v2 = vsel %vm670_vm3, %v667_v50, 0 }
 0x249   :  { %v643_v11 = vpack.c.bf16 %v4779_v4, %v4779_v4  ;;  %v642_v8 = vpack.c.bf16 %v4778_v53, %v4778_v53  ;;  %v4787_v12 = vpop.permute.xlu1 %4786  ;;  %v2091_v24 = vsel %vm160_vm2, %v2063_v18, 0 }
 0x24a   :  { %v669_v60 = vpack.c.bf16 %v4784_v61, %v4784_v61  ;;  %v668_v7 = vpack.c.bf16 %v4783_v63, %v4783_v63  ;;  %v4789_v15 = vunpack.i.h.bf16 %v4787_v12  ;;  %v4788_v17 = vunpack.i.l.bf16 %v4787_v12 }
 0x24c   :  { %v1687_v13 = vsel %vm670_vm3, %v668_v7, 0  ;;  %v1733_v14 = vsel %vm670_vm3, %v669_v60, 0  ;;  %v645_v20 = vpack.c.bf16 %v4789_v15, %v4789_v15  ;;  %v644_v21 = vpack.c.bf16 %v4788_v17, %v4788_v17 }
 0x24d   :  { %4430 = vmatmul.mubr.msk.bf16.vlgmr.msra.gmra.mxu0 %vm670_vm3, %v636_v27  ;;  %4436 = vmatmul.mubr.msk.bf16.vlgmr.msra.gmra.mxu1 %vm670_vm3, %v637_v26 }
 0x24e   :  { %4440 = vmatpush3.bf16.xpose.msra.mxu0 %v1411_v32  ;;  %4446 = vmatpush3.bf16.xpose.msra.mxu1 %v1457_v33 }
 0x24f   :  { %4441 = vmatprep.mubr.msk.bf16.mxu0 %vm5035_vm1, %v5034_v5  ;;  %4447 = vmatprep.mubr.msk.bf16.mxu1 %vm5035_vm1, %v5034_v5 }
 0x250   :  { %4451 = vmatprep.subr.bf16.mxu0 %v5034_v5  ;;  %4457 = vmatprep.subr.bf16.mxu1 %v5034_v5 }
 0x255   :  { %4442 = vmatmul.mubr.msk.bf16.vlgmr.msra.gmra.mxu0 %vm670_vm3, %v638_v40  ;;  %4448 = vmatmul.mubr.msk.bf16.vlgmr.msra.gmra.mxu1 %vm670_vm3, %v639_v35 }
 0x256   :  { %4452 = vmatpush3.bf16.xpose.msra.mxu0 %v1503_v44  ;;  %4458 = vmatpush3.bf16.xpose.msra.mxu1 %v1549_v45 }
 0x257   :  { %4453 = vmatprep.mubr.msk.bf16.mxu0 %vm5035_vm1, %v5034_v5  ;;  %4459 = vmatprep.mubr.msk.bf16.mxu1 %vm5035_vm1, %v5034_v5 }
 0x258   :  { %4463 = vmatprep.subr.bf16.mxu0 %v5034_v5  ;;  %4469 = vmatprep.subr.bf16.mxu1 %v5034_v5 }
 0x25d   :  { %4454 = vmatmul.mubr.msk.bf16.vlgmr.msra.gmra.mxu0 %vm670_vm3, %v640_v57  ;;  %4460 = vmatmul.mubr.msk.bf16.vlgmr.msra.gmra.mxu1 %vm670_vm3, %v641_v56 }
 0x25e   :  { %4464 = vmatpush3.bf16.xpose.msra.mxu0 %v1595_v1  ;;  %4470 = vmatpush3.bf16.xpose.msra.mxu1 %v1641_v2 }
 0x25f   :  { %4465 = vmatprep.mubr.msk.bf16.mxu0 %vm5035_vm1, %v5034_v5  ;;  %4471 = vmatprep.mubr.msk.bf16.mxu1 %vm5035_vm1, %v5034_v5 }
 0x260   :  { %4475 = vmatprep.subr.bf16.mxu0 %v5034_v5  ;;  %4481 = vmatprep.subr.bf16.mxu1 %v5034_v5 }
 0x265   :  { %4466 = vmatmul.mubr.msk.bf16.vlgmr.msra.gmra.mxu0 %vm670_vm3, %v642_v8  ;;  %4472 = vmatmul.mubr.msk.bf16.vlgmr.msra.gmra.mxu1 %vm670_vm3, %v643_v11 }
 0x266   :  { %4476 = vmatpush3.bf16.xpose.msra.mxu0 %v1687_v13  ;;  %4482 = vmatpush3.bf16.xpose.msra.mxu1 %v1733_v14 }
 0x267   :  { %4477 = vmatprep.mubr.msk.bf16.mxu0 %vm5035_vm1, %v5034_v5  ;;  %4483 = vmatprep.mubr.msk.bf16.mxu1 %vm5035_vm1, %v5034_v5 }
 0x268   :  { %4487 = vmatprep.subr.bf16.mxu0 %v5034_v5  ;;  %4493 = vmatprep.subr.bf16.mxu1 %v5034_v5 }
 0x26d   :  { %4478 = vmatmul.mubr.msk.bf16.vlgmr.msra.gmra.mxu0 %vm670_vm3, %v644_v21  ;;  %4484 = vmatmul.mubr.msk.bf16.vlgmr.msra.gmra.mxu1 %vm670_vm3, %v645_v20 }
 0x26e   :  { %4488 = vmatpush3.bf16.msra.mxu0 %v2091_v24  ;;  %4494 = vmatpush3.bf16.msra.mxu1 %v2137_v25 }
 0x26f   :  { %4489 = vmatprep.mubr.msk.bf16.mxu0 %vm5035_vm1, %v5034_v5  ;;  %4495 = vmatprep.mubr.msk.bf16.mxu1 %vm5035_vm1, %v5034_v5 }
 0x270   :  { %4499 = vmatprep.subr.bf16.mxu0 %v5034_v5  ;;  %4505 = vmatprep.subr.bf16.mxu1 %v5034_v5 }
 0x271   :  { %v5474_v47 = vpop.f32.mrf.mxu0 }
 0x272   :  { %v1775_v48 = vsel %vm670_vm3, %v5474_v47, -inf }
 0x273   :  { %v4347_v26 = vpop.f32.mrf.mxu0  ;;  %1776 = vmax.xlane.f32.xlu0 %v1775_v48 }
 0x275   :  { %v714_v27 = vpop.f32.mrf.mxu0 }
 0x277   :  { %v4348_v29 = vpop.f32.mrf.mxu0 }
 0x279   :  { %v5478_v30 = vpop.f32.mrf.mxu0 }
 0x27a   :  { %v1778_v31 = vsel %vm670_vm3, %v5478_v30, -inf }
 0x27b   :  { %v4353_v32 = vpop.f32.mrf.mxu0  ;;  %1779 = vmax.xlane.f32.xlu1 %v1778_v31 }
 0x27d   :  { %v760_v33 = vpop.f32.mrf.mxu0  ;;  %v5482_v34 = vpop.f32.mrf.mxu1 }
 0x27e   :  { %v1784_v37 = vsel %vm670_vm3, %v5482_v34, -inf }
 0x27f   :  { %v4354_v38 = vpop.f32.mrf.mxu0  ;;  %1785 = vmax.xlane.f32.xlu0 %v1784_v37  ;;  %v4365_v39 = vpop.f32.mrf.mxu1 }
 0x280   :  { %v5526_v37 = vpop.permute.xlu1 %4791 }
 0x281   :  { %v5486_v36 = vpop.f32.mrf.mxu0  ;;  %v852_v35 = vpop.f32.mrf.mxu1 }
 0x282   :  { %v1781_v40 = vsel %vm670_vm3, %v5486_v36, -inf }
 0x283   :  { %v4359_v41 = vpop.f32.mrf.mxu0  ;;  %1782 = vmax.xlane.f32.xlu0 %v1781_v40  ;;  %v4366_v42 = vpop.f32.mrf.mxu1 }
 0x285   :  { %v806_v43 = vpop.f32.mrf.mxu0  ;;  %v5490_v44 = vpop.f32.mrf.mxu1 }
 0x286   :  { %v1790_v61 = vsel %vm670_vm3, %v5490_v44, -inf }
 0x287   :  { %v4360_v45 = vpop.f32.mrf.mxu0  ;;  %v4377_v46 = vpop.f32.mrf.mxu1 }
 0x289   :  { %v5492_v49 = vpop.f32.mrf.mxu0  ;;  %v944_v50 = vpop.f32.mrf.mxu1 }
 0x28a   :  { %v1787_v58 = vsel %vm670_vm3, %v5492_v49, -inf }
 0x28b   :  { %v4371_v51 = vpop.f32.mrf.mxu0  ;;  %v4378_v54 = vpop.f32.mrf.mxu1 }
 0x28c   :  { %4801 = vrot.lane.b32.xlu1 %v5370_v6, %s5036_s4 }
 0x28d   :  { %v898_v56 = vpop.f32.mrf.mxu0 }
 0x28f   :  { %v4372_v57 = vpop.f32.mrf.mxu0 }
 0x299   :  { %4796 = vrot.lane.b32.xlu0 %v5354_v62, %s5036_s4 }
 0x2b0   :  { %1788 = vmax.xlane.f32.xlu1 %v1787_v58 }
 0x2b8   :  { %1791 = vmax.xlane.f32.xlu0 %v1790_v61 }
 0x2ec   :  { %v5502_v63 = vpop.f32.mrf.mxu0  ;;  %v5504_v1 = vpop.f32.mrf.mxu1 }
 0x2ed   :  { %v1793_v2 = vsel %vm670_vm3, %v5502_v63, -inf  ;;  %v1796_v4 = vsel %vm670_vm3, %v5504_v1, -inf }
 0x2ee   :  { %v4383_v53 = vpop.f32.mrf.mxu0  ;;  %1794 = vmax.xlane.f32.xlu1 %v1793_v2  ;;  %1797 = vmax.xlane.f32.xlu0 %v1796_v4  ;;  %v4389_v60 = vpop.f32.mrf.mxu1 }
 0x2f0   :  { %v990_v7 = vpop.f32.mrf.mxu0  ;;  %v1036_v11 = vpop.f32.mrf.mxu1 }
 0x2f2   :  { %v4384_v8 = vpop.f32.mrf.mxu0  ;;  %v4390_v12 = vpop.f32.mrf.mxu1 }
 0x2f4   :  { %v5510_v13 = vpop.f32.mrf.mxu0  ;;  %v5512_v14 = vpop.f32.mrf.mxu1 }
 0x2f5   :  { %v1799_v15 = vsel %vm670_vm3, %v5510_v13, -inf  ;;  %v1802_v17 = vsel %vm670_vm3, %v5512_v14, -inf }
 0x2f6   :  { %v4395_v18 = vpop.f32.mrf.mxu0  ;;  %1800 = vmax.xlane.f32.xlu1 %v1799_v15  ;;  %1803 = vmax.xlane.f32.xlu0 %v1802_v17  ;;  %v4401_v19 = vpop.f32.mrf.mxu1 }
 0x2f8   :  { %v1082_v20 = vpop.f32.mrf.mxu0  ;;  %v1128_v21 = vpop.f32.mrf.mxu1 }
 0x2fa   :  { %v4396_v24 = vpop.f32.mrf.mxu0  ;;  %v4402_v25 = vpop.f32.mrf.mxu1 }
 0x2fc   :  { %v1777_v27 = vpop.xlane.xlu0 %1776 }
 0x2fd   :  { %v5518_v48 = vpop.f32.mrf.mxu0  ;;  %v5520_v26 = vpop.f32.mrf.mxu1  ;;  %v1847_v38 = vsub.f32 %v5474_v47, %v1777_v27 }
 0x2fe   :  { %v1805_v29 = vsel %vm670_vm3, %v5518_v48, -inf  ;;  %v1808_v31 = vsel %vm670_vm3, %v5520_v26, -inf }
 0x2ff   :  { %v4407_v32 = vpop.f32.mrf.mxu0  ;;  %1806 = vmax.xlane.f32.xlu1 %v1805_v29  ;;  %1809 = vmax.xlane.f32.xlu0 %v1808_v31  ;;  %v4413_v33 = vpop.f32.mrf.mxu1  ;;  %v1871_v43 = vmul.f32 1.442695, %v1847_v38 }
 0x301   :  { %v1174_v39 = vpop.f32.mrf.mxu0  ;;  %v1220_v35 = vpop.f32.mrf.mxu1  ;;  %4914 = vpow2.f32 %v1871_v43 }
 0x303   :  { %v4408_v40 = vpop.f32.mrf.mxu0  ;;  %v4414_v41 = vpop.f32.mrf.mxu1 }
 0x304   :  { %v1780_v42 = vpop.xlane.xlu1 %1779 }
 0x305   :  { %v5529_v45 = vpop.f32.mrf.mxu0  ;;  %v1848_v46 = vsub.f32 %v5478_v30, %v1780_v42  ;;  %v5532_v50 = vpop.f32.mrf.mxu1 }
 0x306   :  { %v1811_v51 = vsel %vm670_vm3, %v5529_v45, -inf  ;;  %v1814_v54 = vsel %vm670_vm3, %v5532_v50, -inf }
 0x307   :  { %v1873_v56 = vmul.f32 1.442695, %v1848_v46  ;;  %v4419_v47 = vpop.f32.mrf.mxu0  ;;  %1812 = vmax.xlane.f32.xlu1 %v1811_v51  ;;  %1815 = vmax.xlane.f32.xlu0 %v1814_v54  ;;  %v4425_v57 = vpop.f32.mrf.mxu1 }
 0x308   :  { %v1786_v58 = vpop.xlane.xlu0 %1785 }
 0x309   :  { %v1266_v61 = vpop.f32.mrf.mxu0  ;;  %v1312_v2 = vpop.f32.mrf.mxu1  ;;  %4916 = vpow2.f32 %v1873_v56  ;;  %v1850_v30 = vsub.f32 %v5482_v34, %v1786_v58 }
 0x30b   :  { %v4420_v4 = vpop.f32.mrf.mxu0  ;;  %v4426_v53 = vpop.f32.mrf.mxu1  ;;  %v1877_v11 = vmul.f32 1.442695, %v1850_v30 }
 0x30c   :  { %v1783_v8 = vpop.xlane.xlu0 %1782 }
 0x30d   :  { %v5539_v60 = vpop.f32.mrf.mxu0  ;;  %v5541_v7 = vpop.f32.mrf.mxu1  ;;  %4918 = vpow2.f32 %v1877_v11  ;;  %v1849_v20 = vsub.f32 %v5486_v36, %v1783_v8 }
 0x30e   :  { %v1817_v12 = vsel %vm670_vm3, %v5539_v60, -inf  ;;  %v1820_v15 = vsel %vm670_vm3, %v5541_v7, -inf  ;;  %v5552_v29 = vpop.eup %4914 }
 0x30f   :  { %v4431_v17 = vpop.f32.mrf.mxu0  ;;  %1818 = vmax.xlane.f32.xlu1 %v1817_v12  ;;  %1821 = vmax.xlane.f32.xlu0 %v1820_v15  ;;  %v4437_v18 = vpop.f32.mrf.mxu1  ;;  %v1875_v31 = vmul.f32 1.442695, %v1849_v20  ;;  %v1919_v41 = vsel %vm670_vm3, %v5552_v29, 0.0 }
 0x311   :  { %v1358_v19 = vpop.f32.mrf.mxu0  ;;  %v1404_v34 = vpop.f32.mrf.mxu1  ;;  %4920 = vpow2.f32 %v1875_v31 }
 0x313   :  { %v4432_v21 = vpop.f32.mrf.mxu0  ;;  %v4438_v24 = vpop.f32.mrf.mxu1 }
 0x315   :  { %v5548_v25 = vpop.f32.mrf.mxu0  ;;  %v5550_v27 = vpop.f32.mrf.mxu1 }
 0x316   :  { %v1823_v32 = vsel %vm670_vm3, %v5548_v25, -inf  ;;  %v1826_v33 = vsel %vm670_vm3, %v5550_v27, -inf  ;;  %v5558_v38 = vpop.eup %4916 }
 0x317   :  { %v4443_v39 = vpop.f32.mrf.mxu0  ;;  %1824 = vmax.xlane.f32.xlu1 %v1823_v32  ;;  %1827 = vmax.xlane.f32.xlu0 %v1826_v33  ;;  %v4449_v36 = vpop.f32.mrf.mxu1  ;;  %v1922_v42 = vsel %vm670_vm3, %v5558_v38, 0.0 }
 0x319   :  { %v1450_v35 = vpop.f32.mrf.mxu0  ;;  %v1496_v40 = vpop.f32.mrf.mxu1 }
 0x31a   :  { %v5572_v57 = vpop.eup %4918 }
 0x31b   :  { %v4444_v43 = vpop.f32.mrf.mxu0  ;;  %1920 = vadd.xlane.f32.xlu1 %v1919_v41  ;;  %1923 = vadd.xlane.f32.xlu0 %v1922_v42  ;;  %v4450_v46 = vpop.f32.mrf.mxu1  ;;  %v1928_v4 = vsel %vm670_vm3, %v5572_v57, 0.0 }
 0x31d   :  { %v5564_v51 = vpop.f32.mrf.mxu0  ;;  %v5566_v54 = vpop.f32.mrf.mxu1 }
 0x31e   :  { %v1829_v56 = vsel %vm670_vm3, %v5564_v51, -inf  ;;  %v1832_v47 = vsel %vm670_vm3, %v5566_v54, -inf  ;;  %v5584_v18 = vpop.eup %4920 }
 0x31f   :  { %v4455_v58 = vpop.f32.mrf.mxu0  ;;  %1830 = vmax.xlane.f32.xlu1 %v1829_v56  ;;  %1833 = vmax.xlane.f32.xlu0 %v1832_v47  ;;  %v4461_v61 = vpop.f32.mrf.mxu1  ;;  %v1925_v24 = vsel %vm670_vm3, %v5584_v18, 0.0 }
 0x320   :  { %v5594_v56 = vpop.permute.xlu0 %4796  ;;  %v5599_v61 = vpop.permute.xlu1 %4801 }
 0x321   :  { %v1542_v2 = vpop.f32.mrf.mxu0  ;;  %v1588_v30 = vpop.f32.mrf.mxu1 }
 0x323   :  { %v4456_v53 = vpop.f32.mrf.mxu0  ;;  %1929 = vadd.xlane.f32.xlu0 %v1928_v4  ;;  %v4462_v11 = vpop.f32.mrf.mxu1 }
 0x325   :  { %v5576_v8 = vpop.f32.mrf.mxu0  ;;  %v5578_v12 = vpop.f32.mrf.mxu1 }
 0x326   :  { %v1835_v15 = vsel %vm670_vm3, %v5576_v8, -inf  ;;  %v1838_v17 = vsel %vm670_vm3, %v5578_v12, -inf }
 0x327   :  { %v4467_v19 = vpop.f32.mrf.mxu0  ;;  %1836 = vmax.xlane.f32.xlu1 %v1835_v15  ;;  %1839 = vmax.xlane.f32.xlu0 %v1838_v17  ;;  %v4473_v34 = vpop.f32.mrf.mxu1 }
 0x329   :  { %v1634_v20 = vpop.f32.mrf.mxu0  ;;  %v1680_v21 = vpop.f32.mrf.mxu1 }
 0x32b   :  { %v4468_v31 = vpop.f32.mrf.mxu0  ;;  %1926 = vadd.xlane.f32.xlu1 %v1925_v24  ;;  %v4474_v32 = vpop.f32.mrf.mxu1 }
 0x32d   :  { %v5588_v33 = vpop.f32.mrf.mxu0  ;;  %v5590_v39 = vpop.f32.mrf.mxu1 }
 0x32e   :  { %v1841_v36 = vsel %vm670_vm3, %v5588_v33, -inf  ;;  %v1844_v17 = vsel %vm670_vm3, %v5590_v39, -inf }
 0x32f   :  { %v4479_v35 = vpop.f32.mrf.mxu0  ;;  %1842 = vmax.xlane.f32.xlu1 %v1841_v36  ;;  %v4485_v40 = vpop.f32.mrf.mxu1 }
 0x331   :  { %v1726_v41 = vpop.f32.mrf.mxu0  ;;  %v1772_v42 = vpop.f32.mrf.mxu1 }
 0x333   :  { %v4480_v43 = vpop.f32.mrf.mxu0  ;;  %v4486_v46 = vpop.f32.mrf.mxu1 }
 0x339   :  { %v1789_v30 = vpop.xlane.xlu1 %1788 }
 0x33a   :  { %v1851_v4 = vsub.f32 %v5492_v49, %v1789_v30 }
 0x33c   :  { %v1879_v53 = vmul.f32 1.442695, %v1851_v4 }
 0x340   :  { %4806 = vrot.lane.b32.xlu1 %v5334_v52, %s5037_s27 }
 0x341   :  { %v1792_v47 = vpop.xlane.xlu0 %1791 }
 0x342   :  { %v1852_v58 = vsub.f32 %v5490_v44, %v1792_v47 }
 0x344   :  { %v1881_v2 = vmul.f32 1.442695, %v1852_v58 }
 0x346   :  { %4922 = vpow2.f32 %v1881_v2 }
 0x347   :  { %4924 = vpow2.f32 %v1879_v53 }
 0x353   :  { %v5602_v11 = vpop.eup %4922 }
 0x354   :  { %v1934_v15 = vsel %vm670_vm3, %v5602_v11, 0.0  ;;  %v5608_v44 = vpop.eup %4924 }
 0x355   :  { %1935 = vadd.xlane.f32.xlu0 %v1934_v15  ;;  %v1931_v19 = vsel %vm670_vm3, %v5608_v44, 0.0 }
 0x359   :  { %1845 = vmax.xlane.f32.xlu0 %v1844_v17 }
 0x364   :  { %1932 = vadd.xlane.f32.xlu1 %v1931_v19 }
 0x377   :  { %v1795_v34 = vpop.xlane.xlu1 %1794  ;;  %v1798_v49 = vpop.xlane.xlu0 %1797 }
 0x378   :  { %v1853_v20 = vsub.f32 %v5502_v63, %v1795_v34  ;;  %v1854_v21 = vsub.f32 %v5504_v1, %v1798_v49 }
 0x37a   :  { %v1883_v24 = vmul.f32 1.442695, %v1853_v20  ;;  %v1885_v31 = vmul.f32 1.442695, %v1854_v21 }
 0x37c   :  { %4926 = vpow2.f32 %v1883_v24 }
 0x37d   :  { %4928 = vpow2.f32 %v1885_v31 }
 0x37f   :  { %v1801_v32 = vpop.xlane.xlu1 %1800 }
 0x380   :  { %v1855_v36 = vsub.f32 %v5510_v13, %v1801_v32  ;;  %v1804_v13 = vpop.xlane.xlu0 %1803 }
 0x382   :  { %v1887_v35 = vmul.f32 1.442695, %v1855_v36 }
 0x384   :  { %4930 = vpow2.f32 %v1887_v35 }
 0x388   :  { %v1807_v40 = vpop.xlane.xlu1 %1806 }
 0x389   :  { %v5615_v41 = vpop.eup %4926  ;;  %v1857_v42 = vsub.f32 %v5518_v48, %v1807_v40  ;;  %v1810_v48 = vpop.xlane.xlu0 %1809 }
 0x38a   :  { %v5618_v43 = vpop.eup %4928  ;;  %v1937_v63 = vsel %vm670_vm3, %v5615_v41, 0.0  ;;  %v1858_v35 = vsub.f32 %v5520_v26, %v1810_v48 }
 0x38b   :  { %v1891_v1 = vmul.f32 1.442695, %v1857_v42  ;;  %1938 = vadd.xlane.f32.xlu1 %v1937_v63  ;;  %v1940_v46 = vsel %vm670_vm3, %v5618_v43, 0.0 }
 0x38c   :  { %1941 = vadd.xlane.f32.xlu0 %v1940_v46 }
 0x38d   :  { %4932 = vpow2.f32 %v1891_v1 }
 0x390   :  { %v1813_v2 = vpop.xlane.xlu1 %1812  ;;  %v1816_v30 = vpop.xlane.xlu0 %1815 }
 0x391   :  { %v5624_v47 = vpop.eup %4930 }
 0x392   :  { %v1943_v58 = vsel %vm670_vm3, %v5624_v47, 0.0 }
 0x393   :  { %1944 = vadd.xlane.f32.xlu1 %v1943_v58  ;;  %v1893_v58 = vmul.f32 1.442695, %v1858_v35 }
 0x398   :  { %v1819_v4 = vpop.xlane.xlu1 %1818  ;;  %v1822_v34 = vpop.xlane.xlu0 %1821 }
 0x399   :  { %v1861_v53 = vsub.f32 %v5539_v60, %v1819_v4  ;;  %v1856_v60 = vsub.f32 %v5512_v14, %v1804_v13  ;;  %v1859_v14 = vsub.f32 %v5529_v45, %v1813_v2  ;;  %v2066_v2 = vpack.c.bf16 %v5345_v59, %v5345_v59 }
 0x39a   :  { %v5629_v15 = vpop.eup %4932 }
 0x39b   :  { %v1899_v17 = vmul.f32 1.442695, %v1861_v53  ;;  %v1949_v19 = vsel %vm670_vm3, %v5629_v15, 0.0  ;;  %v1889_v63 = vmul.f32 1.442695, %v1856_v60  ;;  %v2065_v60 = vpack.c.bf16 %v5336_v55, %v5336_v55 }
 0x39c   :  { %1950 = vadd.xlane.f32.xlu1 %v1949_v19  ;;  %v1895_v53 = vmul.f32 1.442695, %v1859_v14  ;;  %v2229_v55 = vsel %vm160_vm2, %v2066_v2, 0 }
 0x39d   :  { %4934 = vpow2.f32 %v1899_v17  ;;  %v1860_v17 = vsub.f32 %v5532_v50, %v1816_v30 }
 0x3a0   :  { %v5633_v49 = vpop.xlane.xlu1 %1824  ;;  %v5635_v20 = vpop.xlane.xlu0 %1827 }
 0x3a2   :  { %4811 = vrot.lane.b32.xlu0 %v5354_v62, %s5037_s27 }
 0x3a4   :  { %v1921_v21 = vpop.xlane.xlu1 %1920  ;;  %v1924_v24 = vpop.xlane.xlu0 %1923 }
 0x3a5   :  { %4936 = vrcp.f32 %v1921_v21 }
 0x3a6   :  { %4938 = vrcp.f32 %v1924_v24 }
 0x3a8   :  { %v1834_v31 = vpop.xlane.xlu0 %1833  ;;  %v5646_v1 = vpop.xlane.xlu1 %1830 }
 0x3a9   :  { %v1866_v32 = vsub.f32 %v5566_v54, %v1834_v31  ;;  %v1897_v31 = vmul.f32 1.442695, %v1860_v17 }
 0x3aa   :  { %v5641_v36 = vpop.eup %4934 }
 0x3ab   :  { %v1909_v40 = vmul.f32 1.442695, %v1866_v32  ;;  %v1961_v42 = vsel %vm670_vm3, %v5641_v36, 0.0  ;;  %v1862_v32 = vsub.f32 %v5541_v7, %v1822_v34  ;;  %v1863_v7 = vsub.f32 %v5548_v25, %v5633_v49 }
 0x3ac   :  { %1962 = vadd.xlane.f32.xlu1 %v1961_v42  ;;  %v1930_v46 = vpop.xlane.xlu0 %1929  ;;  %v2068_v42 = vpack.c.bf16 %v5362_v3, %v5362_v3 }
 0x3ad   :  { %4940 = vpow2.f32 %v1909_v40  ;;  %v1901_v30 = vmul.f32 1.442695, %v1862_v32  ;;  %v1903_v49 = vmul.f32 1.442695, %v1863_v7 }
 0x3ae   :  { %4942 = vrcp.f32 %v1930_v46  ;;  %v1864_v46 = vsub.f32 %v5550_v27, %v5635_v20  ;;  %v1865_v20 = vsub.f32 %v5564_v51, %v5646_v1 }
 0x3af   :  { %4944 = vpow2.f32 %v1889_v63 }
 0x3b0   :  { %v5649_v54 = vpop.xlane.xlu1 %1836  ;;  %v1840_v13 = vpop.xlane.xlu0 %1839  ;;  %4946 = vpow2.f32 %v1893_v58  ;;  %v1905_v27 = vmul.f32 1.442695, %v1864_v46 }
 0x3b1   :  { %v1868_v26 = vsub.f32 %v5578_v12, %v1840_v13  ;;  %v1867_v51 = vsub.f32 %v5576_v8, %v5649_v54 }
 0x3b2   :  { %v4937_v4 = vpop.eup %4936 }
 0x3b3   :  { %v1913_v48 = vmul.f32 1.442695, %v1868_v26  ;;  %v4939_v21 = vpop.eup %4938  ;;  %v2015_v24 = vmul.f32 %v4937_v4, %v5552_v29  ;;  %v2183_v29 = vsel %vm160_vm2, %v2065_v60, 0 }
 0x3b4   :  { %v1927_v19 = vpop.xlane.xlu1 %1926  ;;  %v2016_v45 = vmul.f32 %v4939_v21, %v5558_v38 }
 0x3b5   :  { %4948 = vpow2.f32 %v1913_v48  ;;  %v2039_v12 = vpack.c.bf16 %v2015_v24, %v2015_v24 }
 0x3b6   :  { %4950 = vrcp.f32 %v1927_v19  ;;  %v2040_v50 = vpack.c.bf16 %v2016_v45, %v2016_v45  ;;  %v1907_v19 = vmul.f32 1.442695, %v1865_v20 }
 0x3b7   :  { %4952 = vpow2.f32 %v1895_v53  ;;  %4490 = vmatmul.mubr.msk.bf16.vlgmr.msra.gmra.mxu0 %vm670_vm3, %v2039_v12  ;;  %v2067_v53 = vpack.c.bf16 %v5356_v0, %v5356_v0  ;;  %v1911_v0 = vmul.f32 1.442695, %v1867_v51 }
 0x3b8   :  { %4496 = vmatmul.mubr.msk.bf16.vlgmr.msra.gmra.mxu1 %vm670_vm3, %v2040_v50  ;;  %4500 = vmatpush3.bf16.msra.mxu0 %v2183_v29  ;;  %4954 = vpow2.f32 %v1897_v31  ;;  %v1843_v24 = vpop.xlane.xlu1 %1842 }
 0x3b9   :  { %4506 = vmatpush3.bf16.msra.mxu1 %v2229_v55  ;;  %4507 = vmatprep.mubr.msk.bf16.mxu1 %vm5035_vm1, %v5034_v5  ;;  %4956 = vpow2.f32 %v1901_v30  ;;  %v2275_v60 = vsel %vm160_vm2, %v2067_v53, 0  ;;  %v1869_v8 = vsub.f32 %v5588_v33, %v1843_v24 }
 0x3ba   :  { %v5664_v38 = vpop.eup %4940  ;;  %4517 = vmatprep.subr.bf16.mxu1 %v5034_v5  ;;  %4501 = vmatprep.mubr.msk.bf16.mxu0 %vm5035_vm1, %v5034_v5  ;;  %4958 = vpow2.f32 %v1903_v49  ;;  %v4794_v49 = vunpack.i.h.bf16 %v5526_v37 }
 0x3bb   :  { %v4943_v59 = vpop.eup %4942  ;;  %v1976_v34 = vsel %vm670_vm3, %v5664_v38, 0.0  ;;  %4511 = vmatprep.subr.bf16.mxu0 %v5034_v5  ;;  %4960 = vpow2.f32 %v1905_v27  ;;  %v1915_v45 = vmul.f32 1.442695, %v1869_v8 }
 0x3bc   :  { %v5675_v35 = vpop.eup %4944  ;;  %1977 = vadd.xlane.f32.xlu1 %v1976_v34  ;;  %v2018_v40 = vmul.f32 %v4943_v59, %v5572_v57  ;;  %v2321_v57 = vsel %vm160_vm2, %v2068_v42, 0  ;;  %4962 = vpow2.f32 %v1907_v19  ;;  %v5747_v46 = vpop.permute.xlu1 %4806 }
 0x3bd   :  { %v5681_v25 = vpop.eup %4946  ;;  %v1946_v58 = vsel %vm670_vm3, %v5675_v35, 0.0  ;;  %4964 = vpow2.f32 %v1911_v0 }
 0x3be   :  { %v2042_v63 = vpack.c.bf16 %v2018_v40, %v2018_v40  ;;  %v1952_v3 = vsel %vm670_vm3, %v5681_v25, 0.0  ;;  %4966 = vpow2.f32 %v1915_v45 }
 0x3c0   :  { %4508 = vmatmul.mubr.msk.bf16.vlgmr.msra.gmra.mxu1 %vm670_vm3, %v2042_v63 }
 0x3c1   :  { %1947 = vadd.xlane.f32.xlu0 %v1946_v58  ;;  %4518 = vmatpush3.bf16.msra.mxu1 %v2321_v57  ;;  %v2070_v57 = vpack.c.bf16 %v4794_v49, %v4794_v49 }
 0x3c2   :  { %v5689_v14 = vpop.eup %4948  ;;  %4519 = vmatprep.mubr.msk.bf16.mxu1 %vm5035_vm1, %v5034_v5  ;;  %4529 = vmatprep.subr.bf16.mxu1 %v5034_v5 }
 0x3c3   :  { %v4951_v13 = vpop.eup %4950  ;;  %v1982_v26 = vsel %vm670_vm3, %v5689_v14, 0.0 }
 0x3c4   :  { %v5700_v48 = vpop.eup %4952  ;;  %1983 = vadd.xlane.f32.xlu1 %v1982_v26  ;;  %v2017_v4 = vmul.f32 %v4951_v13, %v5584_v18  ;;  %v4793_v26 = vunpack.i.l.bf16 %v5526_v37 }
 0x3c5   :  { %1953 = vadd.xlane.f32.xlu0 %v1952_v3  ;;  %v1955_v1 = vsel %vm670_vm3, %v5700_v48, 0.0  ;;  %v5709_v21 = vpop.eup %4954 }
 0x3c6   :  { %v2041_v17 = vpack.c.bf16 %v2017_v4, %v2017_v4  ;;  %v1958_v18 = vsel %vm670_vm3, %v5709_v21, 0.0  ;;  %v5719_v54 = vpop.eup %4956  ;;  %v2069_v53 = vpack.c.bf16 %v4793_v26, %v4793_v26 }
 0x3c7   :  { %v1964_v2 = vsel %vm670_vm3, %v5719_v54, 0.0  ;;  %v5723_v12 = vpop.eup %4958 }
 0x3c8   :  { %4502 = vmatmul.mubr.msk.bf16.vlgmr.msra.gmra.mxu0 %vm670_vm3, %v2041_v17  ;;  %v1967_v31 = vsel %vm670_vm3, %v5723_v12, 0.0  ;;  %v5727_v32 = vpop.eup %4960  ;;  %v2367_v51 = vsel %vm160_vm2, %v2069_v53, 0 }
 0x3c9   :  { %1956 = vadd.xlane.f32.xlu0 %v1955_v1  ;;  %4512 = vmatpush3.bf16.msra.mxu0 %v2275_v60  ;;  %v1970_v33 = vsel %vm670_vm3, %v5727_v32, 0.0  ;;  %v5733_v50 = vpop.eup %4962  ;;  %v4799_v1 = vunpack.i.h.bf16 %v5594_v56 }
 0x3ca   :  { %4513 = vmatprep.mubr.msk.bf16.mxu0 %vm5035_vm1, %v5034_v5  ;;  %4523 = vmatprep.subr.bf16.mxu0 %v5034_v5  ;;  %v1973_v29 = vsel %vm670_vm3, %v5733_v50, 0.0  ;;  %v5737_v55 = vpop.eup %4964 }
 0x3cb   :  { %v1979_v30 = vsel %vm670_vm3, %v5737_v55, 0.0  ;;  %v5741_v7 = vpop.eup %4966 }
 0x3cc   :  { %v1985_v42 = vsel %vm670_vm3, %v5741_v7, 0.0 }
 0x3cd   :  { %1959 = vadd.xlane.f32.xlu0 %v1958_v18  ;;  %v2072_v18 = vpack.c.bf16 %v4799_v1, %v4799_v1 }
 0x3d1   :  { %1965 = vadd.xlane.f32.xlu0 %v1964_v2 }
 0x3d5   :  { %1968 = vadd.xlane.f32.xlu0 %v1967_v31  ;;  %4816 = vrot.lane.b32.xlu1 %v5370_v6, %s5037_s27 }
 0x3d9   :  { %1971 = vadd.xlane.f32.xlu0 %v1970_v33  ;;  %v4803_v33 = vunpack.i.l.bf16 %v5599_v61 }
 0x3dd   :  { %1974 = vadd.xlane.f32.xlu0 %v1973_v29 }
 0x3de   :  { %v1936_v59 = vpop.xlane.xlu0 %1935 }
 0x3df   :  { %4968 = vrcp.f32 %v1936_v59 }
 0x3e1   :  { %1980 = vadd.xlane.f32.xlu0 %v1979_v30 }
 0x3e2   :  { %v1846_v34 = vpop.xlane.xlu0 %1845 }
 0x3e3   :  { %v1870_v40 = vsub.f32 %v5590_v39, %v1846_v34  ;;  %v2413_v39 = vsel %vm160_vm2, %v2070_v57, 0 }
 0x3e5   :  { %v1917_v63 = vmul.f32 1.442695, %v1870_v40  ;;  %1986 = vadd.xlane.f32.xlu0 %v1985_v42  ;;  %v4808_v40 = vunpack.i.l.bf16 %v5747_v46 }
 0x3e7   :  { %4970 = vpow2.f32 %v1917_v63  ;;  %v2075_v63 = vpack.c.bf16 %v4808_v40, %v4808_v40 }
 0x3ec   :  { %v4969_v58 = vpop.eup %4968 }
 0x3ed   :  { %v1933_v3 = vpop.xlane.xlu1 %1932  ;;  %v2020_v13 = vmul.f32 %v4969_v58, %v5602_v11  ;;  %v2643_v58 = vsel %vm160_vm2, %v2075_v63, 0 }
 0x3ee   :  { %4972 = vrcp.f32 %v1933_v3 }
 0x3ef   :  { %v2044_v27 = vpack.c.bf16 %v2020_v13, %v2020_v13 }
 0x3f1   :  { %4520 = vmatmul.mubr.msk.bf16.vlgmr.msra.gmra.mxu1 %vm670_vm3, %v2044_v27 }
 0x3f2   :  { %4530 = vmatpush3.bf16.msra.mxu1 %v2413_v39  ;;  %4531 = vmatprep.mubr.msk.bf16.mxu1 %vm5035_vm1, %v5034_v5 }
 0x3f3   :  { %4541 = vmatprep.subr.bf16.mxu1 %v5034_v5 }
 0x3f4   :  { %v5755_v20 = vpop.eup %4970 }
 0x3f5   :  { %v1988_v4 = vsel %vm670_vm3, %v5755_v20, 0.0 }
 0x3f9   :  { %1989 = vadd.xlane.f32.xlu1 %v1988_v4 }
 0x3fb   :  { %v4973_v11 = vpop.eup %4972  ;;  %4821 = vrot.lane.b32.xlu0 %v5334_v52, %s5038_s8 }
 0x3fc   :  { %v2019_v17 = vmul.f32 %v4973_v11, %v5608_v44 }
 0x3fe   :  { %v2043_v19 = vpack.c.bf16 %v2019_v17, %v2019_v17 }
 0x3ff   :  { %4826 = vrot.lane.b32.xlu0 %v5354_v62, %s5038_s8  ;;  %v4798_v62 = vunpack.i.l.bf16 %v5594_v56  ;;  %v2505_v56 = vsel %vm160_vm2, %v2072_v18, 0 }
 0x400   :  { %4514 = vmatmul.mubr.msk.bf16.vlgmr.msra.gmra.mxu0 %vm670_vm3, %v2043_v19 }
 0x401   :  { %4524 = vmatpush3.bf16.msra.mxu0 %v2367_v51  ;;  %4525 = vmatprep.mubr.msk.bf16.mxu0 %vm5035_vm1, %v5034_v5  ;;  %v2071_v0 = vpack.c.bf16 %v4798_v62, %v4798_v62 }
 0x402   :  { %4535 = vmatprep.subr.bf16.mxu0 %v5034_v5 }
 0x403   :  { %4831 = vrot.lane.b32.xlu0 %v5370_v6, %s5038_s8  ;;  %v2459_v29 = vsel %vm160_vm2, %v2071_v0, 0 }
 0x414   :  { %v1939_v52 = vpop.xlane.xlu1 %1938 }
 0x415   :  { %4974 = vrcp.f32 %v1939_v52  ;;  %v1942_v37 = vpop.xlane.xlu0 %1941 }
 0x416   :  { %4976 = vrcp.f32 %v1942_v37 }
 0x419   :  { %v4812_v57 = vpop.permute.xlu0 %4811 }
 0x41a   :  { %v4813_v62 = vunpack.i.l.bf16 %v4812_v57 }
 0x41c   :  { %v1945_v44 = vpop.xlane.xlu1 %1944  ;;  %v2077_v0 = vpack.c.bf16 %v4813_v62, %v4813_v62 }
 0x41d   :  { %4978 = vrcp.f32 %v1945_v44  ;;  %v4809_v44 = vunpack.i.h.bf16 %v5747_v46 }
 0x422   :  { %v4975_v24 = vpop.eup %4974 }
 0x423   :  { %v4977_v60 = vpop.eup %4976  ;;  %v2021_v8 = vmul.f32 %v4975_v24, %v5615_v41 }
 0x424   :  { %v2022_v45 = vmul.f32 %v4977_v60, %v5618_v43  ;;  %v2073_v43 = vpack.c.bf16 %v4803_v33, %v4803_v33  ;;  %v2076_v60 = vpack.c.bf16 %v4809_v44, %v4809_v44  ;;  %v4814_v33 = vunpack.i.h.bf16 %v4812_v57 }
 0x425   :  { %v1951_v2 = vpop.xlane.xlu1 %1950  ;;  %v2045_v6 = vpack.c.bf16 %v2021_v8, %v2021_v8 }
 0x426   :  { %4980 = vrcp.f32 %v1951_v2  ;;  %v2046_v31 = vpack.c.bf16 %v2022_v45, %v2022_v45  ;;  %v2551_v34 = vsel %vm160_vm2, %v2073_v43, 0 }
 0x427   :  { %4526 = vmatmul.mubr.msk.bf16.vlgmr.msra.gmra.mxu0 %vm670_vm3, %v2045_v6 }
 0x428   :  { %4532 = vmatmul.mubr.msk.bf16.vlgmr.msra.gmra.mxu1 %vm670_vm3, %v2046_v31  ;;  %4536 = vmatpush3.bf16.msra.mxu0 %v2459_v29 }
 0x429   :  { %4542 = vmatpush3.bf16.msra.mxu1 %v2505_v56  ;;  %4537 = vmatprep.mubr.msk.bf16.mxu0 %vm5035_vm1, %v5034_v5  ;;  %v2689_v56 = vsel %vm160_vm2, %v2076_v60, 0 }
 0x42a   :  { %v4979_v41 = vpop.eup %4978  ;;  %4547 = vmatprep.subr.bf16.mxu0 %v5034_v5  ;;  %4543 = vmatprep.mubr.msk.bf16.mxu1 %vm5035_vm1, %v5034_v5 }
 0x42b   :  { %v2023_v59 = vmul.f32 %v4979_v41, %v5624_v47  ;;  %4553 = vmatprep.subr.bf16.mxu1 %v5034_v5 }
 0x42d   :  { %v2047_v30 = vpack.c.bf16 %v2023_v59, %v2023_v59  ;;  %v2078_v59 = vpack.c.bf16 %v4814_v33, %v4814_v33 }
 0x42f   :  { %4538 = vmatmul.mubr.msk.bf16.vlgmr.msra.gmra.mxu0 %vm670_vm3, %v2047_v30 }
 0x430   :  { %4548 = vmatpush3.bf16.msra.mxu0 %v2551_v34  ;;  %4549 = vmatprep.mubr.msk.bf16.mxu0 %vm5035_vm1, %v5034_v5 }
 0x431   :  { %4559 = vmatprep.subr.bf16.mxu0 %v5034_v5 }
 0x433   :  { %v4981_v42 = vpop.eup %4980 }
 0x434   :  { %v2025_v49 = vmul.f32 %v4981_v42, %v5629_v15  ;;  %v4804_v15 = vunpack.i.h.bf16 %v5599_v61 }
 0x435   :  { %v1963_v39 = vpop.xlane.xlu1 %1962 }
 0x436   :  { %v2049_v47 = vpack.c.bf16 %v2025_v49, %v2025_v49  ;;  %v2074_v53 = vpack.c.bf16 %v4804_v15, %v4804_v15 }
 0x438   :  { %4550 = vmatmul.mubr.msk.bf16.vlgmr.msra.gmra.mxu0 %vm670_vm3, %v2049_v47  ;;  %v2597_v61 = vsel %vm160_vm2, %v2074_v53, 0 }
 0x439   :  { %4560 = vmatpush3.bf16.msra.mxu0 %v2643_v58  ;;  %4561 = vmatprep.mubr.msk.bf16.mxu0 %vm5035_vm1, %v5034_v5 }
 0x43a   :  { %4571 = vmatprep.subr.bf16.mxu0 %v5034_v5 }
 0x445   :  { %v1978_v11 = vpop.xlane.xlu1 %1977 }
 0x44a   :  { %v1948_v3 = vpop.xlane.xlu0 %1947 }
 0x44b   :  { %4982 = vrcp.f32 %v1948_v3 }
 0x44d   :  { %v5802_v52 = vpop.xlane.xlu1 %1983 }
 0x44e   :  { %v1954_v13 = vpop.xlane.xlu0 %1953 }
 0x44f   :  { %4984 = vrcp.f32 %v1954_v13 }
 0x451   :  { %v4817_v8 = vpop.permute.xlu1 %4816 }
 0x452   :  { %v1957_v27 = vpop.xlane.xlu0 %1956  ;;  %v4818_v29 = vunpack.i.l.bf16 %v4817_v8  ;;  %v4819_v47 = vunpack.i.h.bf16 %v4817_v8 }
 0x453   :  { %4986 = vrcp.f32 %v1957_v27 }
 0x454   :  { %4988 = vrcp.f32 %v1963_v39  ;;  %v2079_v30 = vpack.c.bf16 %v4818_v29, %v4818_v29  ;;  %v2080_v13 = vpack.c.bf16 %v4819_v47, %v4819_v47 }
 0x456   :  { %v1960_v26 = vpop.xlane.xlu0 %1959 }
 0x457   :  { %4990 = vrcp.f32 %v1960_v26 }
 0x458   :  { %v4983_v4 = vpop.eup %4982 }
 0x459   :  { %v2024_v17 = vmul.f32 %v4983_v4, %v5675_v35 }
 0x45a   :  { %v1966_v19 = vpop.xlane.xlu0 %1965 }
 0x45b   :  { %v2048_v51 = vpack.c.bf16 %v2024_v17, %v2024_v17  ;;  %4992 = vrcp.f32 %v1966_v19 }
 0x45c   :  { %v4985_v37 = vpop.eup %4984 }
 0x45d   :  { %4544 = vmatmul.mubr.msk.bf16.vlgmr.msra.gmra.mxu1 %vm670_vm3, %v2048_v51  ;;  %v2026_v35 = vmul.f32 %v4985_v37, %v5681_v25  ;;  %v2735_v25 = vsel %vm160_vm2, %v2077_v0, 0 }
 0x45e   :  { %4554 = vmatpush3.bf16.msra.mxu1 %v2597_v61  ;;  %v1969_v1 = vpop.xlane.xlu0 %1968  ;;  %4555 = vmatprep.mubr.msk.bf16.mxu1 %vm5035_vm1, %v5034_v5 }
 0x45f   :  { %4994 = vrcp.f32 %v1969_v1  ;;  %4565 = vmatprep.subr.bf16.mxu1 %v5034_v5  ;;  %v2050_v2 = vpack.c.bf16 %v2026_v35, %v2026_v35 }
 0x460   :  { %v4987_v24 = vpop.eup %4986 }
 0x461   :  { %v2027_v46 = vmul.f32 %v4987_v24, %v5700_v48  ;;  %v4989_v45 = vpop.eup %4988 }
 0x462   :  { %v1972_v18 = vpop.xlane.xlu0 %1971  ;;  %v2029_v43 = vmul.f32 %v4989_v45, %v5641_v36  ;;  %v2827_v36 = vsel %vm160_vm2, %v2079_v30, 0 }
 0x463   :  { %v2051_v6 = vpack.c.bf16 %v2027_v46, %v2027_v46  ;;  %4996 = vrcp.f32 %v1972_v18 }
 0x464   :  { %v4991_v31 = vpop.eup %4990  ;;  %v2053_v63 = vpack.c.bf16 %v2029_v43, %v2029_v43 }
 0x465   :  { %4556 = vmatmul.mubr.msk.bf16.vlgmr.msra.gmra.mxu1 %vm670_vm3, %v2050_v2  ;;  %4562 = vmatmul.mubr.msk.bf16.vlgmr.msra.gmra.mxu0 %vm670_vm3, %v2051_v6  ;;  %v2028_v41 = vmul.f32 %v4991_v31, %v5709_v21  ;;  %v2781_v21 = vsel %vm160_vm2, %v2078_v59, 0 }
 0x466   :  { %4566 = vmatpush3.bf16.msra.mxu1 %v2689_v56  ;;  %4572 = vmatpush3.bf16.msra.mxu0 %v2735_v25  ;;  %v1975_v48 = vpop.xlane.xlu0 %1974 }
 0x467   :  { %4998 = vrcp.f32 %v1975_v48  ;;  %4567 = vmatprep.mubr.msk.bf16.mxu1 %vm5035_vm1, %v5034_v5  ;;  %4573 = vmatprep.mubr.msk.bf16.mxu0 %vm5035_vm1, %v5034_v5  ;;  %v2052_v42 = vpack.c.bf16 %v2028_v41, %v2028_v41 }
 0x468   :  { %4577 = vmatprep.subr.bf16.mxu1 %v5034_v5  ;;  %4583 = vmatprep.subr.bf16.mxu0 %v5034_v5  ;;  %v4993_v40 = vpop.eup %4992  ;;  %5000 = vrcp.f32 %v1978_v11 }
 0x469   :  { %v2030_v57 = vmul.f32 %v4993_v40, %v5719_v54  ;;  %v2873_v54 = vsel %vm160_vm2, %v2080_v13, 0 }
 0x46a   :  { %v1981_v34 = vpop.xlane.xlu0 %1980 }
 0x46b   :  { %5002 = vrcp.f32 %v1981_v34  ;;  %v2054_v26 = vpack.c.bf16 %v2030_v57, %v2030_v57 }
 0x46c   :  { %v4995_v49 = vpop.eup %4994  ;;  %5004 = vrcp.f32 %v5802_v52 }
 0x46d   :  { %4568 = vmatmul.mubr.msk.bf16.vlgmr.msra.gmra.mxu1 %vm670_vm3, %v2052_v42  ;;  %4574 = vmatmul.mubr.msk.bf16.vlgmr.msra.gmra.mxu0 %vm670_vm3, %v2053_v63  ;;  %v2031_v3 = vmul.f32 %v4995_v49, %v5723_v12 }
 0x46e   :  { %4578 = vmatpush3.bf16.msra.mxu1 %v2781_v21  ;;  %4584 = vmatpush3.bf16.msra.mxu0 %v2827_v36  ;;  %v1987_v58 = vpop.xlane.xlu0 %1986 }
 0x46f   :  { %4579 = vmatprep.mubr.msk.bf16.mxu1 %vm5035_vm1, %v5034_v5  ;;  %4585 = vmatprep.mubr.msk.bf16.mxu0 %vm5035_vm1, %v5034_v5  ;;  %v2055_v4 = vpack.c.bf16 %v2031_v3, %v2031_v3  ;;  %5006 = vrcp.f32 %v1987_v58 }
 0x470   :  { %4589 = vmatprep.subr.bf16.mxu1 %v5034_v5  ;;  %4595 = vmatprep.subr.bf16.mxu0 %v5034_v5  ;;  %v4997_v39 = vpop.eup %4996 }
 0x471   :  { %v2032_v52 = vmul.f32 %v4997_v39, %v5727_v32 }
 0x472   :  { %v4822_v27 = vpop.permute.xlu0 %4821 }
 0x473   :  { %v4823_v15 = vunpack.i.l.bf16 %v4822_v27  ;;  %v4824_v53 = vunpack.i.h.bf16 %v4822_v27  ;;  %v2056_v0 = vpack.c.bf16 %v2032_v52, %v2032_v52 }
 0x474   :  { %v4999_v11 = vpop.eup %4998 }
 0x475   :  { %v2081_v17 = vpack.c.bf16 %v4823_v15, %v4823_v15  ;;  %4580 = vmatmul.mubr.msk.bf16.vlgmr.msra.gmra.mxu1 %vm670_vm3, %v2054_v26  ;;  %4586 = vmatmul.mubr.msk.bf16.vlgmr.msra.gmra.mxu0 %vm670_vm3, %v2055_v4  ;;  %v2033_v37 = vmul.f32 %v4999_v11, %v5733_v50  ;;  %v2082_v44 = vpack.c.bf16 %v4824_v53, %v4824_v53  ;;  %v5001_v24 = vpop.eup %5000 }
 0x476   :  { %4590 = vmatpush3.bf16.msra.mxu1 %v2873_v54  ;;  %v4827_v12 = vpop.permute.xlu0 %4826  ;;  %4591 = vmatprep.mubr.msk.bf16.mxu1 %vm5035_vm1, %v5034_v5  ;;  %v2034_v29 = vmul.f32 %v5001_v24, %v5664_v38 }
 0x477   :  { %v4828_v19 = vunpack.i.l.bf16 %v4827_v12  ;;  %v2919_v51 = vsel %vm160_vm2, %v2081_v17, 0  ;;  %4597 = vmatprep.mubr.msk.bf16.mxu0 %vm5035_vm1, %v5034_v5  ;;  %4601 = vmatprep.subr.bf16.mxu1 %v5034_v5  ;;  %v5848_v61 = vpop.f32.mrf.mxu0  ;;  %v2057_v46 = vpack.c.bf16 %v2033_v37, %v2033_v37  ;;  %v4829_v45 = vunpack.i.h.bf16 %v4827_v12 }
 0x478   :  { %4596 = vmatpush3.bf16.msra.mxu0 %v2919_v51  ;;  %v5851_v1 = vpop.f32.mrf.mxu1  ;;  %v5003_v18 = vpop.eup %5002  ;;  %v2965_v6 = vsel %vm160_vm2, %v2082_v44, 0  ;;  %v2058_v40 = vpack.c.bf16 %v2034_v29, %v2034_v29 }
 0x479   :  { %v2083_v62 = vpack.c.bf16 %v4828_v19, %v4828_v19  ;;  %4607 = vmatprep.subr.bf16.mxu0 %v5034_v5  ;;  %v4491_v60 = vpop.f32.mrf.mxu0  ;;  %v2035_v56 = vmul.f32 %v5003_v18, %v5737_v55  ;;  %v2084_v48 = vpack.c.bf16 %v4829_v45, %v4829_v45  ;;  %v5005_v43 = vpop.eup %5004 }
 0x47a   :  { %v4832_v35 = vpop.permute.xlu0 %4831  ;;  %v4497_v32 = vpop.f32.mrf.mxu1  ;;  %v2036_v36 = vmul.f32 %v5005_v43, %v5689_v14 }
 0x47b   :  { %v3011_v8 = vsel %vm160_vm2, %v2083_v62, 0  ;;  %v4833_v50 = vunpack.i.l.bf16 %v4832_v35  ;;  %v2130_v2 = vpop.f32.mrf.mxu0  ;;  %v2059_v42 = vpack.c.bf16 %v2035_v56, %v2035_v56  ;;  %v4834_v49 = vunpack.i.h.bf16 %v4832_v35 }
 0x47c   :  { %v2176_v31 = vpop.f32.mrf.mxu1  ;;  %v5007_v30 = vpop.eup %5006  ;;  %v3057_v38 = vsel %vm160_vm2, %v2084_v48, 0  ;;  %v2060_v39 = vpack.c.bf16 %v2036_v36, %v2036_v36 }
 0x47d   :  { %4592 = vmatmul.mubr.msk.bf16.vlgmr.msra.gmra.mxu1 %vm670_vm3, %v2056_v0  ;;  %4598 = vmatmul.mubr.msk.bf16.vlgmr.msra.gmra.mxu0 %vm670_vm3, %v2057_v46  ;;  %v4492_v33 = vpop.f32.mrf.mxu0  ;;  %v2085_v41 = vpack.c.bf16 %v4833_v50, %v4833_v50  ;;  %v2037_v21 = vmul.f32 %v5007_v30, %v5741_v7  ;;  %v2086_v57 = vpack.c.bf16 %v4834_v49, %v4834_v49 }
 0x47e   :  { %4602 = vmatpush3.bf16.msra.mxu1 %v2965_v6  ;;  %4608 = vmatpush3.bf16.msra.mxu0 %v3011_v8  ;;  %v4498_v25 = vpop.f32.mrf.mxu1 }
 0x47f   :  { %4603 = vmatprep.mubr.msk.bf16.mxu1 %vm5035_vm1, %v5034_v5  ;;  %4609 = vmatprep.mubr.msk.bf16.mxu0 %vm5035_vm1, %v5034_v5  ;;  %v3103_v55 = vsel %vm160_vm2, %v2085_v41, 0  ;;  %v2061_v13 = vpack.c.bf16 %v2037_v21, %v2037_v21  ;;  %v3149_v15 = vsel %vm160_vm2, %v2086_v57, 0  ;;  %v4890_v21 = vld [vmem:[%s6220_s9 + $0x8] sm:$0xff]  }
 0x480   :  { %4613 = vmatprep.subr.bf16.mxu1 %v5034_v5  ;;  %4619 = vmatprep.subr.bf16.mxu0 %v5034_v5  ;;  %v5865_v59 = vpop.f32.mrf.mxu1 }
 0x482   :  { %v1990_v34 = vpop.xlane.xlu1 %1989  ;;  %v4509_v63 = vpop.f32.mrf.mxu1 }
 0x483   :  { %5008 = vrcp.f32 %v1990_v34 }
 0x484   :  { %v2268_v47 = vpop.f32.mrf.mxu1 }
 0x485   :  { %4604 = vmatmul.mubr.msk.bf16.vlgmr.msra.gmra.mxu1 %vm670_vm3, %v2058_v40  ;;  %4610 = vmatmul.mubr.msk.bf16.vlgmr.msra.gmra.mxu0 %vm670_vm3, %v2059_v42 }
 0x486   :  { %4614 = vmatpush3.bf16.msra.mxu1 %v3057_v38  ;;  %4620 = vmatpush3.bf16.msra.mxu0 %v3103_v55  ;;  %v4510_v58 = vpop.f32.mrf.mxu1 }
 0x487   :  { %4615 = vmatprep.mubr.msk.bf16.mxu1 %vm5035_vm1, %v5034_v5  ;;  %4621 = vmatprep.mubr.msk.bf16.mxu0 %vm5035_vm1, %v5034_v5 }
 0x488   :  { %4625 = vmatprep.subr.bf16.mxu1 %v5034_v5  ;;  %4631 = vmatprep.subr.bf16.mxu0 %v5034_v5  ;;  %v5879_v3 = vpop.f32.mrf.mxu0 }
 0x48a   :  { %v4503_v27 = vpop.f32.mrf.mxu0 }
 0x48c   :  { %v2222_v7 = vpop.f32.mrf.mxu0 }
 0x48d   :  { %4616 = vmatmul.mubr.msk.bf16.vlgmr.msra.gmra.mxu1 %vm670_vm3, %v2060_v39  ;;  %4622 = vmatmul.mubr.msk.bf16.vlgmr.msra.gmra.mxu0 %vm670_vm3, %v2061_v13 }
 0x48e   :  { %4626 = vmatpush3.bf16.msra.mxu1 %v3149_v15  ;;  %4627 = vmatprep.mubr.msk.bf16.mxu1 %vm5035_vm1, %v5034_v5  ;;  %v4504_v14 = vpop.f32.mrf.mxu0 }
 0x48f   :  { %4635 = vmatprep.mubr.msk.bf16.mxu0 %vm5035_vm1, %v5034_v5  ;;  %4647 = vmatprep.subr.bf16.mxu1 %v5034_v5 }
 0x490   :  { %v5009_v26 = vpop.eup %5008  ;;  %4632 = vmatpush3.bf16.msra.mxu0 %v4890_v21 }
 0x491   :  { %v2038_v4 = vmul.f32 %v5009_v26, %v5755_v20  ;;  %4633 = vmatprep.subr.bf16.mxu0 %v5034_v5 }
 0x493   :  { %v2062_v11 = vpack.c.bf16 %v2038_v4, %v2038_v4 }
 0x495   :  { %4628 = vmatmul.mubr.msk.bf16.vlgmr.msra.gmra.mxu1 %vm670_vm3, %v2062_v11 }
 0x496   :  { %4651 = vmatprep.mubr.msk.bf16.mxu1 %vm5035_vm1, %v5034_v5 }
 0x4b1   :  { %v5893_v53 = vpop.f32.mrf.mxu1 }
 0x4b3   :  { %v4521_v17 = vpop.f32.mrf.mxu1 }
 0x4b5   :  { %v2360_v54 = vpop.f32.mrf.mxu1 }
 0x4b7   :  { %v4522_v12 = vpop.f32.mrf.mxu1 }
 0x4c0   :  { %v5895_v19 = vpop.f32.mrf.mxu0 }
 0x4c2   :  { %v4515_v51 = vpop.f32.mrf.mxu0 }
 0x4c4   :  { %v2314_v52 = vpop.f32.mrf.mxu0 }
 0x4c6   :  { %v4516_v37 = vpop.f32.mrf.mxu0 }
 0x4e7   :  { %v2403_v44 = vpop.f32.mrf.mxu0 }
 0x4e8   :  { %v2449_v62 = vpop.f32.mrf.mxu1 }
 0x4e9   :  { %v4835_v35 = vpack.i.bf16 %v2449_v62, %v2403_v44  ;;  %v4527_v20 = vpop.f32.mrf.mxu0  ;;  %v4891_v44 = vld [vmem:[%s6220_s9] sm:$0xff]  }
 0x4ea   :  { %v4533_v24 = vpop.f32.mrf.mxu1  ;;  %4634 = vmatpush3.bf16.msra.mxu0 %v4891_v44 }
 0x4eb   :  { %4836 = vrot.lane.b32.xlu0 %v4835_v35, %s5039_s5  ;;  %v2406_v60 = vpop.f32.mrf.mxu0  ;;  %4663 = vmatprep.subr.bf16.mxu0 %v5034_v5 }
 0x4ec   :  { %v2452_v0 = vpop.f32.mrf.mxu1 }
 0x4ed   :  { %v4528_v46 = vpop.f32.mrf.mxu0 }
 0x4ee   :  { %v4534_v8 = vpop.f32.mrf.mxu1 }
 0x4ef   :  { %v2495_v18 = vpop.f32.mrf.mxu0 }
 0x4f1   :  { %v4539_v32 = vpop.f32.mrf.mxu0 }
 0x4f3   :  { %v2498_v45 = vpop.f32.mrf.mxu0 }
 0x4f5   :  { %v4540_v50 = vpop.f32.mrf.mxu0 }
 0x4f8   :  { %v5898_v2 = vpop.f32.mrf.mxu0 }
 0x4fa   :  { %v4551_v6 = vpop.f32.mrf.mxu0 }
 0x4fc   :  { %v2590_v31 = vpop.f32.mrf.mxu0 }
 0x4fe   :  { %v4552_v33 = vpop.f32.mrf.mxu0 }
 0x51d   :  { %v2541_v29 = vpop.f32.mrf.mxu1 }
 0x51e   :  { %v4850_v27 = vpack.i.bf16 %v2541_v29, %v2495_v18 }
 0x51f   :  { %v4545_v56 = vpop.f32.mrf.mxu1 }
 0x521   :  { %v2544_v25 = vpop.f32.mrf.mxu1 }
 0x523   :  { %v4546_v48 = vpop.f32.mrf.mxu1 }
 0x525   :  { %v5900_v41 = vpop.f32.mrf.mxu1  ;;  %v2679_v43 = vpop.f32.mrf.mxu0 }
 0x527   :  { %v4557_v30 = vpop.f32.mrf.mxu1  ;;  %v4563_v34 = vpop.f32.mrf.mxu0 }
 0x529   :  { %v2636_v40 = vpop.f32.mrf.mxu1  ;;  %v2682_v42 = vpop.f32.mrf.mxu0 }
 0x52a   :  { %v4865_v42 = vpack.i.bf16 %v5900_v41, %v5898_v2 }
 0x52b   :  { %v4558_v63 = vpop.f32.mrf.mxu1  ;;  %v4564_v49 = vpop.f32.mrf.mxu0 }
 0x52d   :  { %v2725_v38 = vpop.f32.mrf.mxu1  ;;  %v2771_v55 = vpop.f32.mrf.mxu0 }
 0x52e   :  { %v4840_v47 = vpack.i.bf16 %v2725_v38, %v2679_v43 }
 0x52f   :  { %v4569_v36 = vpop.f32.mrf.mxu1  ;;  %v4575_v58 = vpop.f32.mrf.mxu0 }
 0x530   :  { %4841 = vrot.lane.b32.xlu0 %v4840_v47, %s5040_s1 }
 0x531   :  { %v2728_v57 = vpop.f32.mrf.mxu1  ;;  %v2774_v13 = vpop.f32.mrf.mxu0 }
 0x533   :  { %v4570_v39 = vpop.f32.mrf.mxu1  ;;  %v4576_v7 = vpop.f32.mrf.mxu0 }
 0x534   :  { %4851 = vrot.lane.b32.xlu0 %v4850_v27, %s5039_s5 }
 0x535   :  { %v2817_v15 = vpop.f32.mrf.mxu1  ;;  %v2863_v14 = vpop.f32.mrf.mxu0 }
 0x536   :  { %v4855_v26 = vpack.i.bf16 %v2817_v15, %v2771_v55 }
 0x537   :  { %v4581_v4 = vpop.f32.mrf.mxu1  ;;  %v4587_v11 = vpop.f32.mrf.mxu0 }
 0x538   :  { %4856 = vrot.lane.b32.xlu0 %v4855_v26, %s5040_s1 }
 0x539   :  { %v2820_v17 = vpop.f32.mrf.mxu1  ;;  %v2866_v54 = vpop.f32.mrf.mxu0 }
 0x53b   :  { %v4582_v12 = vpop.f32.mrf.mxu1  ;;  %v4588_v51 = vpop.f32.mrf.mxu0 }
 0x53d   :  { %v2909_v52 = vpop.f32.mrf.mxu1  ;;  %v2955_v37 = vpop.f32.mrf.mxu0 }
 0x53e   :  { %v4870_v31 = vpack.i.bf16 %v2909_v52, %v2863_v14 }
 0x53f   :  { %v4593_v62 = vpop.f32.mrf.mxu1  ;;  %v4599_v35 = vpop.f32.mrf.mxu0 }
 0x541   :  { %v2912_v20 = vpop.f32.mrf.mxu1  ;;  %v2958_v24 = vpop.f32.mrf.mxu0 }
 0x543   :  { %v4594_v60 = vpop.f32.mrf.mxu1  ;;  %v4600_v0 = vpop.f32.mrf.mxu0 }
 0x545   :  { %v3001_v46 = vpop.f32.mrf.mxu1  ;;  %v3047_v8 = vpop.f32.mrf.mxu0 }
 0x546   :  { %v4845_v18 = vpack.i.bf16 %v3001_v46, %v2955_v37 }
 0x547   :  { %v4605_v32 = vpop.f32.mrf.mxu1  ;;  %v4611_v45 = vpop.f32.mrf.mxu0 }
 0x548   :  { %4846 = vrot.lane.b32.xlu1 %v4845_v18, %s5041_s2 }
 0x549   :  { %v3004_v50 = vpop.f32.mrf.mxu1  ;;  %v3050_v6 = vpop.f32.mrf.mxu0 }
 0x54b   :  { %v4606_v33 = vpop.f32.mrf.mxu1  ;;  %v4612_v29 = vpop.f32.mrf.mxu0 }
 0x54c   :  { %4871 = vrot.lane.b32.xlu1 %v4870_v31, %s5040_s1 }
 0x54d   :  { %v3093_v56 = vpop.f32.mrf.mxu1  ;;  %v3139_v25 = vpop.f32.mrf.mxu0 }
 0x54e   :  { %v4860_v48 = vpack.i.bf16 %v3093_v56, %v3047_v8 }
 0x54f   :  { %v4617_v43 = vpop.f32.mrf.mxu1  ;;  %v4623_v30 = vpop.f32.mrf.mxu0 }
 0x550   :  { %4861 = vrot.lane.b32.xlu0 %v4860_v48, %s5041_s2 }
 0x551   :  { %v3096_v34 = vpop.f32.mrf.mxu1  ;;  %v3142_v40 = vpop.f32.mrf.mxu0 }
 0x553   :  { %v4618_v63 = vpop.f32.mrf.mxu1  ;;  %v4624_v49 = vpop.f32.mrf.mxu0 }
 0x554   :  { %4866 = vrot.lane.b32.xlu0 %v4865_v42, %s5039_s5 }
 0x555   :  { %v3185_v38 = vpop.f32.mrf.mxu1 }
 0x556   :  { %v4875_v55 = vpack.i.bf16 %v3185_v38, %v3139_v25 }
 0x557   :  { %v4629_v47 = vpop.f32.mrf.mxu1 }
 0x558   :  { %4876 = vrot.lane.b32.xlu0 %v4875_v55, %s5041_s2 }
 0x559   :  { %v3188_v21 = vpop.f32.mrf.mxu1 }
 0x55b   :  { %v4630_v36 = vpop.f32.mrf.mxu1 }
 0x55d   :  { %v4837_v58 = vpop.permute.xlu0 %4836 }
 0x55e   :  { %v4839_v13 = vunpack.i.h.bf16 %v4837_v58  ;;  %v4838_v27 = vunpack.i.l.bf16 %v4837_v58 }
 0x560   :  { %v3264_v41 = vsel %vm670_vm3, %v5851_v1, %v4839_v13  ;;  %v3263_v14 = vsel %vm670_vm3, %v5848_v61, %v4838_v27 }
 0x5a2   :  { %v4842_v57 = vpop.permute.xlu0 %4841 }
 0x5a3   :  { %v4844_v7 = vunpack.i.h.bf16 %v4842_v57  ;;  %v4843_v15 = vunpack.i.l.bf16 %v4842_v57 }
 0x5a5   :  { %v3271_v11 = vsel %vm3269_vm4, %v3264_v41, %v4844_v7  ;;  %v3270_v17 = vsel %vm3269_vm4, %v3263_v14, %v4843_v15 }
 0x5a6   :  { %v4852_v39 = vpop.permute.xlu0 %4851 }
 0x5a7   :  { %v4854_v37 = vunpack.i.h.bf16 %v4852_v39  ;;  %v4853_v44 = vunpack.i.l.bf16 %v4852_v39 }
 0x5a9   :  { %v3266_v1 = vsel %vm670_vm3, %v5865_v59, %v4854_v37  ;;  %v3265_v20 = vsel %vm670_vm3, %v5879_v3, %v4853_v44 }
 0x5aa   :  { %v4857_v54 = vpop.permute.xlu0 %4856 }
 0x5ab   :  { %v4859_v62 = vunpack.i.h.bf16 %v4857_v54  ;;  %v4858_v35 = vunpack.i.l.bf16 %v4857_v54 }
 0x5ad   :  { %v3273_v0 = vsel %vm3269_vm4, %v3266_v1, %v4859_v62  ;;  %v3272_v46 = vsel %vm3269_vm4, %v3265_v20, %v4858_v35 }
 0x5ba   :  { %v4847_v2 = vpop.permute.xlu1 %4846 }
 0x5bb   :  { %v4849_v26 = vunpack.i.h.bf16 %v4847_v2  ;;  %v4848_v4 = vunpack.i.l.bf16 %v4847_v2 }
 0x5bd   :  { %v3278_v12 = vsel %vm3276_vm5, %v3271_v11, %v4849_v26  ;;  %v3277_v51 = vsel %vm3276_vm5, %v3270_v17, %v4848_v4 }
 0x5be   :  { %v3283_v52 = vpack.c.bf16 %v3278_v12, %v3277_v51  ;;  %v4872_v31 = vpop.permute.xlu1 %4871 }
 0x5bf   :  { %v4874_v33 = vunpack.i.h.bf16 %v4872_v31  ;;  %v4873_v29 = vunpack.i.l.bf16 %v4872_v31 }
 0x5c0   :  { %4636 = vmatmul.mubr.msk.bf16.vlgmr.msra.gmra.mxu0 %vm96_vm0, %v3283_v52 }
 0x5c1   :  { %4639 = vmatprep.mubr.msk.bf16.mxu0 %vm5035_vm1, %v5034_v5 }
 0x5c2   :  { %v4862_v61 = vpop.permute.xlu0 %4861 }
 0x5c3   :  { %v4864_v24 = vunpack.i.h.bf16 %v4862_v61  ;;  %v4863_v60 = vunpack.i.l.bf16 %v4862_v61 }
 0x5c5   :  { %v3280_v8 = vsel %vm3276_vm5, %v3273_v0, %v4864_v24  ;;  %v3279_v18 = vsel %vm3276_vm5, %v3272_v46, %v4863_v60 }
 0x5c6   :  { %v3284_v32 = vpack.c.bf16 %v3280_v8, %v3279_v18  ;;  %v4867_v45 = vpop.permute.xlu0 %4866 }
 0x5c7   :  { %v4869_v50 = vunpack.i.h.bf16 %v4867_v45  ;;  %v4868_v6 = vunpack.i.l.bf16 %v4867_v45 }
 0x5c8   :  { %4640 = vmatmul.mubr.msk.bf16.gmra.mxu0 %vm96_vm0, %v3284_v32 }
 0x5c9   :  { %4643 = vmatprep.mubr.msk.bf16.mxu0 %vm5035_vm1, %v5034_v5  ;;  %v3268_v59 = vsel %vm670_vm3, %v5893_v53, %v4869_v50  ;;  %v3267_v3 = vsel %vm670_vm3, %v5895_v19, %v4868_v6  ;;  %v4114_v53 = vld [vmem:[%s6221_s10] ss:$0 sm:$0xff] }
 0x5ca   :  { %v4877_v56 = vpop.permute.xlu0 %4876  ;;  %v3274_v43 = vsel %vm3269_vm4, %v3267_v3, %v4873_v29  ;;  %v3275_v30 = vsel %vm3269_vm4, %v3268_v59, %v4874_v33 }
 0x5cb   :  { %v4879_v25 = vunpack.i.h.bf16 %v4877_v56  ;;  %v4878_v48 = vunpack.i.l.bf16 %v4877_v56 }
 0x5cd   :  { %v3282_v34 = vsel %vm3276_vm5, %v3275_v30, %v4879_v25  ;;  %v3281_v40 = vsel %vm3276_vm5, %v3274_v43, %v4878_v48 }
 0x5ce   :  { %v3285_v42 = vpack.c.bf16 %v3282_v34, %v3281_v40  ;;  %v4892_v40 = vld [vmem:[%s6222_s13 + $0x8] sm:$0xff]  }
 0x5cf   :  { %4648 = vmatpush3.bf16.msra.mxu1 %v4892_v40 }
 0x5d0   :  { %4644 = vmatmul.mubr.msk.bf16.gmra.mxu0 %vm96_vm0, %v3285_v42  ;;  %4649 = vmatprep.subr.bf16.mxu1 %v5034_v5  ;;  %v4893_v42 = vld [vmem:[%s6222_s13] sm:$0xff]  }
 0x5d1   :  { %4679 = vmatprep.mubr.msk.bf16.mxu0 %vm5035_vm1, %v5034_v5 }
 0x5d3   :  { %4650 = vmatpush3.bf16.msra.mxu1 %v4893_v42 }
 0x680   :  { %v3352_v19 = vpop.f32.mrf.mxu0 }
 0x681   :  { %v3353_v63 = vadd.f32 %v4114_v53, %v3352_v19  ;;  %v4895_v19 = vld [vmem:[%s6223_s15 + $0x30] sm:$0xff]  }
 0x682   :  { %v4637_v49 = vpop.f32.mrf.mxu0 }
 0x683   :  { %v3375_v38 = vadd.f32 %v3353_v63, %v5191_v10  ;;  %v4896_v63 = vld [vmem:[%s6223_s15 + $0x28] sm:$0xff]   ;;  %v4897_v49 = vld [vmem:[%s6223_s15 + $0x20] sm:$0xff]  }
 0x684   :  { %v3355_v55 = vpop.f32.mrf.mxu0 }
 0x685   :  { %v3356_v47 = vadd.f32 %v4114_v53, %v3355_v55  ;;  %v3381_v21 = vsel %vm96_vm0, %v3375_v38, 0.0 }
 0x686   :  { %3382 = vadd.xlane.f32.xlu1 %v3381_v21  ;;  %v4638_v36 = vpop.f32.mrf.mxu0 }
 0x687   :  { %v3376_v58 = vadd.f32 %v3356_v47, %v5198_v16 }
 0x688   :  { %v3360_v57 = vpop.f32.mrf.mxu0 }
 0x689   :  { %v3361_v13 = vadd.f32 %v4114_v53, %v3360_v57  ;;  %v3384_v27 = vsel %vm96_vm0, %v3376_v58, 0.0 }
 0x68a   :  { %v4641_v39 = vpop.f32.mrf.mxu0  ;;  %3385 = vadd.xlane.f32.xlu0 %v3384_v27 }
 0x68b   :  { %v3377_v7 = vadd.f32 %v3361_v13, %v5212_v23 }
 0x68c   :  { %v3363_v15 = vpop.f32.mrf.mxu0 }
 0x68d   :  { %v3364_v2 = vadd.f32 %v4114_v53, %v3363_v15  ;;  %v3387_v10 = vsel %vm96_vm0, %v3377_v7, 0.0 }
 0x68e   :  { %v4642_v41 = vpop.f32.mrf.mxu0  ;;  %3388 = vadd.xlane.f32.xlu0 %v3387_v10 }
 0x68f   :  { %v3378_v14 = vadd.f32 %v3364_v2, %v5207_v22 }
 0x690   :  { %v3368_v26 = vpop.f32.mrf.mxu0 }
 0x691   :  { %v3390_v4 = vsel %vm96_vm0, %v3378_v14, 0.0  ;;  %v3369_v16 = vadd.f32 %v4114_v53, %v3368_v26 }
 0x692   :  { %3391 = vadd.xlane.f32.xlu1 %v3390_v4  ;;  %v4645_v11 = vpop.f32.mrf.mxu0  ;;  %v4120_v4 = vld [vmem:[%s6224_s11] ss:$0 sm:$0xff] }
 0x693   :  { %v3379_v17 = vadd.f32 %v5189_v9, %v3369_v16 }
 0x694   :  { %v3371_v54 = vpop.f32.mrf.mxu0 }
 0x695   :  { %v3372_v12 = vadd.f32 %v4114_v53, %v3371_v54  ;;  %v3393_v23 = vsel %vm96_vm0, %v3379_v17, 0.0  ;;  %v4894_v53 = vld [vmem:[%s6223_s15 + $0x38] sm:$0xff]  }
 0x696   :  { %3394 = vadd.xlane.f32.xlu0 %v3393_v23  ;;  %v4646_v51 = vpop.f32.mrf.mxu0  ;;  %4664 = vmatpush3.bf16.msra.mxu0 %v4894_v53 }
 0x697   :  { %v3380_v52 = vadd.f32 %v3372_v12, %v5225_v28  ;;  %4665 = vmatprep.subr.bf16.mxu0 %v5034_v5 }
 0x699   :  { %v3396_v37 = vsel %vm96_vm0, %v3380_v52, 0.0 }
 0x69a   :  { %3397 = vadd.xlane.f32.xlu1 %v3396_v37  ;;  %4666 = vmatpush3.bf16.msra.mxu0 %v4895_v19 }
 0x69b   :  { %4667 = vmatprep.subr.bf16.mxu0 %v5034_v5 }
 0x69e   :  { %4668 = vmatpush3.bf16.msra.mxu0 %v4896_v63 }
 0x69f   :  { %4669 = vmatprep.subr.bf16.mxu0 %v5034_v5 }
 0x6a2   :  { %4670 = vmatpush3.bf16.msra.mxu0 %v4897_v49 }
 0x6a3   :  { %4671 = vmatprep.subr.bf16.mxu0 %v5034_v5 }
 0x70f   :  { %v3383_v22 = vpop.xlane.xlu1 %3382 }
 0x710   :  { %v3400_v44 = vmul.f32 0.03125, %v3383_v22 }
 0x712   :  { %v5965_v62 = vsub.f32 %v3375_v38, %v3400_v44  ;;  %v4898_v38 = vld [vmem:[%s6223_s15 + $0x18] sm:$0xff]  }
 0x713   :  { %v3386_v35 = vpop.xlane.xlu0 %3385  ;;  %4672 = vmatpush3.bf16.msra.mxu0 %v4898_v38 }
 0x714   :  { %v3401_v61 = vmul.f32 0.03125, %v3386_v35  ;;  %v3412_v9 = vmul.f32 %v5965_v62, %v5965_v62  ;;  %4673 = vmatprep.subr.bf16.mxu0 %v5034_v5 }
 0x716   :  { %v5969_v1 = vsub.f32 %v3376_v58, %v3401_v61  ;;  %v3418_v20 = vsel %vm96_vm0, %v3412_v9, 0.0 }
 0x717   :  { %v3389_v24 = vpop.xlane.xlu0 %3388  ;;  %3419 = vadd.xlane.f32.xlu0 %v3418_v20 }
 0x718   :  { %v3402_v60 = vmul.f32 0.03125, %v3389_v24  ;;  %v3413_v28 = vmul.f32 %v5969_v1, %v5969_v1 }
 0x71a   :  { %v5974_v0 = vsub.f32 %v3377_v7, %v3402_v60  ;;  %v3421_v46 = vsel %vm96_vm0, %v3413_v28, 0.0 }
 0x71b   :  { %v3392_v8 = vpop.xlane.xlu1 %3391  ;;  %3422 = vadd.xlane.f32.xlu1 %v3421_v46 }
 0x71c   :  { %v3403_v18 = vmul.f32 0.03125, %v3392_v8  ;;  %v3414_v32 = vmul.f32 %v5974_v0, %v5974_v0 }
 0x71e   :  { %v5979_v45 = vsub.f32 %v3378_v14, %v3403_v18  ;;  %v3424_v50 = vsel %vm96_vm0, %v3414_v32, 0.0 }
 0x71f   :  { %3425 = vadd.xlane.f32.xlu0 %v3424_v50  ;;  %v3395_v6 = vpop.xlane.xlu0 %3394 }
 0x720   :  { %v3415_v31 = vmul.f32 %v5979_v45, %v5979_v45  ;;  %v3404_v59 = vmul.f32 0.03125, %v3395_v6 }
 0x722   :  { %v3427_v3 = vsel %vm96_vm0, %v3415_v31, 0.0  ;;  %v5985_v33 = vsub.f32 %v3379_v17, %v3404_v59 }
 0x723   :  { %3428 = vadd.xlane.f32.xlu1 %v3427_v3  ;;  %v3398_v29 = vpop.xlane.xlu1 %3397  ;;  %v4899_v3 = vld [vmem:[%s6223_s15 + $0x10] sm:$0xff]  }
 0x724   :  { %v3405_v56 = vmul.f32 0.03125, %v3398_v29  ;;  %v3416_v25 = vmul.f32 %v5985_v33, %v5985_v33  ;;  %4674 = vmatpush3.bf16.msra.mxu0 %v4899_v3  ;;  %v4901_v29 = vld [vmem:[%s6223_s15] sm:$0xff]  }
 0x725   :  { %4675 = vmatprep.subr.bf16.mxu0 %v5034_v5 }
 0x726   :  { %v5989_v48 = vsub.f32 %v3380_v52, %v3405_v56  ;;  %v3430_v43 = vsel %vm96_vm0, %v3416_v25, 0.0  ;;  %v4121_v52 = vld [vmem:[%s6225_s12] ss:$0 sm:$0xff] }
 0x727   :  { %3431 = vadd.xlane.f32.xlu0 %v3430_v43  ;;  %v4122_v56 = vld [vmem:[%s6226_s14] ss:$0 sm:$0xff] }
 0x728   :  { %v3417_v30 = vmul.f32 %v5989_v48, %v5989_v48 }
 0x72a   :  { %v3433_v34 = vsel %vm96_vm0, %v3417_v30, 0.0 }
 0x72b   :  { %3434 = vadd.xlane.f32.xlu1 %v3433_v34 }
 0x7a0   :  { %v3420_v55 = vpop.xlane.xlu0 %3419 }
 0x7a1   :  { %v3436_v47 = vmul.f32 0.03125, %v3420_v55 }
 0x7a3   :  { %v3442_v21 = vadd.f32 1e-05, %v3436_v47 }
 0x7a4   :  { %v3423_v36 = vpop.xlane.xlu1 %3422 }
 0x7a5   :  { %5010 = vrsqrt.f32 %v3442_v21  ;;  %v3437_v58 = vmul.f32 0.03125, %v3423_v36 }
 0x7a7   :  { %v3443_v57 = vadd.f32 1e-05, %v3437_v58 }
 0x7a8   :  { %v3426_v13 = vpop.xlane.xlu0 %3425 }
 0x7a9   :  { %5012 = vrsqrt.f32 %v3443_v57  ;;  %v3438_v27 = vmul.f32 0.03125, %v3426_v13 }
 0x7ab   :  { %v3444_v39 = vadd.f32 1e-05, %v3438_v27 }
 0x7ac   :  { %v3429_v7 = vpop.xlane.xlu1 %3428 }
 0x7ad   :  { %5014 = vrsqrt.f32 %v3444_v39  ;;  %v3439_v15 = vmul.f32 0.03125, %v3429_v7 }
 0x7af   :  { %v3445_v2 = vadd.f32 1e-05, %v3439_v15 }
 0x7b0   :  { %v3432_v10 = vpop.xlane.xlu0 %3431 }
 0x7b1   :  { %5016 = vrsqrt.f32 %v3445_v2  ;;  %v3440_v14 = vmul.f32 0.03125, %v3432_v10 }
 0x7b2   :  { %v5011_v41 = vpop.eup %5010 }
 0x7b3   :  { %v3454_v26 = vmul.f32 %v5011_v41, %v5965_v62  ;;  %v3446_v16 = vadd.f32 1e-05, %v3440_v14 }
 0x7b4   :  { %v3435_v11 = vpop.xlane.xlu1 %3434 }
 0x7b5   :  { %5018 = vrsqrt.f32 %v3446_v16  ;;  %v3441_v54 = vmul.f32 0.03125, %v3435_v11  ;;  %v3467_v12 = vmul.f32 %v4120_v4, %v3454_v26  ;;  %v4128_v16 = vld [vmem:[%s6227_s16] ss:$0 sm:$0xff] }
 0x7b6   :  { %v5013_v17 = vpop.eup %5012 }
 0x7b7   :  { %v3455_v23 = vmul.f32 %v5013_v17, %v5969_v1  ;;  %v3447_v51 = vadd.f32 1e-05, %v3441_v54  ;;  %v6031_v62 = vadd.f32 %v4121_v52, %v3467_v12 }
 0x7b9   :  { %v3468_v37 = vmul.f32 %v4120_v4, %v3455_v23  ;;  %5020 = vrsqrt.f32 %v3447_v51 }
 0x7ba   :  { %v5015_v22 = vpop.eup %5014 }
 0x7bb   :  { %v3456_v44 = vmul.f32 %v5015_v22, %v5974_v0  ;;  %v6033_v35 = vadd.f32 %v4121_v52, %v3468_v37 }
 0x7bd   :  { %v3486_v61 = vpack.c.bf16 %v6033_v35, %v6031_v62  ;;  %v3469_v20 = vmul.f32 %v4120_v4, %v3456_v44 }
 0x7be   :  { %v5017_v9 = vpop.eup %5016 }
 0x7bf   :  { %v3457_v1 = vmul.f32 %v5017_v9, %v5979_v45  ;;  %4652 = vmatmul.mubr.msk.bf16.vlgmr.msra.gmra.mxu1 %vm96_vm0, %v3486_v61  ;;  %v6041_v28 = vadd.f32 %v4121_v52, %v3469_v20 }
 0x7c0   :  { %4655 = vmatprep.mubr.msk.bf16.mxu1 %vm5035_vm1, %v5034_v5 }
 0x7c1   :  { %v3470_v24 = vmul.f32 %v4120_v4, %v3457_v1 }
 0x7c2   :  { %v5019_v60 = vpop.eup %5018 }
 0x7c3   :  { %v6043_v0 = vadd.f32 %v4121_v52, %v3470_v24  ;;  %v3458_v46 = vmul.f32 %v5019_v60, %v5985_v33  ;;  %v4900_v33 = vld [vmem:[%s6223_s15 + $0x8] sm:$0xff]  }
 0x7c4   :  { %4676 = vmatpush3.bf16.msra.mxu0 %v4900_v33 }
 0x7c5   :  { %v3487_v8 = vpack.c.bf16 %v6043_v0, %v6041_v28  ;;  %v3471_v45 = vmul.f32 %v4120_v4, %v3458_v46  ;;  %4677 = vmatprep.subr.bf16.mxu0 %v5034_v5 }
 0x7c6   :  { %v5021_v18 = vpop.eup %5020 }
 0x7c7   :  { %4656 = vmatmul.mubr.msk.bf16.gmra.mxu1 %vm96_vm0, %v3487_v8  ;;  %v3459_v32 = vmul.f32 %v5021_v18, %v5989_v48  ;;  %v6052_v6 = vadd.f32 %v4121_v52, %v3471_v45 }
 0x7c8   :  { %4659 = vmatprep.mubr.msk.bf16.mxu1 %vm5035_vm1, %v5034_v5  ;;  %4678 = vmatpush3.bf16.msra.mxu0 %v4901_v29 }
 0x7c9   :  { %v3472_v50 = vmul.f32 %v4120_v4, %v3459_v32 }
 0x7cb   :  { %v6054_v31 = vadd.f32 %v4121_v52, %v3472_v50 }
 0x7cd   :  { %v3488_v59 = vpack.c.bf16 %v6054_v31, %v6052_v6 }
 0x7cf   :  { %4660 = vmatmul.mubr.msk.bf16.gmra.mxu1 %vm96_vm0, %v3488_v59 }
 0x87f   :  { %v3555_v25 = vpop.f32.mrf.mxu1 }
 0x880   :  { %v3556_v43 = vadd.f32 %v4122_v56, %v3555_v25 }
 0x881   :  { %v4653_v48 = vpop.f32.mrf.mxu1 }
 0x882   :  { %v3578_v42 = vmax.f32 %v3556_v43, 0.0 }
 0x883   :  { %v3558_v30 = vpop.f32.mrf.mxu1 }
 0x884   :  { %v3559_v34 = vadd.f32 %v4122_v56, %v3558_v30 }
 0x885   :  { %v4654_v40 = vpop.f32.mrf.mxu1 }
 0x886   :  { %v3579_v53 = vmax.f32 %v3559_v34, 0.0 }
 0x887   :  { %v3563_v19 = vpop.f32.mrf.mxu1 }
 0x888   :  { %v3584_v63 = vpack.c.bf16 %v3579_v53, %v3578_v42  ;;  %v3564_v38 = vadd.f32 %v4122_v56, %v3563_v19 }
 0x889   :  { %v4657_v49 = vpop.f32.mrf.mxu1 }
 0x88a   :  { %4680 = vmatmul.mubr.bf16.vlgmr.msra.gmra.mxu0 %v3584_v63  ;;  %v3580_v36 = vmax.f32 %v3564_v38, 0.0 }
 0x88b   :  { %v3566_v55 = vpop.f32.mrf.mxu1  ;;  %4683 = vmatprep.mubr.msk.bf16.mxu0 %vm5035_vm1, %v5034_v5 }
 0x88c   :  { %v3567_v47 = vadd.f32 %v4122_v56, %v3566_v55 }
 0x88d   :  { %v4658_v21 = vpop.f32.mrf.mxu1 }
 0x88e   :  { %v3581_v58 = vmax.f32 %v3567_v47, 0.0 }
 0x88f   :  { %v3571_v13 = vpop.f32.mrf.mxu1 }
 0x890   :  { %v3585_v57 = vpack.c.bf16 %v3581_v58, %v3580_v36  ;;  %v3572_v39 = vadd.f32 %v4122_v56, %v3571_v13 }
 0x891   :  { %v4661_v27 = vpop.f32.mrf.mxu1 }
 0x892   :  { %4684 = vmatmul.mubr.bf16.gmra.mxu0 %v3585_v57  ;;  %v3582_v10 = vmax.f32 %v3572_v39, 0.0 }
 0x893   :  { %4687 = vmatprep.mubr.msk.bf16.mxu0 %vm5035_vm1, %v5034_v5  ;;  %v3574_v7 = vpop.f32.mrf.mxu1 }
 0x894   :  { %v3575_v15 = vadd.f32 %v4122_v56, %v3574_v7 }
 0x895   :  { %v4662_v2 = vpop.f32.mrf.mxu1 }
 0x896   :  { %v3583_v41 = vmax.f32 %v3575_v15, 0.0 }
 0x898   :  { %v3586_v14 = vpack.c.bf16 %v3583_v41, %v3582_v10  ;;  %v4904_v10 = vld [vmem:[%s6228_s19 + $0x24] ss:$16 sps:$4 sm:$0xff]   ;;  %v4902_v41 = vld [vmem:[%s6228_s19 + $0x20] ss:$16 sps:$4 sm:$0xff]  }
 0x899   :  { %3936 = vmatprep.subr.bf16.mxu1 %v4904_v10 }
 0x89a   :  { %4688 = vmatmul.mubr.bf16.gmra.mxu0 %v3586_v14  ;;  %3937 = vmatpush1.bf16.msra.mxu1 %v4902_v41  ;;  %v4905_v14 = vld [vmem:[%s6228_s19] ss:$16 sps:$4 sm:$0xff]   ;;  %v4911_v41 = vld [vmem:[%s6228_s19 + $0x8] ss:$16 sps:$4 sm:$0xff]  }
 0x94a   :  { %v3692_v26 = vpop.f32.mrf.mxu0 }
 0x94b   :  { %v3693_v5 = vadd.f32 %v4128_v16, %v3692_v26  ;;  %v4907_v26 = vld [vmem:[%s6228_s19 + $0x4] ss:$16 sps:$4 sm:$0xff]  }
 0x94c   :  { %v4681_v4 = vpop.f32.mrf.mxu0  ;;  %3938 = vmatprep.subr.bf16.mxu1 %v4907_v26 }
 0x94d   :  { %v3715_v1 = vadd.f32 %v3693_v5, %v6031_v62  ;;  %v5042_v4 = vmov 0   ;;  %3939 = vmatpush1.bf16.msra.mxu1 %v4905_v14 }
 0x94e   :  { %v3695_v11 = vpop.f32.mrf.mxu0  ;;  %3956 = vmatprep.mubr.bf16.mxu1 %v5042_v4 }
 0x94f   :  { %v3696_v17 = vadd.f32 %v4128_v16, %v3695_v11  ;;  %v3721_v60 = vsel %vm96_vm0, %v3715_v1, 0.0 }
 0x950   :  { %v4682_v54 = vpop.f32.mrf.mxu0 }
 0x951   :  { %v3716_v12 = vadd.f32 %v3696_v17, %v6033_v35 }
 0x952   :  { %v3700_v23 = vpop.f32.mrf.mxu0 }
 0x953   :  { %v3701_v51 = vadd.f32 %v4128_v16, %v3700_v23  ;;  %v3724_v52 = vsel %vm96_vm0, %v3716_v12, 0.0 }
 0x954   :  { %3725 = vadd.xlane.f32.xlu0 %v3724_v52  ;;  %v4685_v37 = vpop.f32.mrf.mxu0 }
 0x955   :  { %v3717_v22 = vadd.f32 %v3701_v51, %v6041_v28 }
 0x956   :  { %v3703_v44 = vpop.f32.mrf.mxu0 }
 0x957   :  { %v3704_v61 = vadd.f32 %v4128_v16, %v3703_v44  ;;  %v3727_v9 = vsel %vm96_vm0, %v3717_v22, 0.0 }
 0x958   :  { %3728 = vadd.xlane.f32.xlu1 %v3727_v9  ;;  %v4686_v20 = vpop.f32.mrf.mxu0 }
 0x959   :  { %v3718_v24 = vadd.f32 %v3704_v61, %v6043_v0 }
 0x95a   :  { %v3708_v35 = vpop.f32.mrf.mxu0 }
 0x95b   :  { %v3730_v46 = vsel %vm96_vm0, %v3718_v24, 0.0  ;;  %v3709_v8 = vadd.f32 %v4128_v16, %v3708_v35 }
 0x95c   :  { %3722 = vadd.xlane.f32.xlu1 %v3721_v60  ;;  %3731 = vadd.xlane.f32.xlu0 %v3730_v46  ;;  %v4689_v18 = vpop.f32.mrf.mxu0 }
 0x95d   :  { %v3719_v28 = vadd.f32 %v3709_v8, %v6052_v6 }
 0x95e   :  { %v3711_v32 = vpop.f32.mrf.mxu0 }
 0x95f   :  { %v3712_v45 = vadd.f32 %v4128_v16, %v3711_v32  ;;  %v3733_v50 = vsel %vm96_vm0, %v3719_v28, 0.0  ;;  %v4910_v16 = vld [vmem:[%s6228_s19 + $0x2c] ss:$16 sps:$4 sm:$0xff]  }
 0x960   :  { %3734 = vadd.xlane.f32.xlu1 %v3733_v50  ;;  %v4690_v62 = vpop.f32.mrf.mxu0  ;;  %3987 = vmatprep.subr.bf16.mxu1 %v4910_v16  ;;  %v4137_v50 = vld [vmem:[%s6229_s17] ss:$0 sm:$0xff]  ;;  %v3858_v16 = vlaneseq }
 0x961   :  { %v3720_v59 = vadd.f32 %v3712_v45, %v6054_v31 }
 0x963   :  { %v3736_v0 = vsel %vm96_vm0, %v3720_v59, 0.0 }
 0x964   :  { %3737 = vadd.xlane.f32.xlu0 %v3736_v0 }
 0x9dd   :  { %v3726_v3 = vpop.xlane.xlu0 %3725 }
 0x9de   :  { %v3740_v33 = vmul.f32 0.03125, %v3726_v3 }
 0x9e0   :  { %v6092_v29 = vsub.f32 %v3716_v12, %v3740_v33 }
 0x9e1   :  { %v3729_v56 = vpop.xlane.xlu1 %3728 }
 0x9e2   :  { %v3741_v25 = vmul.f32 0.03125, %v3729_v56  ;;  %v3752_v6 = vmul.f32 %v6092_v29, %v6092_v29  ;;  %v4138_v56 = vld [vmem:[%s6230_s18] ss:$0 sm:$0xff] }
 0x9e4   :  { %v6096_v48 = vsub.f32 %v3717_v22, %v3741_v25  ;;  %v3760_v43 = vsel %vm96_vm0, %v3752_v6, 0.0 }
 0x9e5   :  { %v3723_v30 = vpop.xlane.xlu1 %3722  ;;  %v3732_v34 = vpop.xlane.xlu0 %3731  ;;  %3761 = vadd.xlane.f32.xlu0 %v3760_v43 }
 0x9e6   :  { %v3739_v31 = vmul.f32 0.03125, %v3723_v30  ;;  %v3742_v40 = vmul.f32 0.03125, %v3732_v34  ;;  %v3753_v42 = vmul.f32 %v6096_v48, %v6096_v48 }
 0x9e8   :  { %v6101_v53 = vsub.f32 %v3715_v1, %v3739_v31  ;;  %v6103_v19 = vsub.f32 %v3718_v24, %v3742_v40  ;;  %v3763_v63 = vsel %vm96_vm0, %v3753_v42, 0.0 }
 0x9e9   :  { %3764 = vadd.xlane.f32.xlu1 %v3763_v63  ;;  %v3735_v49 = vpop.xlane.xlu1 %3734 }
 0x9ea   :  { %v3751_v38 = vmul.f32 %v6101_v53, %v6101_v53  ;;  %v3754_v55 = vmul.f32 %v6103_v19, %v6103_v19  ;;  %v3743_v47 = vmul.f32 0.03125, %v3735_v49 }
 0x9ec   :  { %v3757_v21 = vsel %vm96_vm0, %v3751_v38, 0.0  ;;  %v3766_v36 = vsel %vm96_vm0, %v3754_v55, 0.0  ;;  %v6112_v58 = vsub.f32 %v3719_v28, %v3743_v47 }
 0x9ed   :  { %3758 = vadd.xlane.f32.xlu1 %v3757_v21  ;;  %3767 = vadd.xlane.f32.xlu0 %v3766_v36  ;;  %v3738_v57 = vpop.xlane.xlu0 %3737 }
 0x9ee   :  { %v3744_v13 = vmul.f32 0.03125, %v3738_v57  ;;  %v3755_v27 = vmul.f32 %v6112_v58, %v6112_v58 }
 0x9f0   :  { %v6116_v39 = vsub.f32 %v3720_v59, %v3744_v13  ;;  %v3769_v7 = vsel %vm96_vm0, %v3755_v27, 0.0 }
 0x9f1   :  { %3770 = vadd.xlane.f32.xlu1 %v3769_v7 }
 0x9f2   :  { %v3756_v15 = vmul.f32 %v6116_v39, %v6116_v39 }
 0x9f4   :  { %v3772_v2 = vsel %vm96_vm0, %v3756_v15, 0.0  ;;  %v4913_v15 = vld [vmem:[%s6228_s19 + $0xc] ss:$16 sps:$4 sm:$0xff]  }
 0x9f5   :  { %3773 = vadd.xlane.f32.xlu0 %v3772_v2 }
 0xa6e   :  { %v3762_v11 = vpop.xlane.xlu0 %3761 }
 0xa6f   :  { %v3776_v17 = vmul.f32 0.03125, %v3762_v11  ;;  %v3859_v11 = vshrl.u32 %v3858_v16, 7 }
 0xa71   :  { %v3782_v12 = vadd.f32 1e-05, %v3776_v17  ;;  %v3860_v17 = vsub.s32 0, %v3859_v11 }
 0xa72   :  { %v3765_v54 = vpop.xlane.xlu1 %3764 }
 0xa73   :  { %v3777_v23 = vmul.f32 0.03125, %v3765_v54  ;;  %5022 = vrsqrt.f32 %v3782_v12  ;;  %v3856_v54 = vld [vmem:[%s6231_s20] sm:$0xf]  ;;  %v3864_v12 = vsub.s32 1, %v3859_v11 }
 0xa75   :  { %v3783_v5 = vadd.f32 1e-05, %v3777_v23  ;;  %v3861_v23 = vrot.slane %v3856_v54, %v3860_v17 }
 0xa76   :  { %v3759_v51 = vpop.xlane.xlu1 %3758  ;;  %v3768_v52 = vpop.xlane.xlu0 %3767 }
 0xa77   :  { %v3775_v37 = vmul.f32 0.03125, %v3759_v51  ;;  %v3778_v22 = vmul.f32 0.03125, %v3768_v52  ;;  %5024 = vrsqrt.f32 %v3783_v5  ;;  %v3865_v5 = vrot.slane %v3856_v54, %v3864_v12 }
 0xa79   :  { %v3781_v44 = vadd.f32 1e-05, %v3775_v37  ;;  %v3784_v61 = vadd.f32 1e-05, %v3778_v22 }
 0xa7a   :  { %v3771_v9 = vpop.xlane.xlu1 %3770 }
 0xa7b   :  { %5026 = vrsqrt.f32 %v3781_v44  ;;  %v3779_v1 = vmul.f32 0.03125, %v3771_v9 }
 0xa7c   :  { %5028 = vrsqrt.f32 %v3784_v61 }
 0xa7d   :  { %v3785_v20 = vadd.f32 1e-05, %v3779_v1 }
 0xa7e   :  { %v3774_v24 = vpop.xlane.xlu0 %3773 }
 0xa7f   :  { %v3780_v35 = vmul.f32 0.03125, %v3774_v24  ;;  %5030 = vrsqrt.f32 %v3785_v20  ;;  %v3868_v24 = vsub.s32 2, %v3859_v11 }
 0xa80   :  { %v5023_v46 = vpop.eup %5022 }
 0xa81   :  { %v3786_v60 = vadd.f32 1e-05, %v3780_v35  ;;  %v3794_v28 = vmul.f32 %v5023_v46, %v6092_v29  ;;  %v3872_v46 = vsub.s32 3, %v3859_v11 }
 0xa83   :  { %5032 = vrsqrt.f32 %v3786_v60  ;;  %v3807_v0 = vmul.f32 %v4137_v50, %v3794_v28 }
 0xa84   :  { %v5025_v8 = vpop.eup %5024 }
 0xa85   :  { %v3795_v32 = vmul.f32 %v5025_v8, %v6096_v48  ;;  %v3820_v6 = vadd.f32 %v4138_v56, %v3807_v0 }
 0xa87   :  { %v3808_v3 = vmul.f32 %v4137_v50, %v3795_v32  ;;  %v3826_v42 = vrot.slane %v3820_v6, 4  ;;  %v3873_v32 = vrot.slane %v3856_v54, %v3872_v46 }
 0xa88   :  { %v5027_v18 = vpop.eup %5026 }
 0xa89   :  { %v5029_v45 = vpop.eup %5028  ;;  %v3793_v62 = vmul.f32 %v5027_v18, %v6101_v53  ;;  %v3821_v48 = vadd.f32 %v4138_v56, %v3808_v3  ;;  %v3869_v18 = vrot.slane %v3856_v54, %v3868_v24 }
 0xa8a   :  { %v3796_v59 = vmul.f32 %v5029_v45, %v6103_v19 }
 0xa8b   :  { %v3806_v25 = vmul.f32 %v4137_v50, %v3793_v62  ;;  %v3838_v53 = vrot.slane %v3821_v48, 4 }
 0xa8c   :  { %v3809_v33 = vmul.f32 %v4137_v50, %v3796_v59  ;;  %v5031_v29 = vpop.eup %5030 }
 0xa8d   :  { %v3819_v34 = vadd.f32 %v4138_v56, %v3806_v25  ;;  %v3797_v31 = vmul.f32 %v5031_v29, %v6112_v58 }
 0xa8e   :  { %v3822_v43 = vadd.f32 %v4138_v56, %v3809_v33 }
 0xa8f   :  { %v3834_v49 = vsel %vm160_vm2, %v3819_v34, %v3826_v42  ;;  %v3840_v38 = vsel %vm160_vm2, %v3838_v53, %v3819_v34  ;;  %v3810_v55 = vmul.f32 %v4137_v50, %v3797_v31 }
 0xa90   :  { %v5033_v30 = vpop.eup %5032  ;;  %v3829_v19 = vrot.slane %v3822_v43, 4  ;;  %v3843_v13 = vadd.f32 %v3840_v38, %v3834_v49 }
 0xa91   :  { %v3798_v40 = vmul.f32 %v5033_v30, %v6116_v39  ;;  %v3823_v58 = vadd.f32 %v4138_v56, %v3810_v55  ;;  %v4908_v39 = vld [vmem:[%s6228_s19 + $0x28] ss:$16 sps:$4 sm:$0xff]  }
 0xa92   :  { %v3835_v21 = vsel %vm160_vm2, %v3821_v48, %v3829_v19 }
 0xa93   :  { %v3811_v63 = vmul.f32 %v4137_v50, %v3798_v40  ;;  %v3842_v10 = vsel %vm160_vm2, %v3829_v19, %v3823_v58 }
 0xa95   :  { %v3824_v47 = vadd.f32 %v4138_v56, %v3811_v63 }
 0xa97   :  { %v3841_v36 = vsel %vm160_vm2, %v3826_v42, %v3824_v47  ;;  %v3832_v57 = vrot.slane %v3824_v47, 4 }
 0xa98   :  { %v3844_v27 = vadd.f32 %v3841_v36, %v3835_v21 }
 0xa99   :  { %v3836_v2 = vsel %vm160_vm2, %v3823_v58, %v3832_v57 }
 0xa9a   :  { %v3846_v7 = vpack.c.bf16 %v3844_v27, %v3843_v13  ;;  %v3845_v14 = vadd.f32 %v3842_v10, %v3836_v2 }
 0xa9c   :  { %4147 = vmatmul.mubr.msk.bf16.vlgmr.msra.gmra.mxu1 %vm96_vm0, %v3846_v7  ;;  %v3847_v26 = vpack.c.bf16 %v3845_v14, %v3845_v14 }
 0xa9d   :  { %3966 = vmatprep.mubr.bf16.mxu1 %v5042_v4  ;;  %3988 = vmatpush1.bf16.msra.mxu1 %v4908_v39 }
 0xa9e   :  { %3989 = vmatprep.subr.bf16.mxu1 %v4913_v15 }
 0xaa1   :  { %3990 = vmatpush1.bf16.msra.mxu1 %v4911_v41 }
 0xaa4   :  { %4148 = vmatmul.mubr.msk.bf16.gmra.mxu1 %vm96_vm0, %v3847_v26 }
 0xaa5   :  { %4007 = vmatprep.mubr.bf16.mxu1 %v5042_v4 }
 0xaac   :  { %4149 = vmatmul.mubr.msk.bf16.vlgmr.msra.gmra.mxu1 %vm96_vm0, %v3846_v7 }
 0xaad   :  { %4017 = vmatprep.mubr.bf16.mxu1 %v5042_v4 }
 0xab4   :  { %4150 = vmatmul.mubr.msk.bf16.gmra.mxu1 %vm96_vm0, %v3847_v26 }
 0xb5c   :  { %v3958_v51 = vpop.f32.mrf.mxu1 }
 0xb5d   :  { %v3959_v52 = vadd.f32 %v3958_v51, %v3861_v23 }
 0xb5e   :  { %v3960_v37 = vpop.f32.mrf.mxu1 }
 0xb5f   :  { %4026 = vst [vmem:[%s6232_s21] sm:$0xff] %v3959_v52  ;;  %v3961_v4 = vadd.f32 %v3960_v37, %v3865_v5 }
 0xb60   :  { %v3962_v22 = vpop.f32.mrf.mxu1 }
 0xb61   :  { %4027 = vst [vmem:[%s6232_s21 + $0x8] sm:$0xff] %v3961_v4  ;;  %v3963_v44 = vadd.f32 %v3962_v22, %v3861_v23 }
 0xb62   :  { %v3964_v61 = vpop.f32.mrf.mxu1 }
 0xb63   :  { %4030 = vst [vmem:[%s6232_s21 + $0x20] sm:$0xff] %v3963_v44  ;;  %v3965_v9 = vadd.f32 %v3964_v61, %v3865_v5 }
 0xb64   :  { %v3968_v1 = vpop.f32.mrf.mxu1 }
 0xb65   :  { %4031 = vst [vmem:[%s6232_s21 + $0x28] sm:$0xff] %v3965_v9  ;;  %v3969_v20 = vadd.f32 %v3968_v1, %v3861_v23 }
 0xb66   :  { %v3970_v35 = vpop.f32.mrf.mxu1 }
 0xb67   :  { %4034 = vst [vmem:[%s6232_s21 + $0x40] sm:$0xff] %v3969_v20  ;;  %v3971_v60 = vadd.f32 %v3970_v35, %v3865_v5 }
 0xb68   :  { %v3972_v8 = vpop.f32.mrf.mxu1 }
 0xb69   :  { %4035 = vst [vmem:[%s6232_s21 + $0x48] sm:$0xff] %v3971_v60 }
 0xb6a   :  { %v3973_v28 = vpop.f32.mrf.mxu1 }
 0xb6c   :  { %v4009_v45 = vpop.f32.mrf.mxu1 }
 0xb6d   :  { %v4010_v50 = vadd.f32 %v4009_v45, %v3869_v18 }
 0xb6e   :  { %v4011_v62 = vpop.f32.mrf.mxu1 }
 0xb6f   :  { %4028 = vst [vmem:[%s6232_s21 + $0x10] sm:$0xff] %v4010_v50  ;;  %v4012_v59 = vadd.f32 %v4011_v62, %v3873_v32 }
 0xb70   :  { %v4013_v0 = vpop.f32.mrf.mxu1 }
 0xb71   :  { %4029 = vst [vmem:[%s6232_s21 + $0x18] sm:$0xff] %v4012_v59  ;;  %v4014_v3 = vadd.f32 %v4013_v0, %v3869_v18 }
 0xb72   :  { %v4015_v33 = vpop.f32.mrf.mxu1 }
 0xb73   :  { %4032 = vst [vmem:[%s6232_s21 + $0x30] sm:$0xff] %v4014_v3  ;;  %v4016_v56 = vadd.f32 %v4015_v33, %v3873_v32 }
 0xb74   :  { %v4019_v25 = vpop.f32.mrf.mxu1 }
 0xb75   :  { %4033 = vst [vmem:[%s6232_s21 + $0x38] sm:$0xff] %v4016_v56  ;;  %v4020_v29 = vadd.f32 %v4019_v25, %v3869_v18 }
 0xb76   :  { %v4021_v6 = vpop.f32.mrf.mxu1 }
 0xb77   :  { %4036 = vst [vmem:[%s6232_s21 + $0x50] sm:$0xff] %v4020_v29  ;;  %v4022_v48 = vadd.f32 %v4021_v6, %v3873_v32 }
 0xb78   :  { %v4023_v43 = vpop.f32.mrf.mxu1 }
 0xb79   :  { %4037 = vst [vmem:[%s6232_s21 + $0x58] sm:$0xff] %v4022_v48 }
 0xb7a   :  { %v4024_v30 = vpop.f32.mrf.mxu1 }

</bundles_post_ra>
